<compile_context>
chip_gen: v7x
topology: tpu7x:2x2x1
jax: 0.10.0
libtpu: 0.0.40
codegen_flags: <defaults>
</compile_context>

<pallas_src>
import jax
import jax.numpy as jnp
from jax import lax
from jax.experimental import pallas as pl
from jax.experimental.pallas import tpu as pltpu


# ----------------------------- kernel helpers (traced inside the kernel) ----

def _conv3x3_prelu(x, w_taps, b, alpha):
    """3x3 VALID conv + PReLU in (H, C, W) layout.

    x:       (Hin, Cin, Win) activation (rows leading, channels on sublanes,
                                          width on lanes).
    w_taps:  (9, Cout, Cin)  per-tap weight matrices, tap index = 3*kh + kw.
    b/alpha: (1, Cout, 1)    bias / PReLU slope.
    Returns (Hin-2, Cout, Win-2).

    Each tap is one batched matmul over output rows, so no 9x im2col patch
    tensor is materialised (decisive for VMEM once row-band tiling is added).
    """
    Hin, Cin, Win = x.shape
    Cout = w_taps.shape[1]
    Ho, Wo = Hin - 2, Win - 2
    acc = None
    for kh in range(3):
        for kw in range(3):
            tap = x[kh:kh + Ho, :, kw:kw + Wo]                        # (Ho,Cin,Wo)
            w_b = jnp.broadcast_to(w_taps[3 * kh + kw][None],
                                   (Ho, Cout, Cin))                   # (Ho,Cout,Cin)
            part = lax.dot_general(
                w_b, tap,
                dimension_numbers=(((2,), (1,)), ((0,), (0,))),
                preferred_element_type=jnp.float32)                   # (Ho,Cout,Wo)
            acc = part if acc is None else acc + part
    y = acc + b
    return jnp.where(y > 0.0, y, y * alpha)                           # PReLU


def _maxpool2x2_ceil(y):
    """MaxPool2d(kernel=2, stride=2, ceil_mode=True) in (H, C, W) layout."""
    Hv, C, Wv = y.shape
    Hp, Wp = -(-Hv // 2), -(-Wv // 2)

    # H direction: rows are on the leading axis -> free reshape + max.
    He = (Hv // 2) * 2
    ph = jnp.max(y[:He].reshape(Hv // 2, 2, C, Wv), axis=1)           # (Hv//2,C,Wv)
    if Hv % 2:                                                        # ragged row
        ph = jnp.concatenate([ph, y[He:]], axis=0)                    # (Hp,C,Wv)

    # W direction: width is on the lane axis; pair-max via two exact 0/1
    # column-selection matmuls (even/odd columns) on the MXU — no lane-dim
    # reshape.  For odd Wv the odd selector duplicates the last even column
    # (max(v, v) == v), matching ceil_mode's partial-window semantics.
    rows = lax.broadcasted_iota(jnp.int32, (Wv, Wp), 0)
    cols = lax.broadcasted_iota(jnp.int32, (Wv, Wp), 1)
    s_even = (rows == 2 * cols).astype(jnp.float32)
    s_odd = (rows == jnp.minimum(2 * cols + 1, Wv - 1)).astype(jnp.float32)
    flat = ph.reshape(Hp * C, Wv)
    pooled = jnp.maximum(
        jnp.dot(flat, s_even, preferred_element_type=jnp.float32),
        jnp.dot(flat, s_odd, preferred_element_type=jnp.float32))     # (Hp*C,Wp)
    return pooled.reshape(Hp, C, Wp)


# ----------------------------- the fused Pallas kernel ----------------------

def pnet_kernel(x_ref, w1_ref, w2_ref, w3_ref, w46_ref, scal_ref, b_ref, a_ref):
    x = x_ref[0]                                                      # (3, H, W)

    # NCHW -> (H, 3, W): channels to sublanes, width stays on lanes.
    x_hcw = jnp.concatenate([x[c][:, None, :] for c in range(3)], axis=1)

    b1, a1 = scal_ref[0:10, 0:1][None], scal_ref[0:10, 1:2][None]
    y = _conv3x3_prelu(x_hcw, w1_ref[...], b1, a1)                    # (H1, 10, W1)

    y = _maxpool2x2_ceil(y)                                           # (Hp, 10, Wp)

    b2, a2 = scal_ref[0:16, 2:3][None], scal_ref[0:16, 3:4][None]
    y = _conv3x3_prelu(y, w2_ref[...], b2, a2)                        # (H2, 16, W2)

    b3, a3 = scal_ref[0:32, 4:5][None], scal_ref[0:32, 5:6][None]
    feat = _conv3x3_prelu(y, w3_ref[...], b3, a3)                     # (H3, 32, W3)
    H3 = feat.shape[0]

    # Fused 1x1 head: rows 0:4 -> conv4_2 (bbox), rows 4:6 -> conv4_1 (logits).
    w46 = jnp.broadcast_to(w46_ref[...][None], (H3, 6, 32))
    b46 = scal_ref[0:6, 6:7][None]
    head = lax.dot_general(
        w46, feat, dimension_numbers=(((2,), (1,)), ((0,), (0,))),
        preferred_element_type=jnp.float32) + b46                     # (H3, 6, W3)

    # 2-class softmax as two sigmoids: no cross-channel reductions; exp and
    # the approximate reciprocal both run on the EUP (free VLIW slot).
    l0, l1 = head[:, 4:5, :], head[:, 5:6, :]
    d = jnp.concatenate([l0 - l1, l1 - l0], axis=1)                   # (H3, 2, W3)
    probs = pl.reciprocal(1.0 + jnp.exp(-d), approx=True)             # [p0, p1]

    b_ref[0] = head[:, 0:4, :]                                        # conv4_2
    a_ref[0] = probs                                                  # softmax(conv4_1)


# ----------------------------- wrappers --------------------------------------

def _taps(w_hwio):
    """(3,3,Cin,Cout) HWIO conv weight -> (9, Cout, Cin) per-tap matrices."""
    kh, kw, cin, cout = w_hwio.shape
    return jnp.transpose(w_hwio, (0, 1, 3, 2)).reshape(kh * kw, cout, cin)


def _full_spec(shape):
    zeros = (0,) * len(shape)
    return pl.BlockSpec(shape, lambda n, _z=zeros: _z)


def _vmem_limit_bytes():
    """Per-generation scoped-VMEM budget (v7x has only 64 MiB per TensorCore)."""
    cap = 128 * 1024 * 1024
    try:
        cap = int(getattr(pltpu.get_tpu_info(), "vmem_capacity_bytes", cap))
    except Exception:
        pass
    return min(cap // 2, 48 * 1024 * 1024)


def pnet_forward(x_nchw, p):
    """Torch-compatible entry point: x in NCHW float32, returns (b, a) NCHW."""
    x = x_nchw.astype(jnp.float32)
    N, C, H, W = x.shape
    assert C == 3 and H >= 12 and W >= 12
    H1, W1 = H - 2, W - 2
    Hp, Wp = -(-H1 // 2), -(-W1 // 2)
    H2, W2 = Hp - 2, Wp - 2
    H3, W3 = H2 - 2, W2 - 2

    # Per-tap conv weights; fused 1x1 head [bbox | cls].
    w1t, w2t, w3t = _taps(p["w1"]), _taps(p["w2"]), _taps(p["w3"])
    w46 = jnp.concatenate([p["w42"].T, p["w41"].T], axis=0)           # (6, 32)

    # All biases / PReLU slopes packed into one small (32, 8) block.
    scal = jnp.zeros((32, 8), jnp.float32)
    scal = scal.at[:10, 0].set(p["b1"][0]).at[:10, 1].set(p["a1"][0])
    scal = scal.at[:16, 2].set(p["b2"][0]).at[:16, 3].set(p["a2"][0])
    scal = scal.at[:32, 4].set(p["b3"][0]).at[:32, 5].set(p["a3"][0])
    scal = scal.at[:4, 6].set(p["b42"][0]).at[4:6, 6].set(p["b41"][0])

    args = (x, w1t, w2t, w3t, w46, scal)
    in_specs = [pl.BlockSpec((1, 3, H, W), lambda n: (n, 0, 0, 0))]
    in_specs += [_full_spec(a.shape) for a in args[1:]]
    out_shape = (jax.ShapeDtypeStruct((N, H3, 4, W3), jnp.float32),
                 jax.ShapeDtypeStruct((N, H3, 2, W3), jnp.float32))
    out_specs = [pl.BlockSpec((1, H3, 4, W3), lambda n: (n, 0, 0, 0)),
                 pl.BlockSpec((1, H3, 2, W3), lambda n: (n, 0, 0, 0))]

    bT, aT = pl.pallas_call(
        pnet_kernel,
        out_shape=out_shape,
        grid_spec=pltpu.PrefetchScalarGridSpec(
            num_scalar_prefetch=0,
            grid=(N,),
            in_specs=in_specs,
            out_specs=out_specs),
        compiler_params=pltpu.CompilerParams(
            dimension_semantics=("parallel",),
            vmem_limit_bytes=_vmem_limit_bytes()),
    )(*args)

    # Kernel emits lane-dense (N, H3, C, W3); a tiny XLA transpose of the head
    # output (the smallest tensor in the net) restores torch NCHW order.
    return jnp.transpose(bT, (0, 2, 1, 3)), jnp.transpose(aT, (0, 2, 1, 3))


# ----------------------------- deterministic synthetic parameters ------------

def init_params(key):
    ks = jax.random.split(key, 16)

    def w(k, shape, scale=0.1):
        return (scale * jax.random.normal(k, shape)).astype(jnp.float32)

    return dict(
        w1=w(ks[0], (3, 3, 3, 10)),  b1=w(ks[1], (1, 10)),
        a1=(0.25 + 0.05 * jax.random.normal(ks[2], (1, 10))).astype(jnp.float32),
        w2=w(ks[3], (3, 3, 10, 16)), b2=w(ks[4], (1, 16)),
        a2=(0.25 + 0.05 * jax.random.normal(ks[5], (1, 16))).astype(jnp.float32),
        w3=w(ks[6], (3, 3, 16, 32)), b3=w(ks[7], (1, 32)),
        a3=(0.25 + 0.05 * jax.random.normal(ks[8], (1, 32))).astype(jnp.float32),
        w41=w(ks[9], (32, 2)),  b41=w(ks[10], (1, 2)),
        w42=w(ks[11], (32, 4)), b42=w(ks[12], (1, 4)),
    )


# ----------------------------- pure-JAX reference (correctness check) --------

def pnet_reference(x_nchw, p):
    x = jnp.transpose(x_nchw, (0, 2, 3, 1)).astype(jnp.float32)

    def conv(x, w, b):
        y = lax.conv_general_dilated(
            x, w, window_strides=(1, 1), padding="VALID",
            dimension_numbers=("NHWC", "HWIO", "NHWC"),
            precision=lax.Precision.HIGHEST)
        return y + b[0]

    def prelu(y, a):
        return jnp.where(y > 0, y, y * a[0])

    y = prelu(conv(x, p["w1"], p["b1"]), p["a1"])
    N, H, W, C = y.shape
    ph, pw = (-H) % 2, (-W) % 2
    yp = jnp.pad(y, ((0, 0), (0, ph), (0, pw), (0, 0)), constant_values=-jnp.inf)
    y = lax.reduce_window(yp, -jnp.inf, lax.max, (1, 2, 2, 1), (1, 2, 2, 1), "VALID")
    y = prelu(conv(y, p["w2"], p["b2"]), p["a2"])
    y = prelu(conv(y, p["w3"], p["b3"]), p["a3"])
    logits = jnp.einsum("nhwc,cd->nhwd", y, p["w41"],
                        precision=lax.Precision.HIGHEST) + p["b41"][0]
    a = jax.nn.softmax(logits, axis=-1)
    b = jnp.einsum("nhwc,cd->nhwd", y, p["w42"],
                   precision=lax.Precision.HIGHEST) + p["b42"][0]
    return jnp.transpose(b, (0, 3, 1, 2)), jnp.transpose(a, (0, 3, 1, 2))


# ----------------------------- main ------------------------------------------

if __name__ == "__main__":
    params = init_params(jax.random.PRNGKey(1))

    # Even square batch-2 input AND an odd non-square input so both ceil_mode
    # pooling paths (ragged H, ragged W) are exercised.
    for shape in [(2, 3, 16, 16), (1, 3, 17, 21)]:
        x = jax.random.normal(jax.random.PRNGKey(0), shape, dtype=jnp.float32)
        b, a = pnet_forward(x, params)
        jax.block_until_ready((b, a))

        b_ref, a_ref = pnet_reference(x, params)
        assert b.shape == b_ref.shape and a.shape == a_ref.shape, (b.shape, a.shape)
        # 2e-3 tolerance: f32 MXU matmuls + EUP approx reciprocal in the
        # sigmoid-form softmax (error ~1e-4, well inside budget).
        assert jnp.allclose(b, b_ref, atol=2e-3, rtol=2e-3), "bbox mismatch"
        assert jnp.allclose(a, a_ref, atol=2e-3, rtol=2e-3), "prob mismatch"

    print("KERNEL_OK")
</pallas_src>

<mosaic_0001>
module attributes {stable_mosaic.version = 11 : i64} {
  func.func @pnet_kernel(%arg0: i32, %arg1: memref<1x3x16x16xf32, #tpu.memory_space<vmem>>, %arg2: memref<9x10x3xf32, #tpu.memory_space<vmem>>, %arg3: memref<9x16x10xf32, #tpu.memory_space<vmem>>, %arg4: memref<9x32x16xf32, #tpu.memory_space<vmem>>, %arg5: memref<6x32xf32, #tpu.memory_space<vmem>>, %arg6: memref<32x8xf32, #tpu.memory_space<vmem>>, %arg7: memref<1x3x4x3xf32, #tpu.memory_space<vmem>>, %arg8: memref<1x3x2x3xf32, #tpu.memory_space<vmem>>) attributes {dimension_semantics = [#tpu.dimension_semantics<parallel>], iteration_bounds = array<i64: 2>, scalar_prefetch = 0 : i64, scratch_operands = 0 : i64, tpu.core_type = #tpu.core_type<tc>, window_params = [{transform_indices = @transform_0, window_bounds = array<i64: 1, 3, 16, 16>}, {pipeline_mode = #tpu.pipeline_mode<synchronous>, transform_indices = @transform_1, window_bounds = array<i64: 9, 10, 3>}, {pipeline_mode = #tpu.pipeline_mode<synchronous>, transform_indices = @transform_2, window_bounds = array<i64: 9, 16, 10>}, {pipeline_mode = #tpu.pipeline_mode<synchronous>, transform_indices = @transform_3, window_bounds = array<i64: 9, 32, 16>}, {pipeline_mode = #tpu.pipeline_mode<synchronous>, transform_indices = @transform_4, window_bounds = array<i64: 6, 32>}, {pipeline_mode = #tpu.pipeline_mode<synchronous>, transform_indices = @transform_5, window_bounds = array<i64: 32, 8>}, {transform_indices = @transform_6, window_bounds = array<i64: 1, 3, 4, 3>}, {transform_indices = @transform_7, window_bounds = array<i64: 1, 3, 2, 3>}]} {
    %c0 = arith.constant 0 : index
    %c0_0 = arith.constant 0 : index
    %c0_1 = arith.constant 0 : index
    %c0_2 = arith.constant 0 : index
    %0 = vector.load %arg1[%c0, %c0_0, %c0_1, %c0_2] : memref<1x3x16x16xf32, #tpu.memory_space<vmem>>, vector<1x3x16x16xf32>
    %1 = vector.shape_cast %0 : vector<1x3x16x16xf32> to vector<3x16x16xf32>
    %2 = vector.extract_strided_slice %1 {offsets = [0, 0, 0], sizes = [1, 16, 16], strides = [1, 1, 1]} : vector<3x16x16xf32> to vector<1x16x16xf32>
    %3 = vector.shape_cast %2 : vector<1x16x16xf32> to vector<16x16xf32>
    %4 = vector.shape_cast %3 : vector<16x16xf32> to vector<16x1x16xf32>
    %5 = vector.extract_strided_slice %1 {offsets = [1, 0, 0], sizes = [1, 16, 16], strides = [1, 1, 1]} : vector<3x16x16xf32> to vector<1x16x16xf32>
    %6 = vector.shape_cast %5 : vector<1x16x16xf32> to vector<16x16xf32>
    %7 = vector.shape_cast %6 : vector<16x16xf32> to vector<16x1x16xf32>
    %8 = vector.extract_strided_slice %1 {offsets = [2, 0, 0], sizes = [1, 16, 16], strides = [1, 1, 1]} : vector<3x16x16xf32> to vector<1x16x16xf32>
    %9 = vector.shape_cast %8 : vector<1x16x16xf32> to vector<16x16xf32>
    %10 = vector.shape_cast %9 : vector<16x16xf32> to vector<16x1x16xf32>
    %11 = tpu.concatenate %4, %7, %10 in 1 : vector<16x1x16xf32>, vector<16x1x16xf32>, vector<16x1x16xf32> -> vector<16x3x16xf32>
    %c0_3 = arith.constant 0 : index
    %c0_4 = arith.constant 0 : index
    %12 = vector.load %arg6[%c0_3, %c0_4] : memref<32x8xf32, #tpu.memory_space<vmem>>, vector<10x1xf32>
    %13 = vector.shape_cast %12 : vector<10x1xf32> to vector<1x10x1xf32>
    %c0_5 = arith.constant 0 : index
    %c1 = arith.constant 1 : index
    %14 = vector.load %arg6[%c0_5, %c1] : memref<32x8xf32, #tpu.memory_space<vmem>>, vector<10x1xf32>
    %15 = vector.shape_cast %14 : vector<10x1xf32> to vector<1x10x1xf32>
    %c0_6 = arith.constant 0 : index
    %c0_7 = arith.constant 0 : index
    %c0_8 = arith.constant 0 : index
    %16 = vector.load %arg2[%c0_6, %c0_7, %c0_8] : memref<9x10x3xf32, #tpu.memory_space<vmem>>, vector<9x10x3xf32>
    %17 = vector.extract_strided_slice %11 {offsets = [0, 0, 0], sizes = [14, 3, 14], strides = [1, 1, 1]} : vector<16x3x16xf32> to vector<14x3x14xf32>
    %18 = vector.extract_strided_slice %16 {offsets = [0, 0, 0], sizes = [1, 10, 3], strides = [1, 1, 1]} : vector<9x10x3xf32> to vector<1x10x3xf32>
    %19 = vector.shape_cast %18 : vector<1x10x3xf32> to vector<10x3xf32>
    %20 = vector.shape_cast %19 : vector<10x3xf32> to vector<1x10x3xf32>
    %21 = vector.shape_cast %20 : vector<1x10x3xf32> to vector<1x10x3xf32>
    %22 = vector.broadcast %21 : vector<1x10x3xf32> to vector<14x10x3xf32>
    %cst = arith.constant dense<0.000000e+00> : vector<14x10x14xf32>
    %23 = tpu.matmul %22, %17, %cst {dimension_numbers = #tpu.dot_dimension_numbers<[2], [1], [1], [2], [0, 0, 0, 1, 1, 2], [0], [0]>} : vector<14x10x3xf32>, vector<14x3x14xf32>, vector<14x10x14xf32> -> vector<14x10x14xf32>
    %24 = vector.extract_strided_slice %11 {offsets = [0, 0, 1], sizes = [14, 3, 14], strides = [1, 1, 1]} : vector<16x3x16xf32> to vector<14x3x14xf32>
    %25 = vector.extract_strided_slice %16 {offsets = [1, 0, 0], sizes = [1, 10, 3], strides = [1, 1, 1]} : vector<9x10x3xf32> to vector<1x10x3xf32>
    %26 = vector.shape_cast %25 : vector<1x10x3xf32> to vector<10x3xf32>
    %27 = vector.shape_cast %26 : vector<10x3xf32> to vector<1x10x3xf32>
    %28 = vector.shape_cast %27 : vector<1x10x3xf32> to vector<1x10x3xf32>
    %29 = vector.broadcast %28 : vector<1x10x3xf32> to vector<14x10x3xf32>
    %cst_9 = arith.constant dense<0.000000e+00> : vector<14x10x14xf32>
    %30 = tpu.matmul %29, %24, %cst_9 {dimension_numbers = #tpu.dot_dimension_numbers<[2], [1], [1], [2], [0, 0, 0, 1, 1, 2], [0], [0]>} : vector<14x10x3xf32>, vector<14x3x14xf32>, vector<14x10x14xf32> -> vector<14x10x14xf32>
    %31 = arith.addf %23, %30 : vector<14x10x14xf32>
    %32 = vector.extract_strided_slice %11 {offsets = [0, 0, 2], sizes = [14, 3, 14], strides = [1, 1, 1]} : vector<16x3x16xf32> to vector<14x3x14xf32>
    %33 = vector.extract_strided_slice %16 {offsets = [2, 0, 0], sizes = [1, 10, 3], strides = [1, 1, 1]} : vector<9x10x3xf32> to vector<1x10x3xf32>
    %34 = vector.shape_cast %33 : vector<1x10x3xf32> to vector<10x3xf32>
    %35 = vector.shape_cast %34 : vector<10x3xf32> to vector<1x10x3xf32>
    %36 = vector.shape_cast %35 : vector<1x10x3xf32> to vector<1x10x3xf32>
    %37 = vector.broadcast %36 : vector<1x10x3xf32> to vector<14x10x3xf32>
    %cst_10 = arith.constant dense<0.000000e+00> : vector<14x10x14xf32>
    %38 = tpu.matmul %37, %32, %cst_10 {dimension_numbers = #tpu.dot_dimension_numbers<[2], [1], [1], [2], [0, 0, 0, 1, 1, 2], [0], [0]>} : vector<14x10x3xf32>, vector<14x3x14xf32>, vector<14x10x14xf32> -> vector<14x10x14xf32>
    %39 = arith.addf %31, %38 : vector<14x10x14xf32>
    %40 = vector.extract_strided_slice %11 {offsets = [1, 0, 0], sizes = [14, 3, 14], strides = [1, 1, 1]} : vector<16x3x16xf32> to vector<14x3x14xf32>
    %41 = vector.extract_strided_slice %16 {offsets = [3, 0, 0], sizes = [1, 10, 3], strides = [1, 1, 1]} : vector<9x10x3xf32> to vector<1x10x3xf32>
    %42 = vector.shape_cast %41 : vector<1x10x3xf32> to vector<10x3xf32>
    %43 = vector.shape_cast %42 : vector<10x3xf32> to vector<1x10x3xf32>
    %44 = vector.shape_cast %43 : vector<1x10x3xf32> to vector<1x10x3xf32>
    %45 = vector.broadcast %44 : vector<1x10x3xf32> to vector<14x10x3xf32>
    %cst_11 = arith.constant dense<0.000000e+00> : vector<14x10x14xf32>
    %46 = tpu.matmul %45, %40, %cst_11 {dimension_numbers = #tpu.dot_dimension_numbers<[2], [1], [1], [2], [0, 0, 0, 1, 1, 2], [0], [0]>} : vector<14x10x3xf32>, vector<14x3x14xf32>, vector<14x10x14xf32> -> vector<14x10x14xf32>
    %47 = arith.addf %39, %46 : vector<14x10x14xf32>
    %48 = vector.extract_strided_slice %11 {offsets = [1, 0, 1], sizes = [14, 3, 14], strides = [1, 1, 1]} : vector<16x3x16xf32> to vector<14x3x14xf32>
    %49 = vector.extract_strided_slice %16 {offsets = [4, 0, 0], sizes = [1, 10, 3], strides = [1, 1, 1]} : vector<9x10x3xf32> to vector<1x10x3xf32>
    %50 = vector.shape_cast %49 : vector<1x10x3xf32> to vector<10x3xf32>
    %51 = vector.shape_cast %50 : vector<10x3xf32> to vector<1x10x3xf32>
    %52 = vector.shape_cast %51 : vector<1x10x3xf32> to vector<1x10x3xf32>
    %53 = vector.broadcast %52 : vector<1x10x3xf32> to vector<14x10x3xf32>
    %cst_12 = arith.constant dense<0.000000e+00> : vector<14x10x14xf32>
    %54 = tpu.matmul %53, %48, %cst_12 {dimension_numbers = #tpu.dot_dimension_numbers<[2], [1], [1], [2], [0, 0, 0, 1, 1, 2], [0], [0]>} : vector<14x10x3xf32>, vector<14x3x14xf32>, vector<14x10x14xf32> -> vector<14x10x14xf32>
    %55 = arith.addf %47, %54 : vector<14x10x14xf32>
    %56 = vector.extract_strided_slice %11 {offsets = [1, 0, 2], sizes = [14, 3, 14], strides = [1, 1, 1]} : vector<16x3x16xf32> to vector<14x3x14xf32>
    %57 = vector.extract_strided_slice %16 {offsets = [5, 0, 0], sizes = [1, 10, 3], strides = [1, 1, 1]} : vector<9x10x3xf32> to vector<1x10x3xf32>
    %58 = vector.shape_cast %57 : vector<1x10x3xf32> to vector<10x3xf32>
    %59 = vector.shape_cast %58 : vector<10x3xf32> to vector<1x10x3xf32>
    %60 = vector.shape_cast %59 : vector<1x10x3xf32> to vector<1x10x3xf32>
    %61 = vector.broadcast %60 : vector<1x10x3xf32> to vector<14x10x3xf32>
    %cst_13 = arith.constant dense<0.000000e+00> : vector<14x10x14xf32>
    %62 = tpu.matmul %61, %56, %cst_13 {dimension_numbers = #tpu.dot_dimension_numbers<[2], [1], [1], [2], [0, 0, 0, 1, 1, 2], [0], [0]>} : vector<14x10x3xf32>, vector<14x3x14xf32>, vector<14x10x14xf32> -> vector<14x10x14xf32>
    %63 = arith.addf %55, %62 : vector<14x10x14xf32>
    %64 = vector.extract_strided_slice %11 {offsets = [2, 0, 0], sizes = [14, 3, 14], strides = [1, 1, 1]} : vector<16x3x16xf32> to vector<14x3x14xf32>
    %65 = vector.extract_strided_slice %16 {offsets = [6, 0, 0], sizes = [1, 10, 3], strides = [1, 1, 1]} : vector<9x10x3xf32> to vector<1x10x3xf32>
    %66 = vector.shape_cast %65 : vector<1x10x3xf32> to vector<10x3xf32>
    %67 = vector.shape_cast %66 : vector<10x3xf32> to vector<1x10x3xf32>
    %68 = vector.shape_cast %67 : vector<1x10x3xf32> to vector<1x10x3xf32>
    %69 = vector.broadcast %68 : vector<1x10x3xf32> to vector<14x10x3xf32>
    %cst_14 = arith.constant dense<0.000000e+00> : vector<14x10x14xf32>
    %70 = tpu.matmul %69, %64, %cst_14 {dimension_numbers = #tpu.dot_dimension_numbers<[2], [1], [1], [2], [0, 0, 0, 1, 1, 2], [0], [0]>} : vector<14x10x3xf32>, vector<14x3x14xf32>, vector<14x10x14xf32> -> vector<14x10x14xf32>
    %71 = arith.addf %63, %70 : vector<14x10x14xf32>
    %72 = vector.extract_strided_slice %11 {offsets = [2, 0, 1], sizes = [14, 3, 14], strides = [1, 1, 1]} : vector<16x3x16xf32> to vector<14x3x14xf32>
    %73 = vector.extract_strided_slice %16 {offsets = [7, 0, 0], sizes = [1, 10, 3], strides = [1, 1, 1]} : vector<9x10x3xf32> to vector<1x10x3xf32>
    %74 = vector.shape_cast %73 : vector<1x10x3xf32> to vector<10x3xf32>
    %75 = vector.shape_cast %74 : vector<10x3xf32> to vector<1x10x3xf32>
    %76 = vector.shape_cast %75 : vector<1x10x3xf32> to vector<1x10x3xf32>
    %77 = vector.broadcast %76 : vector<1x10x3xf32> to vector<14x10x3xf32>
    %cst_15 = arith.constant dense<0.000000e+00> : vector<14x10x14xf32>
    %78 = tpu.matmul %77, %72, %cst_15 {dimension_numbers = #tpu.dot_dimension_numbers<[2], [1], [1], [2], [0, 0, 0, 1, 1, 2], [0], [0]>} : vector<14x10x3xf32>, vector<14x3x14xf32>, vector<14x10x14xf32> -> vector<14x10x14xf32>
    %79 = arith.addf %71, %78 : vector<14x10x14xf32>
    %80 = vector.extract_strided_slice %11 {offsets = [2, 0, 2], sizes = [14, 3, 14], strides = [1, 1, 1]} : vector<16x3x16xf32> to vector<14x3x14xf32>
    %81 = vector.extract_strided_slice %16 {offsets = [8, 0, 0], sizes = [1, 10, 3], strides = [1, 1, 1]} : vector<9x10x3xf32> to vector<1x10x3xf32>
    %82 = vector.shape_cast %81 : vector<1x10x3xf32> to vector<10x3xf32>
    %83 = vector.shape_cast %82 : vector<10x3xf32> to vector<1x10x3xf32>
    %84 = vector.shape_cast %83 : vector<1x10x3xf32> to vector<1x10x3xf32>
    %85 = vector.broadcast %84 : vector<1x10x3xf32> to vector<14x10x3xf32>
    %cst_16 = arith.constant dense<0.000000e+00> : vector<14x10x14xf32>
    %86 = tpu.matmul %85, %80, %cst_16 {dimension_numbers = #tpu.dot_dimension_numbers<[2], [1], [1], [2], [0, 0, 0, 1, 1, 2], [0], [0]>} : vector<14x10x3xf32>, vector<14x3x14xf32>, vector<14x10x14xf32> -> vector<14x10x14xf32>
    %87 = arith.addf %79, %86 : vector<14x10x14xf32>
    %88 = vector.broadcast %13 : vector<1x10x1xf32> to vector<14x10x14xf32>
    %89 = arith.addf %87, %88 : vector<14x10x14xf32>
    %cst_17 = arith.constant 0.000000e+00 : f32
    %90 = vector.broadcast %cst_17 : f32 to vector<14x10x14xf32>
    %91 = arith.cmpf ogt, %89, %90 : vector<14x10x14xf32>
    %92 = vector.broadcast %15 : vector<1x10x1xf32> to vector<14x10x14xf32>
    %93 = arith.mulf %89, %92 : vector<14x10x14xf32>
    %94 = arith.select %91, %89, %93 : vector<14x10x14xi1>, vector<14x10x14xf32>
    %95 = vector.shape_cast %94 : vector<14x10x14xf32> to vector<7x2x10x14xf32>
    %cst_18 = arith.constant dense<0xFF800000> : vector<7x10x14xf32>
    %96 = vector.multi_reduction <maximumf>, %95, %cst_18 [1] : vector<7x2x10x14xf32> to vector<7x10x14xf32>
    %97 = tpu.iota {dimensions = array<i32: 0>} : vector<14x7xi32>
    %98 = tpu.iota {dimensions = array<i32: 1>} : vector<14x7xi32>
    %c2_i32 = arith.constant 2 : i32
    %99 = vector.broadcast %c2_i32 : i32 to vector<14x7xi32>
    %100 = arith.muli %99, %98 : vector<14x7xi32>
    %101 = arith.cmpi eq, %97, %100 : vector<14x7xi32>
    %102 = arith.extui %101 : vector<14x7xi1> to vector<14x7xi32>
    %103 = arith.sitofp %102 : vector<14x7xi32> to vector<14x7xf32>
    %c2_i32_19 = arith.constant 2 : i32
    %104 = vector.broadcast %c2_i32_19 : i32 to vector<14x7xi32>
    %105 = arith.muli %104, %98 : vector<14x7xi32>
    %c1_i32 = arith.constant 1 : i32
    %106 = vector.broadcast %c1_i32 : i32 to vector<14x7xi32>
    %107 = arith.addi %105, %106 : vector<14x7xi32>
    %c13_i32 = arith.constant 13 : i32
    %108 = vector.broadcast %c13_i32 : i32 to vector<14x7xi32>
    %109 = arith.minsi %107, %108 : vector<14x7xi32>
    %110 = arith.cmpi eq, %97, %109 : vector<14x7xi32>
    %111 = arith.extui %110 : vector<14x7xi1> to vector<14x7xi32>
    %112 = arith.sitofp %111 : vector<14x7xi32> to vector<14x7xf32>
    %113 = vector.shape_cast %96 : vector<7x10x14xf32> to vector<70x14xf32>
    %cst_20 = arith.constant dense<0.000000e+00> : vector<70x7xf32>
    %114 = tpu.matmul %113, %103, %cst_20 {dimension_numbers = #tpu.dot_dimension_numbers<[1], [0], [0], [1], [0, 0, 1, 1], [], []>} : vector<70x14xf32>, vector<14x7xf32>, vector<70x7xf32> -> vector<70x7xf32>
    %cst_21 = arith.constant dense<0.000000e+00> : vector<70x7xf32>
    %115 = tpu.matmul %113, %112, %cst_21 {dimension_numbers = #tpu.dot_dimension_numbers<[1], [0], [0], [1], [0, 0, 1, 1], [], []>} : vector<70x14xf32>, vector<14x7xf32>, vector<70x7xf32> -> vector<70x7xf32>
    %116 = arith.maximumf %114, %115 : vector<70x7xf32>
    %117 = vector.shape_cast %116 : vector<70x7xf32> to vector<7x10x7xf32>
    %c0_22 = arith.constant 0 : index
    %c2 = arith.constant 2 : index
    %118 = vector.load %arg6[%c0_22, %c2] : memref<32x8xf32, #tpu.memory_space<vmem>>, vector<16x1xf32>
    %119 = vector.shape_cast %118 : vector<16x1xf32> to vector<1x16x1xf32>
    %c0_23 = arith.constant 0 : index
    %c3 = arith.constant 3 : index
    %120 = vector.load %arg6[%c0_23, %c3] : memref<32x8xf32, #tpu.memory_space<vmem>>, vector<16x1xf32>
    %121 = vector.shape_cast %120 : vector<16x1xf32> to vector<1x16x1xf32>
    %c0_24 = arith.constant 0 : index
    %c0_25 = arith.constant 0 : index
    %c0_26 = arith.constant 0 : index
    %122 = vector.load %arg3[%c0_24, %c0_25, %c0_26] : memref<9x16x10xf32, #tpu.memory_space<vmem>>, vector<9x16x10xf32>
    %123 = vector.extract_strided_slice %117 {offsets = [0, 0, 0], sizes = [5, 10, 5], strides = [1, 1, 1]} : vector<7x10x7xf32> to vector<5x10x5xf32>
    %124 = vector.extract_strided_slice %122 {offsets = [0, 0, 0], sizes = [1, 16, 10], strides = [1, 1, 1]} : vector<9x16x10xf32> to vector<1x16x10xf32>
    %125 = vector.shape_cast %124 : vector<1x16x10xf32> to vector<16x10xf32>
    %126 = vector.shape_cast %125 : vector<16x10xf32> to vector<1x16x10xf32>
    %127 = vector.shape_cast %126 : vector<1x16x10xf32> to vector<1x16x10xf32>
    %128 = vector.broadcast %127 : vector<1x16x10xf32> to vector<5x16x10xf32>
    %cst_27 = arith.constant dense<0.000000e+00> : vector<5x16x5xf32>
    %129 = tpu.matmul %128, %123, %cst_27 {dimension_numbers = #tpu.dot_dimension_numbers<[2], [1], [1], [2], [0, 0, 0, 1, 1, 2], [0], [0]>} : vector<5x16x10xf32>, vector<5x10x5xf32>, vector<5x16x5xf32> -> vector<5x16x5xf32>
    %130 = vector.extract_strided_slice %117 {offsets = [0, 0, 1], sizes = [5, 10, 5], strides = [1, 1, 1]} : vector<7x10x7xf32> to vector<5x10x5xf32>
    %131 = vector.extract_strided_slice %122 {offsets = [1, 0, 0], sizes = [1, 16, 10], strides = [1, 1, 1]} : vector<9x16x10xf32> to vector<1x16x10xf32>
    %132 = vector.shape_cast %131 : vector<1x16x10xf32> to vector<16x10xf32>
    %133 = vector.shape_cast %132 : vector<16x10xf32> to vector<1x16x10xf32>
    %134 = vector.shape_cast %133 : vector<1x16x10xf32> to vector<1x16x10xf32>
    %135 = vector.broadcast %134 : vector<1x16x10xf32> to vector<5x16x10xf32>
    %cst_28 = arith.constant dense<0.000000e+00> : vector<5x16x5xf32>
    %136 = tpu.matmul %135, %130, %cst_28 {dimension_numbers = #tpu.dot_dimension_numbers<[2], [1], [1], [2], [0, 0, 0, 1, 1, 2], [0], [0]>} : vector<5x16x10xf32>, vector<5x10x5xf32>, vector<5x16x5xf32> -> vector<5x16x5xf32>
    %137 = arith.addf %129, %136 : vector<5x16x5xf32>
    %138 = vector.extract_strided_slice %117 {offsets = [0, 0, 2], sizes = [5, 10, 5], strides = [1, 1, 1]} : vector<7x10x7xf32> to vector<5x10x5xf32>
    %139 = vector.extract_strided_slice %122 {offsets = [2, 0, 0], sizes = [1, 16, 10], strides = [1, 1, 1]} : vector<9x16x10xf32> to vector<1x16x10xf32>
    %140 = vector.shape_cast %139 : vector<1x16x10xf32> to vector<16x10xf32>
    %141 = vector.shape_cast %140 : vector<16x10xf32> to vector<1x16x10xf32>
    %142 = vector.shape_cast %141 : vector<1x16x10xf32> to vector<1x16x10xf32>
    %143 = vector.broadcast %142 : vector<1x16x10xf32> to vector<5x16x10xf32>
    %cst_29 = arith.constant dense<0.000000e+00> : vector<5x16x5xf32>
    %144 = tpu.matmul %143, %138, %cst_29 {dimension_numbers = #tpu.dot_dimension_numbers<[2], [1], [1], [2], [0, 0, 0, 1, 1, 2], [0], [0]>} : vector<5x16x10xf32>, vector<5x10x5xf32>, vector<5x16x5xf32> -> vector<5x16x5xf32>
    %145 = arith.addf %137, %144 : vector<5x16x5xf32>
    %146 = vector.extract_strided_slice %117 {offsets = [1, 0, 0], sizes = [5, 10, 5], strides = [1, 1, 1]} : vector<7x10x7xf32> to vector<5x10x5xf32>
    %147 = vector.extract_strided_slice %122 {offsets = [3, 0, 0], sizes = [1, 16, 10], strides = [1, 1, 1]} : vector<9x16x10xf32> to vector<1x16x10xf32>
    %148 = vector.shape_cast %147 : vector<1x16x10xf32> to vector<16x10xf32>
    %149 = vector.shape_cast %148 : vector<16x10xf32> to vector<1x16x10xf32>
    %150 = vector.shape_cast %149 : vector<1x16x10xf32> to vector<1x16x10xf32>
    %151 = vector.broadcast %150 : vector<1x16x10xf32> to vector<5x16x10xf32>
    %cst_30 = arith.constant dense<0.000000e+00> : vector<5x16x5xf32>
    %152 = tpu.matmul %151, %146, %cst_30 {dimension_numbers = #tpu.dot_dimension_numbers<[2], [1], [1], [2], [0, 0, 0, 1, 1, 2], [0], [0]>} : vector<5x16x10xf32>, vector<5x10x5xf32>, vector<5x16x5xf32> -> vector<5x16x5xf32>
    %153 = arith.addf %145, %152 : vector<5x16x5xf32>
    %154 = vector.extract_strided_slice %117 {offsets = [1, 0, 1], sizes = [5, 10, 5], strides = [1, 1, 1]} : vector<7x10x7xf32> to vector<5x10x5xf32>
    %155 = vector.extract_strided_slice %122 {offsets = [4, 0, 0], sizes = [1, 16, 10], strides = [1, 1, 1]} : vector<9x16x10xf32> to vector<1x16x10xf32>
    %156 = vector.shape_cast %155 : vector<1x16x10xf32> to vector<16x10xf32>
    %157 = vector.shape_cast %156 : vector<16x10xf32> to vector<1x16x10xf32>
    %158 = vector.shape_cast %157 : vector<1x16x10xf32> to vector<1x16x10xf32>
    %159 = vector.broadcast %158 : vector<1x16x10xf32> to vector<5x16x10xf32>
    %cst_31 = arith.constant dense<0.000000e+00> : vector<5x16x5xf32>
    %160 = tpu.matmul %159, %154, %cst_31 {dimension_numbers = #tpu.dot_dimension_numbers<[2], [1], [1], [2], [0, 0, 0, 1, 1, 2], [0], [0]>} : vector<5x16x10xf32>, vector<5x10x5xf32>, vector<5x16x5xf32> -> vector<5x16x5xf32>
    %161 = arith.addf %153, %160 : vector<5x16x5xf32>
    %162 = vector.extract_strided_slice %117 {offsets = [1, 0, 2], sizes = [5, 10, 5], strides = [1, 1, 1]} : vector<7x10x7xf32> to vector<5x10x5xf32>
    %163 = vector.extract_strided_slice %122 {offsets = [5, 0, 0], sizes = [1, 16, 10], strides = [1, 1, 1]} : vector<9x16x10xf32> to vector<1x16x10xf32>
    %164 = vector.shape_cast %163 : vector<1x16x10xf32> to vector<16x10xf32>
    %165 = vector.shape_cast %164 : vector<16x10xf32> to vector<1x16x10xf32>
    %166 = vector.shape_cast %165 : vector<1x16x10xf32> to vector<1x16x10xf32>
    %167 = vector.broadcast %166 : vector<1x16x10xf32> to vector<5x16x10xf32>
    %cst_32 = arith.constant dense<0.000000e+00> : vector<5x16x5xf32>
    %168 = tpu.matmul %167, %162, %cst_32 {dimension_numbers = #tpu.dot_dimension_numbers<[2], [1], [1], [2], [0, 0, 0, 1, 1, 2], [0], [0]>} : vector<5x16x10xf32>, vector<5x10x5xf32>, vector<5x16x5xf32> -> vector<5x16x5xf32>
    %169 = arith.addf %161, %168 : vector<5x16x5xf32>
    %170 = vector.extract_strided_slice %117 {offsets = [2, 0, 0], sizes = [5, 10, 5], strides = [1, 1, 1]} : vector<7x10x7xf32> to vector<5x10x5xf32>
    %171 = vector.extract_strided_slice %122 {offsets = [6, 0, 0], sizes = [1, 16, 10], strides = [1, 1, 1]} : vector<9x16x10xf32> to vector<1x16x10xf32>
    %172 = vector.shape_cast %171 : vector<1x16x10xf32> to vector<16x10xf32>
    %173 = vector.shape_cast %172 : vector<16x10xf32> to vector<1x16x10xf32>
    %174 = vector.shape_cast %173 : vector<1x16x10xf32> to vector<1x16x10xf32>
    %175 = vector.broadcast %174 : vector<1x16x10xf32> to vector<5x16x10xf32>
    %cst_33 = arith.constant dense<0.000000e+00> : vector<5x16x5xf32>
    %176 = tpu.matmul %175, %170, %cst_33 {dimension_numbers = #tpu.dot_dimension_numbers<[2], [1], [1], [2], [0, 0, 0, 1, 1, 2], [0], [0]>} : vector<5x16x10xf32>, vector<5x10x5xf32>, vector<5x16x5xf32> -> vector<5x16x5xf32>
    %177 = arith.addf %169, %176 : vector<5x16x5xf32>
    %178 = vector.extract_strided_slice %117 {offsets = [2, 0, 1], sizes = [5, 10, 5], strides = [1, 1, 1]} : vector<7x10x7xf32> to vector<5x10x5xf32>
    %179 = vector.extract_strided_slice %122 {offsets = [7, 0, 0], sizes = [1, 16, 10], strides = [1, 1, 1]} : vector<9x16x10xf32> to vector<1x16x10xf32>
    %180 = vector.shape_cast %179 : vector<1x16x10xf32> to vector<16x10xf32>
    %181 = vector.shape_cast %180 : vector<16x10xf32> to vector<1x16x10xf32>
    %182 = vector.shape_cast %181 : vector<1x16x10xf32> to vector<1x16x10xf32>
    %183 = vector.broadcast %182 : vector<1x16x10xf32> to vector<5x16x10xf32>
    %cst_34 = arith.constant dense<0.000000e+00> : vector<5x16x5xf32>
    %184 = tpu.matmul %183, %178, %cst_34 {dimension_numbers = #tpu.dot_dimension_numbers<[2], [1], [1], [2], [0, 0, 0, 1, 1, 2], [0], [0]>} : vector<5x16x10xf32>, vector<5x10x5xf32>, vector<5x16x5xf32> -> vector<5x16x5xf32>
    %185 = arith.addf %177, %184 : vector<5x16x5xf32>
    %186 = vector.extract_strided_slice %117 {offsets = [2, 0, 2], sizes = [5, 10, 5], strides = [1, 1, 1]} : vector<7x10x7xf32> to vector<5x10x5xf32>
    %187 = vector.extract_strided_slice %122 {offsets = [8, 0, 0], sizes = [1, 16, 10], strides = [1, 1, 1]} : vector<9x16x10xf32> to vector<1x16x10xf32>
    %188 = vector.shape_cast %187 : vector<1x16x10xf32> to vector<16x10xf32>
    %189 = vector.shape_cast %188 : vector<16x10xf32> to vector<1x16x10xf32>
    %190 = vector.shape_cast %189 : vector<1x16x10xf32> to vector<1x16x10xf32>
    %191 = vector.broadcast %190 : vector<1x16x10xf32> to vector<5x16x10xf32>
    %cst_35 = arith.constant dense<0.000000e+00> : vector<5x16x5xf32>
    %192 = tpu.matmul %191, %186, %cst_35 {dimension_numbers = #tpu.dot_dimension_numbers<[2], [1], [1], [2], [0, 0, 0, 1, 1, 2], [0], [0]>} : vector<5x16x10xf32>, vector<5x10x5xf32>, vector<5x16x5xf32> -> vector<5x16x5xf32>
    %193 = arith.addf %185, %192 : vector<5x16x5xf32>
    %194 = vector.broadcast %119 : vector<1x16x1xf32> to vector<5x16x5xf32>
    %195 = arith.addf %193, %194 : vector<5x16x5xf32>
    %cst_36 = arith.constant 0.000000e+00 : f32
    %196 = vector.broadcast %cst_36 : f32 to vector<5x16x5xf32>
    %197 = arith.cmpf ogt, %195, %196 : vector<5x16x5xf32>
    %198 = vector.broadcast %121 : vector<1x16x1xf32> to vector<5x16x5xf32>
    %199 = arith.mulf %195, %198 : vector<5x16x5xf32>
    %200 = arith.select %197, %195, %199 : vector<5x16x5xi1>, vector<5x16x5xf32>
    %c0_37 = arith.constant 0 : index
    %c4 = arith.constant 4 : index
    %201 = vector.load %arg6[%c0_37, %c4] : memref<32x8xf32, #tpu.memory_space<vmem>>, vector<32x1xf32>
    %202 = vector.shape_cast %201 : vector<32x1xf32> to vector<1x32x1xf32>
    %c0_38 = arith.constant 0 : index
    %c5 = arith.constant 5 : index
    %203 = vector.load %arg6[%c0_38, %c5] : memref<32x8xf32, #tpu.memory_space<vmem>>, vector<32x1xf32>
    %204 = vector.shape_cast %203 : vector<32x1xf32> to vector<1x32x1xf32>
    %c0_39 = arith.constant 0 : index
    %c0_40 = arith.constant 0 : index
    %c0_41 = arith.constant 0 : index
    %205 = vector.load %arg4[%c0_39, %c0_40, %c0_41] : memref<9x32x16xf32, #tpu.memory_space<vmem>>, vector<9x32x16xf32>
    %206 = vector.extract_strided_slice %200 {offsets = [0, 0, 0], sizes = [3, 16, 3], strides = [1, 1, 1]} : vector<5x16x5xf32> to vector<3x16x3xf32>
    %207 = vector.extract_strided_slice %205 {offsets = [0, 0, 0], sizes = [1, 32, 16], strides = [1, 1, 1]} : vector<9x32x16xf32> to vector<1x32x16xf32>
    %208 = vector.shape_cast %207 : vector<1x32x16xf32> to vector<32x16xf32>
    %209 = vector.shape_cast %208 : vector<32x16xf32> to vector<1x32x16xf32>
    %210 = vector.shape_cast %209 : vector<1x32x16xf32> to vector<1x32x16xf32>
    %211 = vector.broadcast %210 : vector<1x32x16xf32> to vector<3x32x16xf32>
    %cst_42 = arith.constant dense<0.000000e+00> : vector<3x32x3xf32>
    %212 = tpu.matmul %211, %206, %cst_42 {dimension_numbers = #tpu.dot_dimension_numbers<[2], [1], [1], [2], [0, 0, 0, 1, 1, 2], [0], [0]>} : vector<3x32x16xf32>, vector<3x16x3xf32>, vector<3x32x3xf32> -> vector<3x32x3xf32>
    %213 = vector.extract_strided_slice %200 {offsets = [0, 0, 1], sizes = [3, 16, 3], strides = [1, 1, 1]} : vector<5x16x5xf32> to vector<3x16x3xf32>
    %214 = vector.extract_strided_slice %205 {offsets = [1, 0, 0], sizes = [1, 32, 16], strides = [1, 1, 1]} : vector<9x32x16xf32> to vector<1x32x16xf32>
    %215 = vector.shape_cast %214 : vector<1x32x16xf32> to vector<32x16xf32>
    %216 = vector.shape_cast %215 : vector<32x16xf32> to vector<1x32x16xf32>
    %217 = vector.shape_cast %216 : vector<1x32x16xf32> to vector<1x32x16xf32>
    %218 = vector.broadcast %217 : vector<1x32x16xf32> to vector<3x32x16xf32>
    %cst_43 = arith.constant dense<0.000000e+00> : vector<3x32x3xf32>
    %219 = tpu.matmul %218, %213, %cst_43 {dimension_numbers = #tpu.dot_dimension_numbers<[2], [1], [1], [2], [0, 0, 0, 1, 1, 2], [0], [0]>} : vector<3x32x16xf32>, vector<3x16x3xf32>, vector<3x32x3xf32> -> vector<3x32x3xf32>
    %220 = arith.addf %212, %219 : vector<3x32x3xf32>
    %221 = vector.extract_strided_slice %200 {offsets = [0, 0, 2], sizes = [3, 16, 3], strides = [1, 1, 1]} : vector<5x16x5xf32> to vector<3x16x3xf32>
    %222 = vector.extract_strided_slice %205 {offsets = [2, 0, 0], sizes = [1, 32, 16], strides = [1, 1, 1]} : vector<9x32x16xf32> to vector<1x32x16xf32>
    %223 = vector.shape_cast %222 : vector<1x32x16xf32> to vector<32x16xf32>
    %224 = vector.shape_cast %223 : vector<32x16xf32> to vector<1x32x16xf32>
    %225 = vector.shape_cast %224 : vector<1x32x16xf32> to vector<1x32x16xf32>
    %226 = vector.broadcast %225 : vector<1x32x16xf32> to vector<3x32x16xf32>
    %cst_44 = arith.constant dense<0.000000e+00> : vector<3x32x3xf32>
    %227 = tpu.matmul %226, %221, %cst_44 {dimension_numbers = #tpu.dot_dimension_numbers<[2], [1], [1], [2], [0, 0, 0, 1, 1, 2], [0], [0]>} : vector<3x32x16xf32>, vector<3x16x3xf32>, vector<3x32x3xf32> -> vector<3x32x3xf32>
    %228 = arith.addf %220, %227 : vector<3x32x3xf32>
    %229 = vector.extract_strided_slice %200 {offsets = [1, 0, 0], sizes = [3, 16, 3], strides = [1, 1, 1]} : vector<5x16x5xf32> to vector<3x16x3xf32>
    %230 = vector.extract_strided_slice %205 {offsets = [3, 0, 0], sizes = [1, 32, 16], strides = [1, 1, 1]} : vector<9x32x16xf32> to vector<1x32x16xf32>
    %231 = vector.shape_cast %230 : vector<1x32x16xf32> to vector<32x16xf32>
    %232 = vector.shape_cast %231 : vector<32x16xf32> to vector<1x32x16xf32>
    %233 = vector.shape_cast %232 : vector<1x32x16xf32> to vector<1x32x16xf32>
    %234 = vector.broadcast %233 : vector<1x32x16xf32> to vector<3x32x16xf32>
    %cst_45 = arith.constant dense<0.000000e+00> : vector<3x32x3xf32>
    %235 = tpu.matmul %234, %229, %cst_45 {dimension_numbers = #tpu.dot_dimension_numbers<[2], [1], [1], [2], [0, 0, 0, 1, 1, 2], [0], [0]>} : vector<3x32x16xf32>, vector<3x16x3xf32>, vector<3x32x3xf32> -> vector<3x32x3xf32>
    %236 = arith.addf %228, %235 : vector<3x32x3xf32>
    %237 = vector.extract_strided_slice %200 {offsets = [1, 0, 1], sizes = [3, 16, 3], strides = [1, 1, 1]} : vector<5x16x5xf32> to vector<3x16x3xf32>
    %238 = vector.extract_strided_slice %205 {offsets = [4, 0, 0], sizes = [1, 32, 16], strides = [1, 1, 1]} : vector<9x32x16xf32> to vector<1x32x16xf32>
    %239 = vector.shape_cast %238 : vector<1x32x16xf32> to vector<32x16xf32>
    %240 = vector.shape_cast %239 : vector<32x16xf32> to vector<1x32x16xf32>
    %241 = vector.shape_cast %240 : vector<1x32x16xf32> to vector<1x32x16xf32>
    %242 = vector.broadcast %241 : vector<1x32x16xf32> to vector<3x32x16xf32>
    %cst_46 = arith.constant dense<0.000000e+00> : vector<3x32x3xf32>
    %243 = tpu.matmul %242, %237, %cst_46 {dimension_numbers = #tpu.dot_dimension_numbers<[2], [1], [1], [2], [0, 0, 0, 1, 1, 2], [0], [0]>} : vector<3x32x16xf32>, vector<3x16x3xf32>, vector<3x32x3xf32> -> vector<3x32x3xf32>
    %244 = arith.addf %236, %243 : vector<3x32x3xf32>
    %245 = vector.extract_strided_slice %200 {offsets = [1, 0, 2], sizes = [3, 16, 3], strides = [1, 1, 1]} : vector<5x16x5xf32> to vector<3x16x3xf32>
    %246 = vector.extract_strided_slice %205 {offsets = [5, 0, 0], sizes = [1, 32, 16], strides = [1, 1, 1]} : vector<9x32x16xf32> to vector<1x32x16xf32>
    %247 = vector.shape_cast %246 : vector<1x32x16xf32> to vector<32x16xf32>
    %248 = vector.shape_cast %247 : vector<32x16xf32> to vector<1x32x16xf32>
    %249 = vector.shape_cast %248 : vector<1x32x16xf32> to vector<1x32x16xf32>
    %250 = vector.broadcast %249 : vector<1x32x16xf32> to vector<3x32x16xf32>
    %cst_47 = arith.constant dense<0.000000e+00> : vector<3x32x3xf32>
    %251 = tpu.matmul %250, %245, %cst_47 {dimension_numbers = #tpu.dot_dimension_numbers<[2], [1], [1], [2], [0, 0, 0, 1, 1, 2], [0], [0]>} : vector<3x32x16xf32>, vector<3x16x3xf32>, vector<3x32x3xf32> -> vector<3x32x3xf32>
    %252 = arith.addf %244, %251 : vector<3x32x3xf32>
    %253 = vector.extract_strided_slice %200 {offsets = [2, 0, 0], sizes = [3, 16, 3], strides = [1, 1, 1]} : vector<5x16x5xf32> to vector<3x16x3xf32>
    %254 = vector.extract_strided_slice %205 {offsets = [6, 0, 0], sizes = [1, 32, 16], strides = [1, 1, 1]} : vector<9x32x16xf32> to vector<1x32x16xf32>
    %255 = vector.shape_cast %254 : vector<1x32x16xf32> to vector<32x16xf32>
    %256 = vector.shape_cast %255 : vector<32x16xf32> to vector<1x32x16xf32>
    %257 = vector.shape_cast %256 : vector<1x32x16xf32> to vector<1x32x16xf32>
    %258 = vector.broadcast %257 : vector<1x32x16xf32> to vector<3x32x16xf32>
    %cst_48 = arith.constant dense<0.000000e+00> : vector<3x32x3xf32>
    %259 = tpu.matmul %258, %253, %cst_48 {dimension_numbers = #tpu.dot_dimension_numbers<[2], [1], [1], [2], [0, 0, 0, 1, 1, 2], [0], [0]>} : vector<3x32x16xf32>, vector<3x16x3xf32>, vector<3x32x3xf32> -> vector<3x32x3xf32>
    %260 = arith.addf %252, %259 : vector<3x32x3xf32>
    %261 = vector.extract_strided_slice %200 {offsets = [2, 0, 1], sizes = [3, 16, 3], strides = [1, 1, 1]} : vector<5x16x5xf32> to vector<3x16x3xf32>
    %262 = vector.extract_strided_slice %205 {offsets = [7, 0, 0], sizes = [1, 32, 16], strides = [1, 1, 1]} : vector<9x32x16xf32> to vector<1x32x16xf32>
    %263 = vector.shape_cast %262 : vector<1x32x16xf32> to vector<32x16xf32>
    %264 = vector.shape_cast %263 : vector<32x16xf32> to vector<1x32x16xf32>
    %265 = vector.shape_cast %264 : vector<1x32x16xf32> to vector<1x32x16xf32>
    %266 = vector.broadcast %265 : vector<1x32x16xf32> to vector<3x32x16xf32>
    %cst_49 = arith.constant dense<0.000000e+00> : vector<3x32x3xf32>
    %267 = tpu.matmul %266, %261, %cst_49 {dimension_numbers = #tpu.dot_dimension_numbers<[2], [1], [1], [2], [0, 0, 0, 1, 1, 2], [0], [0]>} : vector<3x32x16xf32>, vector<3x16x3xf32>, vector<3x32x3xf32> -> vector<3x32x3xf32>
    %268 = arith.addf %260, %267 : vector<3x32x3xf32>
    %269 = vector.extract_strided_slice %200 {offsets = [2, 0, 2], sizes = [3, 16, 3], strides = [1, 1, 1]} : vector<5x16x5xf32> to vector<3x16x3xf32>
    %270 = vector.extract_strided_slice %205 {offsets = [8, 0, 0], sizes = [1, 32, 16], strides = [1, 1, 1]} : vector<9x32x16xf32> to vector<1x32x16xf32>
    %271 = vector.shape_cast %270 : vector<1x32x16xf32> to vector<32x16xf32>
    %272 = vector.shape_cast %271 : vector<32x16xf32> to vector<1x32x16xf32>
    %273 = vector.shape_cast %272 : vector<1x32x16xf32> to vector<1x32x16xf32>
    %274 = vector.broadcast %273 : vector<1x32x16xf32> to vector<3x32x16xf32>
    %cst_50 = arith.constant dense<0.000000e+00> : vector<3x32x3xf32>
    %275 = tpu.matmul %274, %269, %cst_50 {dimension_numbers = #tpu.dot_dimension_numbers<[2], [1], [1], [2], [0, 0, 0, 1, 1, 2], [0], [0]>} : vector<3x32x16xf32>, vector<3x16x3xf32>, vector<3x32x3xf32> -> vector<3x32x3xf32>
    %276 = arith.addf %268, %275 : vector<3x32x3xf32>
    %277 = vector.broadcast %202 : vector<1x32x1xf32> to vector<3x32x3xf32>
    %278 = arith.addf %276, %277 : vector<3x32x3xf32>
    %cst_51 = arith.constant 0.000000e+00 : f32
    %279 = vector.broadcast %cst_51 : f32 to vector<3x32x3xf32>
    %280 = arith.cmpf ogt, %278, %279 : vector<3x32x3xf32>
    %281 = vector.broadcast %204 : vector<1x32x1xf32> to vector<3x32x3xf32>
    %282 = arith.mulf %278, %281 : vector<3x32x3xf32>
    %283 = arith.select %280, %278, %282 : vector<3x32x3xi1>, vector<3x32x3xf32>
    %c0_52 = arith.constant 0 : index
    %c0_53 = arith.constant 0 : index
    %284 = vector.load %arg5[%c0_52, %c0_53] : memref<6x32xf32, #tpu.memory_space<vmem>>, vector<6x32xf32>
    %285 = vector.shape_cast %284 : vector<6x32xf32> to vector<1x6x32xf32>
    %286 = vector.shape_cast %285 : vector<1x6x32xf32> to vector<1x6x32xf32>
    %287 = vector.broadcast %286 : vector<1x6x32xf32> to vector<3x6x32xf32>
    %c0_54 = arith.constant 0 : index
    %c6 = arith.constant 6 : index
    %288 = vector.load %arg6[%c0_54, %c6] : memref<32x8xf32, #tpu.memory_space<vmem>>, vector<6x1xf32>
    %289 = vector.shape_cast %288 : vector<6x1xf32> to vector<1x6x1xf32>
    %cst_55 = arith.constant dense<0.000000e+00> : vector<3x6x3xf32>
    %290 = tpu.matmul %287, %283, %cst_55 {dimension_numbers = #tpu.dot_dimension_numbers<[2], [1], [1], [2], [0, 0, 0, 1, 1, 2], [0], [0]>} : vector<3x6x32xf32>, vector<3x32x3xf32>, vector<3x6x3xf32> -> vector<3x6x3xf32>
    %291 = vector.broadcast %289 : vector<1x6x1xf32> to vector<3x6x3xf32>
    %292 = arith.addf %290, %291 : vector<3x6x3xf32>
    %293 = vector.extract_strided_slice %292 {offsets = [0, 4, 0], sizes = [3, 1, 3], strides = [1, 1, 1]} : vector<3x6x3xf32> to vector<3x1x3xf32>
    %294 = vector.extract_strided_slice %292 {offsets = [0, 5, 0], sizes = [3, 1, 3], strides = [1, 1, 1]} : vector<3x6x3xf32> to vector<3x1x3xf32>
    %295 = arith.subf %293, %294 : vector<3x1x3xf32>
    %296 = arith.subf %294, %293 : vector<3x1x3xf32>
    %297 = tpu.concatenate %295, %296 in 1 : vector<3x1x3xf32>, vector<3x1x3xf32> -> vector<3x2x3xf32>
    %cst_56 = arith.constant 0.000000e+00 : f32
    %298 = vector.broadcast %cst_56 : f32 to vector<3x2x3xf32>
    %299 = arith.subf %298, %297 : vector<3x2x3xf32>
    %300 = math.exp %299 : vector<3x2x3xf32>
    %cst_57 = arith.constant 1.000000e+00 : f32
    %301 = vector.broadcast %cst_57 : f32 to vector<3x2x3xf32>
    %302 = arith.addf %301, %300 : vector<3x2x3xf32>
    %303 = tpu.reciprocal %302 {approx = true} : vector<3x2x3xf32> -> vector<3x2x3xf32>
    %304 = vector.extract_strided_slice %292 {offsets = [0, 0, 0], sizes = [3, 4, 3], strides = [1, 1, 1]} : vector<3x6x3xf32> to vector<3x4x3xf32>
    %c0_58 = arith.constant 0 : index
    %c0_59 = arith.constant 0 : index
    %c0_60 = arith.constant 0 : index
    %c0_61 = arith.constant 0 : index
    %305 = vector.load %arg7[%c0_58, %c0_59, %c0_60, %c0_61] : memref<1x3x4x3xf32, #tpu.memory_space<vmem>>, vector<1x3x4x3xf32>
    %306 = vector.shape_cast %305 : vector<1x3x4x3xf32> to vector<3x4x3xf32>
    %307 = vector.shape_cast %304 : vector<3x4x3xf32> to vector<1x3x4x3xf32>
    tpu.vector_store %arg7[%c0_58, %c0_59, %c0_60, %c0_61], %307 {strides = array<i32>} : memref<1x3x4x3xf32, #tpu.memory_space<vmem>>, vector<1x3x4x3xf32>,
    %c0_62 = arith.constant 0 : index
    %c0_63 = arith.constant 0 : index
    %c0_64 = arith.constant 0 : index
    %c0_65 = arith.constant 0 : index
    %308 = vector.load %arg8[%c0_62, %c0_63, %c0_64, %c0_65] : memref<1x3x2x3xf32, #tpu.memory_space<vmem>>, vector<1x3x2x3xf32>
    %309 = vector.shape_cast %308 : vector<1x3x2x3xf32> to vector<3x2x3xf32>
    %310 = vector.shape_cast %303 : vector<3x2x3xf32> to vector<1x3x2x3xf32>
    tpu.vector_store %arg8[%c0_62, %c0_63, %c0_64, %c0_65], %310 {strides = array<i32>} : memref<1x3x2x3xf32, #tpu.memory_space<vmem>>, vector<1x3x2x3xf32>,
    return
  }
  func.func @transform_0(%arg0: i32) -> (i32, i32, i32, i32) {
    %c0_i32 = arith.constant 0 : i32
    %c0_i32_0 = arith.constant 0 : i32
    %c0_i32_1 = arith.constant 0 : i32
    %c0_i32_2 = arith.constant 0 : i32
    return %arg0, %c0_i32, %c0_i32_0, %c0_i32_1 : i32, i32, i32, i32
  }
  func.func @transform_1(%arg0: i32) -> (i32, i32, i32) {
    %c0_i32 = arith.constant 0 : i32
    %c0_i32_0 = arith.constant 0 : i32
    %c0_i32_1 = arith.constant 0 : i32
    %c0_i32_2 = arith.constant 0 : i32
    return %c0_i32, %c0_i32_0, %c0_i32_1 : i32, i32, i32
  }
  func.func @transform_2(%arg0: i32) -> (i32, i32, i32) {
    %c0_i32 = arith.constant 0 : i32
    %c0_i32_0 = arith.constant 0 : i32
    %c0_i32_1 = arith.constant 0 : i32
    %c0_i32_2 = arith.constant 0 : i32
    return %c0_i32, %c0_i32_0, %c0_i32_1 : i32, i32, i32
  }
  func.func @transform_3(%arg0: i32) -> (i32, i32, i32) {
    %c0_i32 = arith.constant 0 : i32
    %c0_i32_0 = arith.constant 0 : i32
    %c0_i32_1 = arith.constant 0 : i32
    %c0_i32_2 = arith.constant 0 : i32
    return %c0_i32, %c0_i32_0, %c0_i32_1 : i32, i32, i32
  }
  func.func @transform_4(%arg0: i32) -> (i32, i32) {
    %c0_i32 = arith.constant 0 : i32
    %c0_i32_0 = arith.constant 0 : i32
    %c0_i32_1 = arith.constant 0 : i32
    return %c0_i32, %c0_i32_0 : i32, i32
  }
  func.func @transform_5(%arg0: i32) -> (i32, i32) {
    %c0_i32 = arith.constant 0 : i32
    %c0_i32_0 = arith.constant 0 : i32
    %c0_i32_1 = arith.constant 0 : i32
    return %c0_i32, %c0_i32_0 : i32, i32
  }
  func.func @transform_6(%arg0: i32) -> (i32, i32, i32, i32) {
    %c0_i32 = arith.constant 0 : i32
    %c0_i32_0 = arith.constant 0 : i32
    %c0_i32_1 = arith.constant 0 : i32
    %c0_i32_2 = arith.constant 0 : i32
    return %arg0, %c0_i32, %c0_i32_0, %c0_i32_1 : i32, i32, i32, i32
  }
  func.func @transform_7(%arg0: i32) -> (i32, i32, i32, i32) {
    %c0_i32 = arith.constant 0 : i32
    %c0_i32_0 = arith.constant 0 : i32
    %c0_i32_1 = arith.constant 0 : i32
    %c0_i32_2 = arith.constant 0 : i32
    return %arg0, %c0_i32, %c0_i32_0, %c0_i32_1 : i32, i32, i32, i32
  }
}

</mosaic_0001>

<bundles_post_ra>
// kernel: tpu_custom_call.1
= control target key start
LH: loop header
LB: loop body
LE: loop exit
PB: predicated region body
PF: predicated region fallthrough
CT: control target
= control target key end

     0   :  { %13 = vsyncpa [#allocation3], 0  ;;  %s25170_s0 = inlined_call_operand.vmem [shape: f32[2,3,16,16], index: 0, kind: input, shape index: {}]   ;;  %s25171_s1 = inlined_call_operand.vmem [shape: f32[9,10,3], index: 1, kind: input, shape index: {}]   ;;  %s25172_s2 = inlined_call_operand.vmem [shape: f32[9,16,10], index: 2, kind: input, shape index: {}]   ;;  %s25173_s3 = inlined_call_operand.vmem [shape: f32[9,32,16], index: 3, kind: input, shape index: {}]   ;;  %s25174_s4 = inlined_call_operand.vmem [shape: f32[6,32], index: 4, kind: input, shape index: {}]   ;;  %s25175_s5 = inlined_call_operand.vmem [shape: f32[32,8], index: 5, kind: input, shape index: {}]   ;;  %s25176_s6 = inlined_call_operand.vmem [shape: f32[2,3,4,3], index: 6, kind: output, shape index: {0}]   ;;  %s25177_s7 = inlined_call_operand.hbm [shape: f32[2,3,2,3], index: 7, kind: output, shape index: {1}]  }
   0x1   :  { %15 = vsyncpa [#allocation3 + $0x1], 0  ;;  %s22457_s24 = smov 0   ;;  %s22459_s25 = smov 0  }
   0x2   :  { %s22461_s26 = smov 0   ;;  %s22463_s27 = smov 0  }
   0x3 LB: > { %s22478_s28 = sadd.s32 4294967295, %s22396_s27   ;;  %s18590_s29 = sadd.s32 4294967294, %s22396_s27   ;;  %s22396_s27 = sphi %s22463_s27, %s25187_s27   ;;  %s22392_s26 = sphi %s22461_s26, %s25186_s26   ;;  %s22388_s25 = sphi %s22459_s25, %s25185_s25   ;;  %s22384_s24 = sphi %s22457_s24, %s25184_s24  }
   0x4   : > { %s22482_s30 = sadd.s32 1, %s22396_s27   ;;  %s185_s8 = sadd.s32 1, %s22392_s26 }
   0x5   : > { %s182_s9 = ssub.s32 %s22396_s27, %s22482_s30  ;;  %p195_p0 = scmp.ne.s32.totalorder %s22392_s26, %s22388_s25 }
   0x6   : > { %p183_p1 = scmp.eq.s32.totalorder %s182_s9, 0  ;;  %p196_p2 = scmp.eq.s32.totalorder %s22478_s28, 1 }
   0x7   : > { %p201_p3 = scmp.ne.s32.totalorder %s22388_s25, %s22384_s24  ;;  %p202_p4 = scmp.eq.s32.totalorder %s18590_s29, 1 }
   0x8   : > { %s22493_s10 = scalar_select %p183_p1, %s22392_s26, %s185_s8  }
   0x9   : > { %p22495_p5 = por %p196_p2, %p195_p0  ;;  %p22499_p6 = por %p202_p4, %p201_p3 }
   0xa   : > { %p18593_p7 = scmp.ge.s32.totalorder %s22396_s27, 1  ;;  %p243_p8 = scmp.lt.s32.totalorder %s22396_s27, 3 }
   0xc   : > { %p244_p9 = pnand %p18593_p7, %p243_p8 }
   0xd   : > { %p280_p10 = scmp.lt.s32.totalorder (!%p244_p9), %s22478_s28, 1  ;;  %v302_v0 = vlaneseq (!%p244_p9)  ;;  %v22398_v1 = vmov (!%p244_p9), 1966171168   ;;  %v22516_v5 = vld [vmem:[%s25171_s1 + $0x10] sm:$0xff] (!%p244_p9)  ;;  %vm829_vm0 = vcmask (!%p244_p9), 23552   ;;  %vm772_vm1 = vcmask (!%p244_p9), 1040384  }
   0xe   : > { %247 = sbr.rel (%p244_p9) target bundleno = 2135 (0x857), region = 44  ;;  %v300_v2 = vunpack.c.l.s4 (!%p244_p9), %v22398_v1  ;;  %20008 = vmatprep.mubr.msk.f32.mxu0 (!%p244_p9), %vm829_vm0, %v22516_v5  ;;  %20023 = vmatprep.mubr.msk.f32.mxu1 (!%p244_p9), %vm829_vm0, %v22516_v5  ;;  %vm789_vm2 = vcmask (!%p244_p9), 1041408   ;;  %s22399_s20 = smov (!%p244_p9), 127   ;;  %vm836_vm3 = vcmask (!%p244_p9), 1042432   ;;  %vm11251_vm6 = vcmask (!%p244_p9), 1045504  }
   0xf   : > { %v22510_v3 = vshrl.u32 (!%p244_p9), %v302_v0, 7  ;;  %s22400_s21 = smov (!%p244_p9), 126   ;;  %vm22406_vm8 = vmmov (!%p244_p9), 0   ;;  %vm10838_vm13 = vcmask (!%p244_p9), 107520   ;;  %s22123_s18 = smul.u32 (!%p244_p9), 96, %s22478_s28 }
  0x10   : > { %v301_v4 = vunpack.c.0.s8 (!%p244_p9), %v300_v2 }
  0x11   : > { %v22534_v10 = vsub.s32 (!%p244_p9), 0, %v22510_v3  ;;  %s25125_s29 = scalar_lea.hbm (!%p244_p9), %s25177_s7, %s22123_s18 }
  0x12   : > { %v22519_v6 = vsub.s32 (!%p244_p9), %v301_v4, %v22510_v3 }
  0x15   : > { %s22507_s13 = scalar_select %p280_p10, %s22478_s28, 1 }
  0x16   : > { %s22414_s28 = smov [#allocation2]  }
  0x17   : > { %s22121_s14 = smul.u32 48, %s22507_s13 }
  0x19   : > { %s22528_s19 = scalar_lea.vmem %s25170_s0, %s22121_s14 }
  0x1a   : > { %v290_v7 = vld [vmem:[%s22528_s19] sm:$0xff]  ;;  %v292_v8 = vld [vmem:[%s22528_s19 + $0x10] sm:$0xff]  ;;  %v22539_v15 = vld [vmem:[%s22528_s19 + $0x8] sm:$0xff] }
  0x1b   : > { %v294_v9 = vld [vmem:[%s22528_s19 + $0x20] sm:$0xff]  ;;  %v305_v11 = vrot.slane %v290_v7, %v22519_v6  ;;  %v414_v12 = vcombine.high %v292_v8, %v292_v8  ;;  %v421_v13 = vrot.slane %v292_v8, %v22519_v6  ;;  %v298_v17 = vcombine.high %v290_v7, %v290_v7  ;;  %v22554_v29 = vld [vmem:[%s22528_s19 + $0x18] sm:$0xff] }
  0x1c   : > { %v514_v14 = vcombine.high %v294_v9, %v294_v9  ;;  %v521_v16 = vrot.slane %v294_v9, %v22519_v6  ;;  %v22549_v24 = vrot.slane %v22539_v15, %v22519_v6  ;;  %v470_v41 = vrot.slane %v22554_v29, %v22519_v6 }
  0x1d   : > { %v321_v18 = vrot.slane %v305_v11, %v22519_v6  ;;  %v428_v19 = vrot.slane %v414_v12, %v22519_v6  ;;  %v437_v20 = vrot.slane %v421_v13, %v22519_v6  ;;  %v429_v21 = vcombine.high %v421_v13, %v421_v13 }
  0x1e   : > { %v528_v22 = vrot.slane %v514_v14, %v22519_v6  ;;  %v537_v23 = vrot.slane %v521_v16, %v22519_v6  ;;  %v312_v28 = vrot.slane %v298_v17, %v22519_v6  ;;  %v529_v31 = vcombine.high %v521_v16, %v521_v16  ;;  %v295_v16 = vld [vmem:[%s22528_s19 + $0x28] sm:$0xff] }
  0x1f   : > { %v430_v25 = vcombine.high %v428_v19, %v428_v19  ;;  %v459_v26 = vcombine.high %v437_v20, %v437_v20  ;;  %v615_v27 = vrot.slane %v437_v20, %v22534_v10  ;;  %v444_v30 = vrot.slane %v428_v19, %v22519_v6 }
  0x20   : > { %v530_v32 = vcombine.high %v528_v22, %v528_v22  ;;  %v695_v33 = vrot.slane %v537_v23, %v22534_v10  ;;  %v559_v35 = vcombine.high %v537_v23, %v537_v23  ;;  %v22562_v39 = vrot.slane %v528_v22, %v22519_v6 }
  0x21   : > { %v458_v34 = vrot.slane %v430_v25, %v22519_v6  ;;  %v623_v36 = vrot.slane %v459_v26, %v22534_v10  ;;  %v773_v37 = vsel %vm772_vm1, %v321_v18, %v615_v27  ;;  %v460_v38 = vcombine.high %v444_v30, %v444_v30 }
  0x22   : > { %v22565_v40 = vsel %vm789_vm2, %v773_v37, %v695_v33  ;;  %v558_v42 = vrot.slane %v530_v32, %v22519_v6  ;;  %v313_v43 = vcombine.high %v305_v11, %v305_v11  ;;  %v314_v44 = vcombine.high %v312_v28, %v312_v28 }
  0x23   : > { %827 = vrot.lane.b32.xlu0 %v22565_v40, %s22399_s20  ;;  %v343_v45 = vcombine.high %v321_v18, %v321_v18  ;;  %v560_v46 = vcombine.high %v22562_v39, %v22562_v39  ;;  %v451_v47 = vrot.slane %v429_v21, %v22519_v6  ;;  %v551_v48 = vrot.slane %v529_v31, %v22519_v6 }
  0x24   : > { %v635_v49 = vrot.slane %v458_v34, %v22534_v10  ;;  %v703_v50 = vrot.slane %v559_v35, %v22534_v10  ;;  %v342_v51 = vrot.slane %v314_v44, %v22519_v6  ;;  %v335_v53 = vrot.slane %v313_v43, %v22519_v6 }
  0x25   : > { %v775_v52 = vsel %vm772_vm1, %v343_v45, %v623_v36  ;;  %v461_v54 = vcombine.high %v451_v47, %v451_v47  ;;  %v561_v55 = vcombine.high %v551_v48, %v551_v48  ;;  %v619_v56 = vrot.slane %v451_v47, %v22534_v10 }
  0x26   : > { %v699_v57 = vrot.slane %v551_v48, %v22534_v10  ;;  %v328_v58 = vrot.slane %v312_v28, %v22519_v6  ;;  %v345_v59 = vcombine.high %v335_v53, %v335_v53  ;;  %v715_v60 = vrot.slane %v558_v42, %v22534_v10 }
  0x27   : > { %v778_v61 = vsel %vm772_vm1, %v342_v51, %v635_v49  ;;  %v627_v62 = vrot.slane %v461_v54, %v22534_v10  ;;  %v707_v63 = vrot.slane %v561_v55, %v22534_v10  ;;  %v774_v1 = vsel %vm772_vm1, %v335_v53, %v619_v56 }
  0x28   : > { %v631_v2 = vrot.slane %v444_v30, %v22534_v10  ;;  %v344_v4 = vcombine.high %v328_v58, %v328_v58  ;;  %v22591_v7 = vsel %vm789_vm2, %v774_v1, %v699_v57  ;;  %v22594_v8 = vsel %vm789_vm2, %v775_v52, %v703_v50 }
  0x29   : > { %v346_v9 = vcombine.high %v342_v51, %v342_v51  ;;  %915 = vrot.lane.b32.xlu0 %v22591_v7, %s22399_s20  ;;  %v776_v11 = vsel %vm772_vm1, %v345_v59, %v627_v62  ;;  %v462_v12 = vcombine.high %v458_v34, %v458_v34  ;;  %v562_v13 = vcombine.high %v558_v42, %v558_v42 }
  0x2a   : > { %v639_v14 = vrot.slane %v460_v38, %v22534_v10  ;;  %v22602_v17 = vsel %vm789_vm2, %v776_v11, %v707_v63  ;;  %v22605_v18 = vsel %vm789_vm2, %v778_v61, %v715_v60  ;;  %v711_v19 = vrot.slane %v22562_v39, %v22534_v10 }
  0x2b   : > { %v362_v20 = vcombine.high %v22549_v24, %v22549_v24  ;;  %1075 = vrot.lane.b32.xlu1 %v22602_v17, %s22399_s20  ;;  %v777_v21 = vsel %vm772_vm1, %v328_v58, %v631_v2  ;;  %v643_v22 = vrot.slane %v462_v12, %v22534_v10  ;;  %v723_v23 = vrot.slane %v562_v13, %v22534_v10 }
  0x2c   : > { %v478_v25 = vcombine.high %v470_v41, %v470_v41  ;;  %v719_v26 = vrot.slane %v560_v46, %v22534_v10  ;;  %v779_v27 = vsel %vm772_vm1, %v344_v4, %v639_v14  ;;  %v570_v30 = vrot.slane %v295_v16, %v22519_v6 }
  0x2d   : > { %v384_v28 = vrot.slane %v362_v20, %v22519_v6  ;;  %1235 = vrot.lane.b32.xlu0 %v22605_v18, %s22399_s20  ;;  %v780_v31 = vsel %vm772_vm1, %v346_v9, %v643_v22  ;;  %v486_v33 = vrot.slane %v470_v41, %v22519_v6  ;;  %v347_v34 = vcombine.high %v22539_v15, %v22539_v15 }
  0x2e   : > { %v500_v32 = vrot.slane %v478_v25, %v22519_v6  ;;  %v22628_v35 = vsel %vm789_vm2, %v780_v31, %v723_v23  ;;  %v578_v36 = vcombine.high %v570_v30, %v570_v30  ;;  %v370_v37 = vrot.slane %v22549_v24, %v22519_v6 }
  0x2f   : > { %v586_v38 = vrot.slane %v570_v30, %v22519_v6  ;;  %995 = vrot.lane.b32.xlu1 %v22594_v8, %s22399_s20  ;;  %v647_v42 = vrot.slane %v486_v33, %v22534_v10  ;;  %v394_v41 = vcombine.high %v384_v28, %v384_v28  ;;  %v22638_v15 = vsel %vm789_vm2, %v777_v21, %v711_v19 }
  0x30   : > { %v651_v39 = vrot.slane %v500_v32, %v22534_v10  ;;  %v510_v43 = vcombine.high %v500_v32, %v500_v32  ;;  %v600_v44 = vrot.slane %v578_v36, %v22519_v6  ;;  %v508_v45 = vcombine.high %v486_v33, %v486_v33 }
  0x31   : > { %1395 = vrot.lane.b32.xlu0 %v22628_v35, %s22399_s20  ;;  %v22644_v24 = vsel %vm789_vm2, %v779_v27, %v719_v26  ;;  %v361_v48 = vrot.slane %v347_v34, %v22519_v6  ;;  %v727_v50 = vrot.slane %v586_v38, %v22534_v10  ;;  %v392_v52 = vcombine.high %v370_v37, %v370_v37 }
  0x32   : > { %v782_v46 = vsel %vm772_vm1, %v384_v28, %v651_v39  ;;  %v659_v47 = vrot.slane %v510_v43, %v22534_v10  ;;  %v731_v49 = vrot.slane %v600_v44, %v22534_v10  ;;  %v610_v51 = vcombine.high %v600_v44, %v600_v44 }
  0x33   : > { %1155 = vrot.lane.b32.xlu1 %v22638_v15, %s22399_s20  ;;  %v781_v53 = vsel %vm772_vm1, %v370_v37, %v647_v42  ;;  %v608_v55 = vcombine.high %v586_v38, %v586_v38  ;;  %v463_v56 = vcombine.high %v22554_v29, %v22554_v29  ;;  %v655_v59 = vrot.slane %v508_v45, %v22534_v10 }
  0x34   : > { %v784_v54 = vsel %vm772_vm1, %v394_v41, %v659_v47  ;;  %v22658_v57 = vsel %vm789_vm2, %v782_v46, %v731_v49  ;;  %v739_v58 = vrot.slane %v610_v51, %v22534_v10  ;;  %v563_v60 = vcombine.high %v295_v16, %v295_v16 }
  0x35   : > { %1555 = vrot.lane.b32.xlu0 %v22658_v57, %s22399_s20  ;;  %v363_v61 = vcombine.high %v361_v48, %v361_v48  ;;  %v477_v62 = vrot.slane %v463_v56, %v22519_v6  ;;  %v22672_v29 = vsel %vm789_vm2, %v781_v53, %v727_v50  ;;  %v735_v9 = vrot.slane %v608_v55, %v22534_v10 }
  0x36   : > { %v22666_v63 = vsel %vm789_vm2, %v784_v54, %v739_v58  ;;  %v577_v1 = vrot.slane %v563_v60, %v22519_v6  ;;  %v783_v11 = vsel %vm772_vm1, %v392_v52, %v655_v59  ;;  %v377_v19 = vrot.slane %v361_v48, %v22519_v6  ;;  %v22758_v48 = vld [vmem:[%s25171_s1 + $0x18] sm:$0x3] }
  0x37   : > { %1315 = vrot.lane.b32.xlu1 %v22644_v24, %s22399_s20  ;;  %v479_v2 = vcombine.high %v477_v62, %v477_v62  ;;  %v493_v4 = vrot.slane %v477_v62, %v22519_v6  ;;  %v391_v14 = vrot.slane %v363_v61, %v22519_v6  ;;  %v22689_v23 = vsel %vm789_vm2, %v783_v11, %v735_v9  ;;  %v22885_v61 = vld [vmem:[%s25171_s1] sm:$0xff] }
  0x38   : > { %v579_v12 = vcombine.high %v577_v1, %v577_v1  ;;  %v593_v13 = vrot.slane %v577_v1, %v22519_v6  ;;  %v393_v33 = vcombine.high %v377_v19, %v377_v19  ;;  %v22896_v1 = vld [vmem:[%s25171_s1 + $0x8] sm:$0x3]  ;;  %v23017_v11 = vld [vmem:[%s25171_s1 + $0x20] sm:$0xff] }
  0x39   : > { %1715 = vrot.lane.b32.xlu0 %v22666_v63, %s22399_s20  ;;  %v507_v16 = vrot.slane %v479_v2, %v22519_v6  ;;  %v663_v20 = vrot.slane %v493_v4, %v22534_v10  ;;  %v509_v31 = vcombine.high %v493_v4, %v493_v4  ;;  %v395_v41 = vcombine.high %v391_v14, %v391_v14 }
  0x3a   : > { %v607_v21 = vrot.slane %v579_v12, %v22519_v6  ;;  %v743_v26 = vrot.slane %v593_v13, %v22534_v10  ;;  %v609_v32 = vcombine.high %v593_v13, %v593_v13  ;;  %v23026_v12 = vld [vmem:[%s25171_s1 + $0x28] sm:$0x3] }
  0x3b   : > { %1475 = vrot.lane.b32.xlu1 %v22672_v29, %s22399_s20  ;;  %v667_v22 = vrot.slane %v507_v16, %v22534_v10  ;;  %v785_v28 = vsel %vm772_vm1, %v377_v19, %v663_v20  ;;  %v671_v34 = vrot.slane %v509_v31, %v22534_v10  ;;  %v511_v39 = vcombine.high %v507_v16, %v507_v16  ;;  %v23290_v31 = vld [vmem:[%s25171_s1 + $0x48] sm:$0x3] }
  0x3c   : > { %v747_v25 = vrot.slane %v607_v21, %v22534_v10  ;;  %v22703_v6 = vsel %vm789_vm2, %v785_v28, %v743_v26  ;;  %v751_v36 = vrot.slane %v609_v32, %v22534_v10  ;;  %v611_v42 = vcombine.high %v607_v21, %v607_v21  ;;  %v23164_v28 = vld [vmem:[%s25171_s1 + $0x38] sm:$0x3] }
  0x3d   : > { %v786_v27 = vsel %vm772_vm1, %v391_v14, %v667_v22  ;;  %v787_v37 = vsel %vm772_vm1, %v393_v33, %v671_v34  ;;  %v675_v43 = vrot.slane %v511_v39, %v22534_v10  ;;  %v818_v33 = vld [vmem:[%s25171_s1 + $0x50] sm:$0xff]  ;;  %v23412_v34 = vld [vmem:[%s25171_s1 + $0x58] sm:$0x3]  ;;  %v23522_v39 = vld [vmem:[%s25171_s1 + $0x68] sm:$0x3] }
  0x3e   : > { %v22696_v30 = vsel %vm789_vm2, %v786_v27, %v747_v25  ;;  %v22737_v38 = vsel %vm789_vm2, %v787_v37, %v751_v36  ;;  %v755_v44 = vrot.slane %v611_v42, %v22534_v10  ;;  %v23155_v27 = vld [vmem:[%s25171_s1 + $0x30] sm:$0xff]  ;;  %v23510_v37 = vld [vmem:[%s25171_s1 + $0x60] sm:$0xff]  ;;  %v10880_v42 = vadd.s32 8, %v22510_v3 }
  0x3f   : > { %1635 = vrot.lane.b32.xlu1 %v22689_v23, %s22399_s20  ;;  %1875 = vrot.lane.b32.xlu0 %v22696_v30, %s22399_s20  ;;  %v788_v45 = vsel %vm772_vm1, %v395_v41, %v675_v43  ;;  %v22403_v43 = vmov 0.0  }
  0x40   : > { %v22749_v46 = vsel %vm789_vm2, %v788_v45, %v755_v44  ;;  %v22404_v45 = vmov 1.0  }
  0x43   : > { %1795 = vrot.lane.b32.xlu1 %v22703_v6, %s22399_s20  ;;  %3123 = vrot.lane.b32.xlu0 %v22591_v7, %s22400_s21 }
  0x47   : > { %3038 = vrot.lane.b32.xlu1 %v22565_v40, %s22400_s21  ;;  %3281 = vrot.lane.b32.xlu0 %v22602_v17, %s22400_s21 }
  0x4b   : > { %3202 = vrot.lane.b32.xlu1 %v22594_v8, %s22400_s21  ;;  %3439 = vrot.lane.b32.xlu0 %v22605_v18, %s22400_s21 }
  0x4f   : > { %3360 = vrot.lane.b32.xlu1 %v22638_v15, %s22400_s21  ;;  %3597 = vrot.lane.b32.xlu0 %v22628_v35, %s22400_s21 }
  0x53   : > { %3518 = vrot.lane.b32.xlu1 %v22644_v24, %s22400_s21  ;;  %3755 = vrot.lane.b32.xlu0 %v22658_v57, %s22400_s21 }
  0x57   : > { %3676 = vrot.lane.b32.xlu1 %v22672_v29, %s22400_s21  ;;  %3913 = vrot.lane.b32.xlu0 %v22666_v63, %s22400_s21 }
  0x5b   : > { %3834 = vrot.lane.b32.xlu1 %v22689_v23, %s22400_s21  ;;  %4071 = vrot.lane.b32.xlu0 %v22696_v30, %s22400_s21 }
  0x5f   : > { %3992 = vrot.lane.b32.xlu1 %v22703_v6, %s22400_s21  ;;  %6246 = vrot.lane.b32.xlu0 %v22737_v38, %s22399_s20 }
  0x63   : > { %7334 = vrot.lane.b32.xlu1 %v22737_v38, %s22400_s21  ;;  %9509 = vrot.lane.b32.xlu0 %v22749_v46, %s22399_s20 }
  0x67   : > { %10597 = vrot.lane.b32.xlu1 %v22749_v46, %s22400_s21 }
  0x95   : > { %v828_v47 = vpop.permute.xlu0 %827 }
  0x96   : > { %20006 = vmatprep.subr.msk.mxu0 %vm836_vm3, %v828_v47 }
  0x97   : > { %20007 = vmatpush3.msk.msra.mxu0 %vm836_vm3, %v828_v47  ;;  %v22405_v47 = vmov 0.0|0.0  }
  0x98   : > { %20009 = vmatmul.mubr.msk.f32.vlgmr.msra.gmra.mrb[0].mxu0 %vm829_vm0, %v22758_v48 }
  0x99   : > { %20013 = vmatprep.mubr.msk.f32.mxu0 %vm829_vm0, %v22516_v5 }
  0x9b   : > { %v22766_v10 = vpop.permute.xlu0 %915 }
  0x9c   : > { %20011 = vmatprep.subr.msk.mxu0 %vm836_vm3, %v22766_v10 }
  0x9d   : > { %v22770_v49 = vpop.permute.xlu1 %1075  ;;  %20012 = vmatpush3.msk.msra.mxu0 %vm836_vm3, %v22766_v10 }
  0x9e   : > { %20021 = vmatprep.subr.msk.mxu1 %vm836_vm3, %v22770_v49  ;;  %20014 = vmatmul.mubr.msk.f32.vlgmr.msra.gmra.mrb[2].mxu0 %vm829_vm0, %v22758_v48 }
  0x9f   : > { %20022 = vmatpush3.msk.msra.mxu1 %vm836_vm3, %v22770_v49  ;;  %v22780_v50 = vpop.permute.xlu0 %1235  ;;  %20018 = vmatprep.mubr.msk.f32.mxu0 %vm829_vm0, %v22516_v5 }
  0xa0   : > { %20024 = vmatmul.mubr.msk.f32.vlgmr.msra.gmra.mrb[0].mxu1 %vm829_vm0, %v22758_v48  ;;  %20031 = vmatprep.subr.msk.mxu1 %vm836_vm3, %v22780_v50 }
  0xa1   : > { %v22788_v51 = vpop.permute.xlu1 %995  ;;  %20032 = vmatpush3.msk.msra.mxu1 %vm836_vm3, %v22780_v50  ;;  %20033 = vmatprep.mubr.msk.f32.mxu1 %vm829_vm0, %v22516_v5 }
  0xa2   : > { %20016 = vmatprep.subr.msk.mxu0 %vm836_vm3, %v22788_v51 }
  0xa3   : > { %20017 = vmatpush3.msk.msra.mxu0 %vm836_vm3, %v22788_v51  ;;  %v22798_v52 = vpop.permute.xlu0 %1395 }
  0xa4   : > { %20019 = vmatmul.mubr.msk.f32.vlgmr.msra.gmra.mrb[4].mxu0 %vm829_vm0, %v22758_v48  ;;  %20034 = vmatmul.mubr.msk.f32.vlgmr.msra.gmra.mrb[2].mxu1 %vm829_vm0, %v22758_v48 }
  0xa5   : > { %v22804_v53 = vpop.permute.xlu1 %1155  ;;  %20041 = vmatprep.subr.msk.mxu1 %vm836_vm3, %v22798_v52  ;;  %20028 = vmatprep.mubr.msk.f32.mxu0 %vm829_vm0, %v22516_v5 }
  0xa6   : > { %20026 = vmatprep.subr.msk.mxu0 %vm836_vm3, %v22804_v53  ;;  %20042 = vmatpush3.msk.msra.mxu1 %vm836_vm3, %v22798_v52 }
  0xa7   : > { %20027 = vmatpush3.msk.msra.mxu0 %vm836_vm3, %v22804_v53  ;;  %20043 = vmatprep.mubr.msk.f32.mxu1 %vm829_vm0, %v22516_v5  ;;  %v22818_v54 = vpop.permute.xlu0 %1555 }
  0xa8   : > { %20029 = vmatmul.mubr.msk.f32.vlgmr.msra.gmra.mrb[6].mxu0 %vm829_vm0, %v22758_v48  ;;  %20044 = vmatmul.mubr.msk.f32.vlgmr.msra.gmra.mrb[4].mxu1 %vm829_vm0, %v22758_v48 }
  0xa9   : > { %v22824_v55 = vpop.permute.xlu1 %1315  ;;  %20051 = vmatprep.subr.msk.mxu1 %vm836_vm3, %v22818_v54  ;;  %20038 = vmatprep.mubr.msk.f32.mxu0 %vm829_vm0, %v22516_v5 }
  0xaa   : > { %20036 = vmatprep.subr.msk.mxu0 %vm836_vm3, %v22824_v55  ;;  %20052 = vmatpush3.msk.msra.mxu1 %vm836_vm3, %v22818_v54 }
  0xab   : > { %20037 = vmatpush3.msk.msra.mxu0 %vm836_vm3, %v22824_v55  ;;  %20053 = vmatprep.mubr.msk.f32.mxu1 %vm829_vm0, %v22516_v5  ;;  %v22838_v56 = vpop.permute.xlu0 %1715 }
  0xac   : > { %20039 = vmatmul.mubr.msk.f32.vlgmr.msra.gmra.mrb[8].mxu0 %vm829_vm0, %v22758_v48  ;;  %20054 = vmatmul.mubr.msk.f32.vlgmr.msra.gmra.mrb[6].mxu1 %vm829_vm0, %v22758_v48 }
  0xad   : > { %v22844_v58 = vpop.permute.xlu1 %1475  ;;  %20061 = vmatprep.subr.msk.mxu1 %vm836_vm3, %v22838_v56  ;;  %20048 = vmatprep.mubr.msk.f32.mxu0 %vm829_vm0, %v22516_v5 }
  0xae   : > { %20046 = vmatprep.subr.msk.mxu0 %vm836_vm3, %v22844_v58  ;;  %20062 = vmatpush3.msk.msra.mxu1 %vm836_vm3, %v22838_v56 }
  0xaf   : > { %20047 = vmatpush3.msk.msra.mxu0 %vm836_vm3, %v22844_v58  ;;  %20063 = vmatprep.mubr.msk.f32.mxu1 %vm829_vm0, %v22516_v5 }
  0xb0   : > { %20049 = vmatmul.mubr.msk.f32.vlgmr.msra.gmra.mrb[10].mxu0 %vm829_vm0, %v22758_v48  ;;  %20064 = vmatmul.mubr.msk.f32.vlgmr.msra.gmra.mrb[8].mxu1 %vm829_vm0, %v22758_v48 }
  0xb1   : > { %v22862_v59 = vpop.permute.xlu1 %1635  ;;  %v22864_v60 = vpop.permute.xlu0 %1875  ;;  %20058 = vmatprep.mubr.msk.f32.mxu0 %vm829_vm0, %v22516_v5  ;;  %20073 = vmatprep.mubr.msk.f32.mxu1 %vm829_vm0, %v22516_v5 }
  0xb2   : > { %20056 = vmatprep.subr.msk.mxu0 %vm836_vm3, %v22862_v59  ;;  %20071 = vmatprep.subr.msk.mxu1 %vm836_vm3, %v22864_v60 }
  0xb3   : > { %20057 = vmatpush3.msk.msra.mxu0 %vm836_vm3, %v22862_v59  ;;  %20072 = vmatpush3.msk.msra.mxu1 %vm836_vm3, %v22864_v60 }
  0xb4   : > { %20059 = vmatmul.mubr.msk.f32.vlgmr.msra.gmra.mrb[12].mxu0 %vm829_vm0, %v22758_v48  ;;  %20074 = vmatmul.mubr.msk.f32.vlgmr.msra.gmra.mrb[10].mxu1 %vm829_vm0, %v22758_v48 }
  0xb5   : > { %v22887_v62 = vpop.permute.xlu1 %1795  ;;  %20081 = vmatprep.subr.msk.mxu1 %vm836_vm3, %v22591_v7  ;;  %20068 = vmatprep.mubr.msk.f32.mxu0 %vm829_vm0, %v22516_v5  ;;  %v22950_v5 = vpop.permute.xlu0 %3123 }
  0xb6   : > { %20066 = vmatprep.subr.msk.mxu0 %vm836_vm3, %v22887_v62  ;;  %20082 = vmatpush3.msk.msra.mxu1 %vm836_vm3, %v22591_v7 }
  0xb7   : > { %20067 = vmatpush3.msk.msra.mxu0 %vm836_vm3, %v22887_v62  ;;  %20083 = vmatprep.mubr.msk.f32.mxu1 %vm829_vm0, %v22885_v61 }
  0xb8   : > { %20069 = vmatmul.mubr.msk.f32.vlgmr.msra.gmra.mrb[14].mxu0 %vm829_vm0, %v22758_v48  ;;  %20084 = vmatmul.mubr.msk.f32.vlgmr.msra.gmra.mrb[12].mxu1 %vm829_vm0, %v22896_v1 }
  0xb9   : > { %20076 = vmatprep.subr.msk.mxu0 %vm836_vm3, %v22565_v40  ;;  %20091 = vmatprep.subr.msk.mxu1 %vm836_vm3, %v22602_v17  ;;  %v22976_v2 = vpop.permute.xlu0 %3281 }
  0xba   : > { %20077 = vmatpush3.msk.msra.mxu0 %vm836_vm3, %v22565_v40  ;;  %20078 = vmatprep.mubr.msk.f32.mxu0 %vm829_vm0, %v22885_v61  ;;  %v3039_v40 = vpop.permute.xlu1 %3038 }
  0xbb   : > { %20092 = vmatpush3.msk.msra.mxu1 %vm836_vm3, %v22602_v17  ;;  %20093 = vmatprep.mubr.msk.f32.mxu1 %vm829_vm0, %v22885_v61 }
  0xbc   : > { %20079 = vmatmul.mubr.msk.f32.vlgmr.msra.gmra.mrb[0].mxu0 %vm829_vm0, %v22896_v1  ;;  %20094 = vmatmul.mubr.msk.f32.vlgmr.msra.gmra.mrb[0].mxu1 %vm829_vm0, %v22896_v1 }
  0xbd   : > { %20086 = vmatprep.subr.msk.mxu0 %vm836_vm3, %v22594_v8  ;;  %20101 = vmatprep.subr.msk.mxu1 %vm836_vm3, %v22605_v18  ;;  %v23004_v9 = vpop.permute.xlu0 %3439 }
  0xbe   : > { %20087 = vmatpush3.msk.msra.mxu0 %vm836_vm3, %v22594_v8  ;;  %20088 = vmatprep.mubr.msk.f32.mxu0 %vm829_vm0, %v22885_v61  ;;  %v22994_v4 = vpop.permute.xlu1 %3202 }
  0xbf   : > { %20102 = vmatpush3.msk.msra.mxu1 %vm836_vm3, %v22605_v18  ;;  %20103 = vmatprep.mubr.msk.f32.mxu1 %vm829_vm0, %v22885_v61 }
  0xc0   : > { %20089 = vmatmul.mubr.msk.f32.vlgmr.msra.gmra.mrb[4].mxu0 %vm829_vm0, %v22896_v1  ;;  %20104 = vmatmul.mubr.msk.f32.vlgmr.msra.gmra.mrb[2].mxu1 %vm829_vm0, %v22896_v1 }
  0xc1   : > { %20096 = vmatprep.subr.msk.mxu0 %vm836_vm3, %v22638_v15  ;;  %20111 = vmatprep.subr.msk.mxu1 %vm836_vm3, %v22628_v35  ;;  %v23042_v14 = vpop.permute.xlu0 %3597 }
  0xc2   : > { %20097 = vmatpush3.msk.msra.mxu0 %vm836_vm3, %v22638_v15  ;;  %20098 = vmatprep.mubr.msk.f32.mxu0 %vm829_vm0, %v22885_v61  ;;  %v23032_v13 = vpop.permute.xlu1 %3360 }
  0xc3   : > { %20112 = vmatpush3.msk.msra.mxu1 %vm836_vm3, %v22628_v35  ;;  %20113 = vmatprep.mubr.msk.f32.mxu1 %vm829_vm0, %v22885_v61 }
  0xc4   : > { %20099 = vmatmul.mubr.msk.f32.vlgmr.msra.gmra.mrb[6].mxu0 %vm829_vm0, %v22896_v1  ;;  %20114 = vmatmul.mubr.msk.f32.vlgmr.msra.gmra.mrb[4].mxu1 %vm829_vm0, %v22896_v1 }
  0xc5   : > { %20106 = vmatprep.subr.msk.mxu0 %vm836_vm3, %v22644_v24  ;;  %20121 = vmatprep.subr.msk.mxu1 %vm836_vm3, %v22658_v57  ;;  %v23068_v19 = vpop.permute.xlu0 %3755 }
  0xc6   : > { %20107 = vmatpush3.msk.msra.mxu0 %vm836_vm3, %v22644_v24  ;;  %20108 = vmatprep.mubr.msk.f32.mxu0 %vm829_vm0, %v22885_v61  ;;  %v23058_v16 = vpop.permute.xlu1 %3518 }
  0xc7   : > { %20122 = vmatpush3.msk.msra.mxu1 %vm836_vm3, %v22658_v57  ;;  %20123 = vmatprep.mubr.msk.f32.mxu1 %vm829_vm0, %v22885_v61 }
  0xc8   : > { %20109 = vmatmul.mubr.msk.f32.vlgmr.msra.gmra.mrb[8].mxu0 %vm829_vm0, %v22896_v1  ;;  %20124 = vmatmul.mubr.msk.f32.vlgmr.msra.gmra.mrb[6].mxu1 %vm829_vm0, %v22896_v1 }
  0xc9   : > { %20116 = vmatprep.subr.msk.mxu0 %vm836_vm3, %v22672_v29  ;;  %20131 = vmatprep.subr.msk.mxu1 %vm836_vm3, %v22666_v63  ;;  %v23096_v21 = vpop.permute.xlu0 %3913 }
  0xca   : > { %20117 = vmatpush3.msk.msra.mxu0 %vm836_vm3, %v22672_v29  ;;  %20118 = vmatprep.mubr.msk.f32.mxu0 %vm829_vm0, %v22885_v61  ;;  %v23086_v20 = vpop.permute.xlu1 %3676 }
  0xcb   : > { %20132 = vmatpush3.msk.msra.mxu1 %vm836_vm3, %v22666_v63  ;;  %20133 = vmatprep.mubr.msk.f32.mxu1 %vm829_vm0, %v22885_v61 }
  0xcc   : > { %20119 = vmatmul.mubr.msk.f32.vlgmr.msra.gmra.mrb[10].mxu0 %vm829_vm0, %v22896_v1  ;;  %20134 = vmatmul.mubr.msk.f32.vlgmr.msra.gmra.mrb[8].mxu1 %vm829_vm0, %v22896_v1 }
  0xcd   : > { %20126 = vmatprep.subr.msk.mxu0 %vm836_vm3, %v22689_v23  ;;  %20141 = vmatprep.subr.msk.mxu1 %vm836_vm3, %v22696_v30  ;;  %v23124_v25 = vpop.permute.xlu0 %4071 }
  0xce   : > { %20127 = vmatpush3.msk.msra.mxu0 %vm836_vm3, %v22689_v23  ;;  %20128 = vmatprep.mubr.msk.f32.mxu0 %vm829_vm0, %v22885_v61  ;;  %v23114_v22 = vpop.permute.xlu1 %3834 }
  0xcf   : > { %20142 = vmatpush3.msk.msra.mxu1 %vm836_vm3, %v22696_v30  ;;  %20143 = vmatprep.mubr.msk.f32.mxu1 %vm829_vm0, %v22885_v61 }
  0xd0   : > { %20129 = vmatmul.mubr.msk.f32.vlgmr.msra.gmra.mrb[12].mxu0 %vm829_vm0, %v22896_v1  ;;  %20144 = vmatmul.mubr.msk.f32.vlgmr.msra.gmra.mrb[10].mxu1 %vm829_vm0, %v22896_v1 }
  0xd1   : > { %20136 = vmatprep.subr.msk.mxu0 %vm836_vm3, %v22703_v6  ;;  %20151 = vmatprep.subr.msk.mxu1 %vm836_vm3, %v22950_v5  ;;  %v23368_v32 = vpop.permute.xlu0 %6246 }
  0xd2   : > { %20137 = vmatpush3.msk.msra.mxu0 %vm836_vm3, %v22703_v6  ;;  %20138 = vmatprep.mubr.msk.f32.mxu0 %vm829_vm0, %v22885_v61  ;;  %v23142_v26 = vpop.permute.xlu1 %3992 }
  0xd3   : > { %20152 = vmatpush3.msk.msra.mxu1 %vm836_vm3, %v22950_v5  ;;  %20153 = vmatprep.mubr.msk.f32.mxu1 %vm829_vm0, %v23017_v11 }
  0xd4   : > { %20139 = vmatmul.mubr.msk.f32.vlgmr.msra.gmra.mrb[14].mxu0 %vm829_vm0, %v22896_v1  ;;  %20154 = vmatmul.mubr.msk.f32.vlgmr.msra.gmra.mrb[12].mxu1 %vm829_vm0, %v23026_v12 }
  0xd5   : > { %20146 = vmatprep.subr.msk.mxu0 %vm836_vm3, %v3039_v40  ;;  %20161 = vmatprep.subr.msk.mxu1 %vm836_vm3, %v22976_v2 }
  0xd6   : > { %20147 = vmatpush3.msk.msra.mxu0 %vm836_vm3, %v3039_v40  ;;  %20148 = vmatprep.mubr.msk.f32.mxu0 %vm829_vm0, %v23017_v11  ;;  %v23481_v36 = vpop.permute.xlu1 %7334 }
  0xd7   : > { %20162 = vmatpush3.msk.msra.mxu1 %vm836_vm3, %v22976_v2  ;;  %20163 = vmatprep.mubr.msk.f32.mxu1 %vm829_vm0, %v23017_v11 }
  0xd8   : > { %20149 = vmatmul.mubr.msk.f32.vlgmr.msra.gmra.mrb[0].mxu0 %vm829_vm0, %v23026_v12  ;;  %20164 = vmatmul.mubr.msk.f32.vlgmr.msra.gmra.mrb[0].mxu1 %vm829_vm0, %v23026_v12 }
  0xd9   : > { %20156 = vmatprep.subr.msk.mxu0 %vm836_vm3, %v22994_v4  ;;  %20171 = vmatprep.subr.msk.mxu1 %vm836_vm3, %v23004_v9 }
  0xda   : > { %20157 = vmatpush3.msk.msra.mxu0 %vm836_vm3, %v22994_v4  ;;  %20158 = vmatprep.mubr.msk.f32.mxu0 %vm829_vm0, %v23017_v11 }
  0xdb   : > { %20172 = vmatpush3.msk.msra.mxu1 %vm836_vm3, %v23004_v9  ;;  %20173 = vmatprep.mubr.msk.f32.mxu1 %vm829_vm0, %v23017_v11 }
  0xdc   : > { %20159 = vmatmul.mubr.msk.f32.vlgmr.msra.gmra.mrb[4].mxu0 %vm829_vm0, %v23026_v12  ;;  %20174 = vmatmul.mubr.msk.f32.vlgmr.msra.gmra.mrb[2].mxu1 %vm829_vm0, %v23026_v12 }
  0xdd   : > { %20166 = vmatprep.subr.msk.mxu0 %vm836_vm3, %v23032_v13  ;;  %20181 = vmatprep.subr.msk.mxu1 %vm836_vm3, %v23042_v14 }
  0xde   : > { %20167 = vmatpush3.msk.msra.mxu0 %vm836_vm3, %v23032_v13  ;;  %20168 = vmatprep.mubr.msk.f32.mxu0 %vm829_vm0, %v23017_v11 }
  0xdf   : > { %20182 = vmatpush3.msk.msra.mxu1 %vm836_vm3, %v23042_v14  ;;  %20183 = vmatprep.mubr.msk.f32.mxu1 %vm829_vm0, %v23017_v11 }
  0xe0   : > { %20169 = vmatmul.mubr.msk.f32.vlgmr.msra.gmra.mrb[6].mxu0 %vm829_vm0, %v23026_v12  ;;  %20184 = vmatmul.mubr.msk.f32.vlgmr.msra.gmra.mrb[4].mxu1 %vm829_vm0, %v23026_v12 }
  0xe1   : > { %20176 = vmatprep.subr.msk.mxu0 %vm836_vm3, %v23058_v16  ;;  %20191 = vmatprep.subr.msk.mxu1 %vm836_vm3, %v23068_v19 }
  0xe2   : > { %20177 = vmatpush3.msk.msra.mxu0 %vm836_vm3, %v23058_v16  ;;  %20178 = vmatprep.mubr.msk.f32.mxu0 %vm829_vm0, %v23017_v11 }
  0xe3   : > { %20192 = vmatpush3.msk.msra.mxu1 %vm836_vm3, %v23068_v19  ;;  %20193 = vmatprep.mubr.msk.f32.mxu1 %vm829_vm0, %v23017_v11 }
  0xe4   : > { %20179 = vmatmul.mubr.msk.f32.vlgmr.msra.gmra.mrb[8].mxu0 %vm829_vm0, %v23026_v12  ;;  %20194 = vmatmul.mubr.msk.f32.vlgmr.msra.gmra.mrb[6].mxu1 %vm829_vm0, %v23026_v12 }
  0xe5   : > { %20186 = vmatprep.subr.msk.mxu0 %vm836_vm3, %v23086_v20  ;;  %20201 = vmatprep.subr.msk.mxu1 %vm836_vm3, %v23096_v21 }
  0xe6   : > { %20187 = vmatpush3.msk.msra.mxu0 %vm836_vm3, %v23086_v20  ;;  %20188 = vmatprep.mubr.msk.f32.mxu0 %vm829_vm0, %v23017_v11 }
  0xe7   : > { %20202 = vmatpush3.msk.msra.mxu1 %vm836_vm3, %v23096_v21  ;;  %20203 = vmatprep.mubr.msk.f32.mxu1 %vm829_vm0, %v23017_v11 }
  0xe8   : > { %20189 = vmatmul.mubr.msk.f32.vlgmr.msra.gmra.mrb[10].mxu0 %vm829_vm0, %v23026_v12  ;;  %20204 = vmatmul.mubr.msk.f32.vlgmr.msra.gmra.mrb[8].mxu1 %vm829_vm0, %v23026_v12 }
  0xe9   : > { %20196 = vmatprep.subr.msk.mxu0 %vm836_vm3, %v23114_v22  ;;  %20211 = vmatprep.subr.msk.mxu1 %vm836_vm3, %v23124_v25 }
  0xea   : > { %20197 = vmatpush3.msk.msra.mxu0 %vm836_vm3, %v23114_v22  ;;  %20198 = vmatprep.mubr.msk.f32.mxu0 %vm829_vm0, %v23017_v11 }
  0xeb   : > { %20212 = vmatpush3.msk.msra.mxu1 %vm836_vm3, %v23124_v25  ;;  %20213 = vmatprep.mubr.msk.f32.mxu1 %vm829_vm0, %v23017_v11 }
  0xec   : > { %20199 = vmatmul.mubr.msk.f32.vlgmr.msra.gmra.mrb[12].mxu0 %vm829_vm0, %v23026_v12  ;;  %20214 = vmatmul.mubr.msk.f32.vlgmr.msra.gmra.mrb[10].mxu1 %vm829_vm0, %v23026_v12 }
  0xed   : > { %20206 = vmatprep.subr.msk.mxu0 %vm836_vm3, %v23142_v26  ;;  %20221 = vmatprep.subr.msk.mxu1 %vm836_vm3, %v22594_v8 }
  0xee   : > { %20207 = vmatpush3.msk.msra.mxu0 %vm836_vm3, %v23142_v26  ;;  %20208 = vmatprep.mubr.msk.f32.mxu0 %vm829_vm0, %v23017_v11 }
  0xef   : > { %20222 = vmatpush3.msk.msra.mxu1 %vm836_vm3, %v22594_v8  ;;  %20223 = vmatprep.mubr.msk.f32.mxu1 %vm829_vm0, %v23155_v27 }
  0xf0   : > { %20209 = vmatmul.mubr.msk.f32.vlgmr.msra.gmra.mrb[14].mxu0 %vm829_vm0, %v23026_v12  ;;  %20224 = vmatmul.mubr.msk.f32.vlgmr.msra.gmra.mrb[12].mxu1 %vm829_vm0, %v23164_v28 }
  0xf1   : > { %20216 = vmatprep.subr.msk.mxu0 %vm836_vm3, %v22591_v7  ;;  %20231 = vmatprep.subr.msk.mxu1 %vm836_vm3, %v22638_v15 }
  0xf2   : > { %20217 = vmatpush3.msk.msra.mxu0 %vm836_vm3, %v22591_v7  ;;  %20218 = vmatprep.mubr.msk.f32.mxu0 %vm829_vm0, %v23155_v27  ;;  %v23281_v7 = vld [vmem:[%s25171_s1 + $0x40] sm:$0xff] }
  0xf3   : > { %20232 = vmatpush3.msk.msra.mxu1 %vm836_vm3, %v22638_v15  ;;  %20233 = vmatprep.mubr.msk.f32.mxu1 %vm829_vm0, %v23155_v27 }
  0xf4   : > { %20219 = vmatmul.mubr.msk.f32.vlgmr.msra.gmra.mrb[0].mxu0 %vm829_vm0, %v23164_v28  ;;  %20234 = vmatmul.mubr.msk.f32.vlgmr.msra.gmra.mrb[0].mxu1 %vm829_vm0, %v23164_v28 }
  0xf5   : > { %20226 = vmatprep.subr.msk.mxu0 %vm836_vm3, %v22602_v17  ;;  %20241 = vmatprep.subr.msk.mxu1 %vm836_vm3, %v22644_v24 }
  0xf6   : > { %20227 = vmatpush3.msk.msra.mxu0 %vm836_vm3, %v22602_v17  ;;  %20228 = vmatprep.mubr.msk.f32.mxu0 %vm829_vm0, %v23155_v27 }
  0xf7   : > { %20242 = vmatpush3.msk.msra.mxu1 %vm836_vm3, %v22644_v24  ;;  %20243 = vmatprep.mubr.msk.f32.mxu1 %vm829_vm0, %v23155_v27 }
  0xf8   : > { %20229 = vmatmul.mubr.msk.f32.vlgmr.msra.gmra.mrb[4].mxu0 %vm829_vm0, %v23164_v28  ;;  %20244 = vmatmul.mubr.msk.f32.vlgmr.msra.gmra.mrb[2].mxu1 %vm829_vm0, %v23164_v28 }
  0xf9   : > { %20236 = vmatprep.subr.msk.mxu0 %vm836_vm3, %v22605_v18  ;;  %20251 = vmatprep.subr.msk.mxu1 %vm836_vm3, %v22672_v29 }
  0xfa   : > { %20237 = vmatpush3.msk.msra.mxu0 %vm836_vm3, %v22605_v18  ;;  %20238 = vmatprep.mubr.msk.f32.mxu0 %vm829_vm0, %v23155_v27 }
  0xfb   : > { %20252 = vmatpush3.msk.msra.mxu1 %vm836_vm3, %v22672_v29  ;;  %20253 = vmatprep.mubr.msk.f32.mxu1 %vm829_vm0, %v23155_v27 }
  0xfc   : > { %20239 = vmatmul.mubr.msk.f32.vlgmr.msra.gmra.mrb[6].mxu0 %vm829_vm0, %v23164_v28  ;;  %20254 = vmatmul.mubr.msk.f32.vlgmr.msra.gmra.mrb[4].mxu1 %vm829_vm0, %v23164_v28 }
  0xfd   : > { %20246 = vmatprep.subr.msk.mxu0 %vm836_vm3, %v22628_v35  ;;  %20261 = vmatprep.subr.msk.mxu1 %vm836_vm3, %v22689_v23 }
  0xfe   : > { %20247 = vmatpush3.msk.msra.mxu0 %vm836_vm3, %v22628_v35  ;;  %20248 = vmatprep.mubr.msk.f32.mxu0 %vm829_vm0, %v23155_v27 }
  0xff   : > { %20262 = vmatpush3.msk.msra.mxu1 %vm836_vm3, %v22689_v23  ;;  %20263 = vmatprep.mubr.msk.f32.mxu1 %vm829_vm0, %v23155_v27 }
 0x100   : > { %20249 = vmatmul.mubr.msk.f32.vlgmr.msra.gmra.mrb[8].mxu0 %vm829_vm0, %v23164_v28  ;;  %20264 = vmatmul.mubr.msk.f32.vlgmr.msra.gmra.mrb[6].mxu1 %vm829_vm0, %v23164_v28 }
 0x101   : > { %20271 = vmatprep.subr.msk.mxu1 %vm836_vm3, %v22703_v6  ;;  %20256 = vmatprep.subr.msk.mxu0 %vm836_vm3, %v22658_v57 }
 0x102   : > { %20272 = vmatpush3.msk.msra.mxu1 %vm836_vm3, %v22703_v6  ;;  %20257 = vmatpush3.msk.msra.mxu0 %vm836_vm3, %v22658_v57 }
 0x103   : > { %20258 = vmatprep.mubr.msk.f32.mxu0 %vm829_vm0, %v23155_v27  ;;  %20273 = vmatprep.mubr.msk.f32.mxu1 %vm829_vm0, %v23155_v27 }
 0x104   : > { %20281 = vmatprep.subr.msk.mxu1 %vm836_vm3, %v22737_v38  ;;  %20259 = vmatmul.mubr.msk.f32.vlgmr.msra.gmra.mrb[10].mxu0 %vm829_vm0, %v23164_v28 }
 0x105   : > { %20274 = vmatmul.mubr.msk.f32.vlgmr.msra.gmra.mrb[8].mxu1 %vm829_vm0, %v23164_v28  ;;  %20266 = vmatprep.subr.msk.mxu0 %vm836_vm3, %v22666_v63 }
 0x106   : > { %20282 = vmatpush3.msk.msra.mxu1 %vm836_vm3, %v22737_v38  ;;  %20267 = vmatpush3.msk.msra.mxu0 %vm836_vm3, %v22666_v63 }
 0x107   : > { %20291 = vmatprep.subr.msk.mxu1 %vm836_vm3, %v22788_v51  ;;  %20268 = vmatprep.mubr.msk.f32.mxu0 %vm829_vm0, %v23155_v27 }
 0x108   : > { %20276 = vmatprep.subr.msk.mxu0 %vm836_vm3, %v22696_v30  ;;  %20283 = vmatprep.mubr.msk.f32.mxu1 %vm829_vm0, %v23155_v27 }
 0x109   : > { %20269 = vmatmul.mubr.msk.f32.vlgmr.msra.gmra.mrb[12].mxu0 %vm829_vm0, %v23164_v28  ;;  %20284 = vmatmul.mubr.msk.f32.vlgmr.msra.gmra.mrb[10].mxu1 %vm829_vm0, %v23164_v28 }
 0x10a   : > { %20277 = vmatpush3.msk.msra.mxu0 %vm836_vm3, %v22696_v30  ;;  %20292 = vmatpush3.msk.msra.mxu1 %vm836_vm3, %v22788_v51 }
 0x10b   : > { %20286 = vmatprep.subr.msk.mxu0 %vm836_vm3, %v22766_v10  ;;  %20301 = vmatprep.subr.msk.mxu1 %vm836_vm3, %v22804_v53 }
 0x10c   : > { %20278 = vmatprep.mubr.msk.f32.mxu0 %vm829_vm0, %v23155_v27  ;;  %20293 = vmatprep.mubr.msk.f32.mxu1 %vm829_vm0, %v23281_v7 }
 0x10d   : > { %20279 = vmatmul.mubr.msk.f32.vlgmr.msra.gmra.mrb[14].mxu0 %vm829_vm0, %v23164_v28  ;;  %20294 = vmatmul.mubr.msk.f32.vlgmr.msra.gmra.mrb[12].mxu1 %vm829_vm0, %v23290_v31 }
 0x10e   : > { %20287 = vmatpush3.msk.msra.mxu0 %vm836_vm3, %v22766_v10  ;;  %20302 = vmatpush3.msk.msra.mxu1 %vm836_vm3, %v22804_v53 }
 0x10f   : > { %20296 = vmatprep.subr.msk.mxu0 %vm836_vm3, %v22770_v49  ;;  %20311 = vmatprep.subr.msk.mxu1 %vm836_vm3, %v22824_v55 }
 0x110   : > { %20288 = vmatprep.mubr.msk.f32.mxu0 %vm829_vm0, %v23281_v7  ;;  %20303 = vmatprep.mubr.msk.f32.mxu1 %vm829_vm0, %v23281_v7 }
 0x111   : > { %20289 = vmatmul.mubr.msk.f32.vlgmr.msra.gmra.mrb[0].mxu0 %vm829_vm0, %v23290_v31  ;;  %20304 = vmatmul.mubr.msk.f32.vlgmr.msra.gmra.mrb[0].mxu1 %vm829_vm0, %v23290_v31 }
 0x112   : > { %20297 = vmatpush3.msk.msra.mxu0 %vm836_vm3, %v22770_v49  ;;  %20312 = vmatpush3.msk.msra.mxu1 %vm836_vm3, %v22824_v55 }
 0x113   : > { %20306 = vmatprep.subr.msk.mxu0 %vm836_vm3, %v22780_v50  ;;  %20321 = vmatprep.subr.msk.mxu1 %vm836_vm3, %v22844_v58 }
 0x114   : > { %20298 = vmatprep.mubr.msk.f32.mxu0 %vm829_vm0, %v23281_v7  ;;  %20313 = vmatprep.mubr.msk.f32.mxu1 %vm829_vm0, %v23281_v7 }
 0x115   : > { %20299 = vmatmul.mubr.msk.f32.vlgmr.msra.gmra.mrb[4].mxu0 %vm829_vm0, %v23290_v31  ;;  %20314 = vmatmul.mubr.msk.f32.vlgmr.msra.gmra.mrb[2].mxu1 %vm829_vm0, %v23290_v31 }
 0x116   : > { %20307 = vmatpush3.msk.msra.mxu0 %vm836_vm3, %v22780_v50  ;;  %20322 = vmatpush3.msk.msra.mxu1 %vm836_vm3, %v22844_v58 }
 0x117   : > { %20316 = vmatprep.subr.msk.mxu0 %vm836_vm3, %v22798_v52  ;;  %20331 = vmatprep.subr.msk.mxu1 %vm836_vm3, %v22862_v59 }
 0x118   : > { %20308 = vmatprep.mubr.msk.f32.mxu0 %vm829_vm0, %v23281_v7  ;;  %20323 = vmatprep.mubr.msk.f32.mxu1 %vm829_vm0, %v23281_v7 }
 0x119   : > { %20309 = vmatmul.mubr.msk.f32.vlgmr.msra.gmra.mrb[6].mxu0 %vm829_vm0, %v23290_v31  ;;  %20324 = vmatmul.mubr.msk.f32.vlgmr.msra.gmra.mrb[4].mxu1 %vm829_vm0, %v23290_v31 }
 0x11a   : > { %20317 = vmatpush3.msk.msra.mxu0 %vm836_vm3, %v22798_v52  ;;  %20332 = vmatpush3.msk.msra.mxu1 %vm836_vm3, %v22862_v59 }
 0x11b   : > { %20326 = vmatprep.subr.msk.mxu0 %vm836_vm3, %v22818_v54  ;;  %20341 = vmatprep.subr.msk.mxu1 %vm836_vm3, %v22887_v62 }
 0x11c   : > { %20318 = vmatprep.mubr.msk.f32.mxu0 %vm829_vm0, %v23281_v7  ;;  %20333 = vmatprep.mubr.msk.f32.mxu1 %vm829_vm0, %v23281_v7 }
 0x11d   : > { %20319 = vmatmul.mubr.msk.f32.vlgmr.msra.gmra.mrb[8].mxu0 %vm829_vm0, %v23290_v31  ;;  %20334 = vmatmul.mubr.msk.f32.vlgmr.msra.gmra.mrb[6].mxu1 %vm829_vm0, %v23290_v31 }
 0x11e   : > { %20327 = vmatpush3.msk.msra.mxu0 %vm836_vm3, %v22818_v54  ;;  %20342 = vmatpush3.msk.msra.mxu1 %vm836_vm3, %v22887_v62 }
 0x11f   : > { %20336 = vmatprep.subr.msk.mxu0 %vm836_vm3, %v22838_v56  ;;  %20328 = vmatprep.mubr.msk.f32.mxu0 %vm829_vm0, %v23281_v7 }
 0x120   : > { %20343 = vmatprep.mubr.msk.f32.mxu1 %vm829_vm0, %v23281_v7  ;;  %20351 = vmatprep.subr.msk.mxu1 %vm836_vm3, %v23368_v32 }
 0x121   : > { %20329 = vmatmul.mubr.msk.f32.vlgmr.msra.gmra.mrb[10].mxu0 %vm829_vm0, %v23290_v31  ;;  %20344 = vmatmul.mubr.msk.f32.vlgmr.msra.gmra.mrb[8].mxu1 %vm829_vm0, %v23290_v31 }
 0x122   : > { %20337 = vmatpush3.msk.msra.mxu0 %vm836_vm3, %v22838_v56  ;;  %20352 = vmatpush3.msk.msra.mxu1 %vm836_vm3, %v23368_v32 }
 0x123   : > { %20346 = vmatprep.subr.msk.mxu0 %vm836_vm3, %v22864_v60  ;;  %20361 = vmatprep.subr.msk.mxu1 %vm836_vm3, %v22994_v4 }
 0x124   : > { %20338 = vmatprep.mubr.msk.f32.mxu0 %vm829_vm0, %v23281_v7  ;;  %20353 = vmatprep.mubr.msk.f32.mxu1 %vm829_vm0, %v23281_v7 }
 0x125   : > { %20339 = vmatmul.mubr.msk.f32.vlgmr.msra.gmra.mrb[12].mxu0 %vm829_vm0, %v23290_v31  ;;  %20354 = vmatmul.mubr.msk.f32.vlgmr.msra.gmra.mrb[10].mxu1 %vm829_vm0, %v23290_v31 }
 0x126   : > { %20347 = vmatpush3.msk.msra.mxu0 %vm836_vm3, %v22864_v60  ;;  %20362 = vmatpush3.msk.msra.mxu1 %vm836_vm3, %v22994_v4 }
 0x127   : > { %20356 = vmatprep.subr.msk.mxu0 %vm836_vm3, %v22950_v5  ;;  %20371 = vmatprep.subr.msk.mxu1 %vm836_vm3, %v23032_v13 }
 0x128   : > { %20348 = vmatprep.mubr.msk.f32.mxu0 %vm829_vm0, %v23281_v7  ;;  %20363 = vmatprep.mubr.msk.f32.mxu1 %vm829_vm0, %v818_v33 }
 0x129   : > { %20349 = vmatmul.mubr.msk.f32.vlgmr.msra.gmra.mrb[14].mxu0 %vm829_vm0, %v23290_v31  ;;  %20364 = vmatmul.mubr.msk.f32.vlgmr.msra.gmra.mrb[12].mxu1 %vm829_vm0, %v23412_v34 }
 0x12a   : > { %20357 = vmatpush3.msk.msra.mxu0 %vm836_vm3, %v22950_v5  ;;  %20372 = vmatpush3.msk.msra.mxu1 %vm836_vm3, %v23032_v13 }
 0x12b   : > { %20366 = vmatprep.subr.msk.mxu0 %vm836_vm3, %v22976_v2  ;;  %20381 = vmatprep.subr.msk.mxu1 %vm836_vm3, %v23058_v16 }
 0x12c   : > { %20358 = vmatprep.mubr.msk.f32.mxu0 %vm829_vm0, %v818_v33  ;;  %20373 = vmatprep.mubr.msk.f32.mxu1 %vm829_vm0, %v818_v33 }
 0x12d   : > { %20359 = vmatmul.mubr.msk.f32.vlgmr.msra.gmra.mrb[0].mxu0 %vm829_vm0, %v23412_v34  ;;  %20374 = vmatmul.mubr.msk.f32.vlgmr.msra.gmra.mrb[0].mxu1 %vm829_vm0, %v23412_v34 }
 0x12e   : > { %20367 = vmatpush3.msk.msra.mxu0 %vm836_vm3, %v22976_v2  ;;  %20382 = vmatpush3.msk.msra.mxu1 %vm836_vm3, %v23058_v16 }
 0x12f   : > { %20376 = vmatprep.subr.msk.mxu0 %vm836_vm3, %v23004_v9  ;;  %20391 = vmatprep.subr.msk.mxu1 %vm836_vm3, %v23086_v20 }
 0x130   : > { %20368 = vmatprep.mubr.msk.f32.mxu0 %vm829_vm0, %v818_v33  ;;  %20383 = vmatprep.mubr.msk.f32.mxu1 %vm829_vm0, %v818_v33 }
 0x131   : > { %20369 = vmatmul.mubr.msk.f32.vlgmr.msra.gmra.mrb[4].mxu0 %vm829_vm0, %v23412_v34  ;;  %20384 = vmatmul.mubr.msk.f32.vlgmr.msra.gmra.mrb[2].mxu1 %vm829_vm0, %v23412_v34 }
 0x132   : > { %20377 = vmatpush3.msk.msra.mxu0 %vm836_vm3, %v23004_v9  ;;  %20392 = vmatpush3.msk.msra.mxu1 %vm836_vm3, %v23086_v20 }
 0x133   : > { %20386 = vmatprep.subr.msk.mxu0 %vm836_vm3, %v23042_v14  ;;  %20401 = vmatprep.subr.msk.mxu1 %vm836_vm3, %v23114_v22 }
 0x134   : > { %20378 = vmatprep.mubr.msk.f32.mxu0 %vm829_vm0, %v818_v33  ;;  %20393 = vmatprep.mubr.msk.f32.mxu1 %vm829_vm0, %v818_v33 }
 0x135   : > { %20379 = vmatmul.mubr.msk.f32.vlgmr.msra.gmra.mrb[6].mxu0 %vm829_vm0, %v23412_v34  ;;  %20394 = vmatmul.mubr.msk.f32.vlgmr.msra.gmra.mrb[4].mxu1 %vm829_vm0, %v23412_v34 }
 0x136   : > { %20387 = vmatpush3.msk.msra.mxu0 %vm836_vm3, %v23042_v14  ;;  %20402 = vmatpush3.msk.msra.mxu1 %vm836_vm3, %v23114_v22 }
 0x137   : > { %20396 = vmatprep.subr.msk.mxu0 %vm836_vm3, %v23068_v19  ;;  %20411 = vmatprep.subr.msk.mxu1 %vm836_vm3, %v23142_v26 }
 0x138   : > { %20388 = vmatprep.mubr.msk.f32.mxu0 %vm829_vm0, %v818_v33  ;;  %20403 = vmatprep.mubr.msk.f32.mxu1 %vm829_vm0, %v818_v33 }
 0x139   : > { %20389 = vmatmul.mubr.msk.f32.vlgmr.msra.gmra.mrb[8].mxu0 %vm829_vm0, %v23412_v34  ;;  %20404 = vmatmul.mubr.msk.f32.vlgmr.msra.gmra.mrb[6].mxu1 %vm829_vm0, %v23412_v34 }
 0x13a   : > { %20397 = vmatpush3.msk.msra.mxu0 %vm836_vm3, %v23068_v19  ;;  %20412 = vmatpush3.msk.msra.mxu1 %vm836_vm3, %v23142_v26 }
 0x13b   : > { %20406 = vmatprep.subr.msk.mxu0 %vm836_vm3, %v23096_v21  ;;  %20398 = vmatprep.mubr.msk.f32.mxu0 %vm829_vm0, %v818_v33 }
 0x13c   : > { %20413 = vmatprep.mubr.msk.f32.mxu1 %vm829_vm0, %v818_v33  ;;  %20421 = vmatprep.subr.msk.mxu1 %vm836_vm3, %v23481_v36 }
 0x13d   : > { %20399 = vmatmul.mubr.msk.f32.vlgmr.msra.gmra.mrb[10].mxu0 %vm829_vm0, %v23412_v34  ;;  %20414 = vmatmul.mubr.msk.f32.vlgmr.msra.gmra.mrb[8].mxu1 %vm829_vm0, %v23412_v34 }
 0x13e   : > { %20407 = vmatpush3.msk.msra.mxu0 %vm836_vm3, %v23096_v21  ;;  %20408 = vmatprep.mubr.msk.f32.mxu0 %vm829_vm0, %v818_v33 }
 0x13f   : > { %20416 = vmatprep.subr.msk.mxu0 %vm836_vm3, %v23124_v25  ;;  %20422 = vmatpush3.msk.msra.mxu1 %vm836_vm3, %v23481_v36 }
 0x140   : > { %20423 = vmatprep.mubr.msk.f32.mxu1 %vm829_vm0, %v818_v33  ;;  %20431 = vmatprep.subr.msk.mxu1 %vm836_vm3, %v22602_v17 }
 0x141   : > { %20409 = vmatmul.mubr.msk.f32.vlgmr.msra.gmra.mrb[12].mxu0 %vm829_vm0, %v23412_v34  ;;  %20424 = vmatmul.mubr.msk.f32.vlgmr.msra.gmra.mrb[10].mxu1 %vm829_vm0, %v23412_v34 }
 0x142   : > { %20417 = vmatpush3.msk.msra.mxu0 %vm836_vm3, %v23124_v25  ;;  %20418 = vmatprep.mubr.msk.f32.mxu0 %vm829_vm0, %v818_v33 }
 0x143   : > { %20432 = vmatpush3.msk.msra.mxu1 %vm836_vm3, %v22602_v17  ;;  %20433 = vmatprep.mubr.msk.f32.mxu1 %vm829_vm0, %v23510_v37  ;;  %v23644_v17 = vld [vmem:[%s25171_s1 + $0x78] sm:$0x3] }
 0x144   : > { %20426 = vmatprep.subr.msk.mxu0 %vm836_vm3, %v22594_v8  ;;  %20441 = vmatprep.subr.msk.mxu1 %vm836_vm3, %v22605_v18 }
 0x145   : > { %20419 = vmatmul.mubr.msk.f32.vlgmr.msra.gmra.mrb[14].mxu0 %vm829_vm0, %v23412_v34  ;;  %20434 = vmatmul.mubr.msk.f32.vlgmr.msra.gmra.mrb[12].mxu1 %vm829_vm0, %v23522_v39 }
 0x146   : > { %20427 = vmatpush3.msk.msra.mxu0 %vm836_vm3, %v22594_v8  ;;  %20428 = vmatprep.mubr.msk.f32.mxu0 %vm829_vm0, %v23510_v37  ;;  %v23635_v8 = vld [vmem:[%s25171_s1 + $0x70] sm:$0xff] }
 0x147   : > { %20442 = vmatpush3.msk.msra.mxu1 %vm836_vm3, %v22605_v18  ;;  %20443 = vmatprep.mubr.msk.f32.mxu1 %vm829_vm0, %v23510_v37  ;;  %v9510_v18 = vpop.permute.xlu0 %9509 }
 0x148   : > { %20436 = vmatprep.subr.msk.mxu0 %vm836_vm3, %v22638_v15  ;;  %20451 = vmatprep.subr.msk.mxu1 %vm836_vm3, %v22628_v35 }
 0x149   : > { %20429 = vmatmul.mubr.msk.f32.vlgmr.msra.gmra.mrb[0].mxu0 %vm829_vm0, %v23522_v39  ;;  %20444 = vmatmul.mubr.msk.f32.vlgmr.msra.gmra.mrb[0].mxu1 %vm829_vm0, %v23522_v39 }
 0x14a   : > { %20437 = vmatpush3.msk.msra.mxu0 %vm836_vm3, %v22638_v15  ;;  %20438 = vmatprep.mubr.msk.f32.mxu0 %vm829_vm0, %v23510_v37 }
 0x14b   : > { %20452 = vmatpush3.msk.msra.mxu1 %vm836_vm3, %v22628_v35  ;;  %20453 = vmatprep.mubr.msk.f32.mxu1 %vm829_vm0, %v23510_v37 }
 0x14c   : > { %20446 = vmatprep.subr.msk.mxu0 %vm836_vm3, %v22644_v24  ;;  %20461 = vmatprep.subr.msk.mxu1 %vm836_vm3, %v22658_v57 }
 0x14d   : > { %20439 = vmatmul.mubr.msk.f32.vlgmr.msra.gmra.mrb[4].mxu0 %vm829_vm0, %v23522_v39  ;;  %20454 = vmatmul.mubr.msk.f32.vlgmr.msra.gmra.mrb[2].mxu1 %vm829_vm0, %v23522_v39 }
 0x14e   : > { %20447 = vmatpush3.msk.msra.mxu0 %vm836_vm3, %v22644_v24  ;;  %20448 = vmatprep.mubr.msk.f32.mxu0 %vm829_vm0, %v23510_v37  ;;  %v824_v24 = vld [vmem:[%s25171_s1 + $0x80] sm:$0xff] }
 0x14f   : > { %20462 = vmatpush3.msk.msra.mxu1 %vm836_vm3, %v22658_v57  ;;  %20463 = vmatprep.mubr.msk.f32.mxu1 %vm829_vm0, %v23510_v37  ;;  %v23766_v57 = vld [vmem:[%s25171_s1 + $0x88] sm:$0x3] }
 0x150   : > { %20456 = vmatprep.subr.msk.mxu0 %vm836_vm3, %v22672_v29  ;;  %20471 = vmatprep.subr.msk.mxu1 %vm836_vm3, %v22666_v63 }
 0x151   : > { %20449 = vmatmul.mubr.msk.f32.vlgmr.msra.gmra.mrb[6].mxu0 %vm829_vm0, %v23522_v39  ;;  %20464 = vmatmul.mubr.msk.f32.vlgmr.msra.gmra.mrb[4].mxu1 %vm829_vm0, %v23522_v39 }
 0x152   : > { %20457 = vmatpush3.msk.msra.mxu0 %vm836_vm3, %v22672_v29  ;;  %20458 = vmatprep.mubr.msk.f32.mxu0 %vm829_vm0, %v23510_v37  ;;  %v22401_v29 = vmov 1  }
 0x153   : > { %20472 = vmatpush3.msk.msra.mxu1 %vm836_vm3, %v22666_v63  ;;  %20473 = vmatprep.mubr.msk.f32.mxu1 %vm829_vm0, %v23510_v37  ;;  %v10598_v63 = vpop.permute.xlu1 %10597 }
 0x154   : > { %20481 = vmatprep.subr.msk.mxu1 %vm836_vm3, %v22696_v30  ;;  %20466 = vmatprep.subr.msk.mxu0 %vm836_vm3, %v22689_v23 }
 0x155   : > { %20459 = vmatmul.mubr.msk.f32.vlgmr.msra.gmra.mrb[8].mxu0 %vm829_vm0, %v23522_v39  ;;  %20474 = vmatmul.mubr.msk.f32.vlgmr.msra.gmra.mrb[6].mxu1 %vm829_vm0, %v23522_v39 }
 0x156   : > { %20482 = vmatpush3.msk.msra.mxu1 %vm836_vm3, %v22696_v30  ;;  %20467 = vmatpush3.msk.msra.mxu0 %vm836_vm3, %v22689_v23  ;;  %v806_v23 = vld [vmem:[%s25175_s5] sm:$0xff]  ;;  %v22402_v30 = vmov 0  }
 0x157   : > { %20468 = vmatprep.mubr.msk.f32.mxu0 %vm829_vm0, %v23510_v37  ;;  %20483 = vmatprep.mubr.msk.f32.mxu1 %vm829_vm0, %v23510_v37 }
 0x158   : > { %20491 = vmatprep.subr.msk.mxu1 %vm836_vm3, %v22749_v46  ;;  %20476 = vmatprep.subr.msk.mxu0 %vm836_vm3, %v22703_v6 }
 0x159   : > { %20469 = vmatmul.mubr.msk.f32.vlgmr.msra.gmra.mrb[10].mxu0 %vm829_vm0, %v23522_v39  ;;  %20484 = vmatmul.mubr.msk.f32.vlgmr.msra.gmra.mrb[8].mxu1 %vm829_vm0, %v23522_v39 }
 0x15a   : > { %20492 = vmatpush3.msk.msra.mxu1 %vm836_vm3, %v22749_v46  ;;  %20477 = vmatpush3.msk.msra.mxu0 %vm836_vm3, %v22703_v6  ;;  %v807_v6 = vld [vmem:[%s25175_s5 + $0x8] sm:$0x3] }
 0x15b   : > { %20501 = vmatprep.subr.msk.mxu1 %vm836_vm3, %v22770_v49  ;;  %20478 = vmatprep.mubr.msk.f32.mxu0 %vm829_vm0, %v23510_v37 }
 0x15c   : > { %20486 = vmatprep.subr.msk.mxu0 %vm836_vm3, %v22737_v38  ;;  %20493 = vmatprep.mubr.msk.f32.mxu1 %vm829_vm0, %v23510_v37 }
 0x15d   : > { %20479 = vmatmul.mubr.msk.f32.vlgmr.msra.gmra.mrb[12].mxu0 %vm829_vm0, %v23522_v39  ;;  %20494 = vmatmul.mubr.msk.f32.vlgmr.msra.gmra.mrb[10].mxu1 %vm829_vm0, %v23522_v39 }
 0x15e   : > { %20487 = vmatpush3.msk.msra.mxu0 %vm836_vm3, %v22737_v38  ;;  %20502 = vmatpush3.msk.msra.mxu1 %vm836_vm3, %v22770_v49  ;;  %v10882_v38 = vand.u32 127, %v302_v0 }
 0x15f   : > { %20496 = vmatprep.subr.msk.mxu0 %vm836_vm3, %v22788_v51  ;;  %20511 = vmatprep.subr.msk.mxu1 %vm836_vm3, %v22780_v50 }
 0x160   : > { %20488 = vmatprep.mubr.msk.f32.mxu0 %vm829_vm0, %v23510_v37  ;;  %20503 = vmatprep.mubr.msk.f32.mxu1 %vm829_vm0, %v23635_v8  ;;  %v10883_v41 = vmul.u32 2, %v10882_v38 }
 0x161   : > { %20489 = vmatmul.mubr.msk.f32.vlgmr.msra.gmra.mrb[14].mxu0 %vm829_vm0, %v23522_v39  ;;  %20504 = vmatmul.mubr.msk.f32.vlgmr.msra.gmra.mrb[12].mxu1 %vm829_vm0, %v23644_v17 }
 0x162   : > { %20497 = vmatpush3.msk.msra.mxu0 %vm836_vm3, %v22788_v51  ;;  %20512 = vmatpush3.msk.msra.mxu1 %vm836_vm3, %v22780_v50  ;;  %vm10885_vm4 = vcmp.eq.s32.totalorder %v10880_v42, %v10883_v41  ;;  %vm10884_vm5 = vcmp.eq.s32.totalorder %v22510_v3, %v10883_v41  ;;  %v10890_v0 = vadd.s32 1, %v10883_v41 }
 0x163   : > { %20506 = vmatprep.subr.msk.mxu0 %vm836_vm3, %v22804_v53  ;;  %20521 = vmatprep.subr.msk.mxu1 %vm836_vm3, %v22798_v52  ;;  %v18975_v44 = vsel %vm10885_vm4, 1.0, %v22403_v43  ;;  %vm21318_vm7 = vmpackc.low %vm11251_vm6, %vm10884_vm5 }
 0x164   : > { %20498 = vmatprep.mubr.msk.f32.mxu0 %vm829_vm0, %v23635_v8  ;;  %20513 = vmatprep.mubr.msk.f32.mxu1 %vm829_vm0, %v23635_v8  ;;  %v21317_v46 = vpack.c.bf16 %v18975_v44, %v22404_v45  ;;  %vm10891_vm9 = vcmp.lt.s32.totalorder %v10890_v0, 13 }
 0x165   : > { %20499 = vmatmul.mubr.msk.f32.vlgmr.msra.gmra.mrb[0].mxu0 %vm829_vm0, %v23644_v17  ;;  %20514 = vmatmul.mubr.msk.f32.vlgmr.msra.gmra.mrb[0].mxu1 %vm829_vm0, %v23644_v17  ;;  %v10892_v48 = vsel %vm10891_vm9, %v10890_v0, 13 }
 0x166   : > { %20507 = vmatpush3.msk.msra.mxu0 %vm836_vm3, %v22804_v53  ;;  %20522 = vmatpush3.msk.msra.mxu1 %vm836_vm3, %v22798_v52  ;;  %vm10893_vm10 = vcmp.eq.s32.totalorder %v22510_v3, %v10892_v48  ;;  %vm10894_vm11 = vcmp.eq.s32.totalorder %v10880_v42, %v10892_v48  ;;  %v22407_v52 = vmov 1983009808  }
 0x167   : > { %20516 = vmatprep.subr.msk.mxu0 %vm836_vm3, %v22824_v55  ;;  %20531 = vmatprep.subr.msk.mxu1 %vm836_vm3, %v22818_v54  ;;  %v18977_v10 = vsel %vm10894_vm11, 1.0, %v22403_v43  ;;  %vm23882_vm12 = vmpackc.low %vm11251_vm6, %vm10893_vm10  ;;  %v10915_v53 = vunpack.c.l.s4 %v22407_v52 }
 0x168   : > { %20508 = vmatprep.mubr.msk.f32.mxu0 %vm829_vm0, %v23635_v8  ;;  %20523 = vmatprep.mubr.msk.f32.mxu1 %vm829_vm0, %v23635_v8  ;;  %v23886_v50 = vpack.c.bf16 %v18977_v10, %v22404_v45 }
 0x169   : > { %20509 = vmatmul.mubr.msk.f32.vlgmr.msra.gmra.mrb[4].mxu0 %vm829_vm0, %v23644_v17  ;;  %20524 = vmatmul.mubr.msk.f32.vlgmr.msra.gmra.mrb[2].mxu1 %vm829_vm0, %v23644_v17 }
 0x16a   : > { %20517 = vmatpush3.msk.msra.mxu0 %vm836_vm3, %v22824_v55  ;;  %20532 = vmatpush3.msk.msra.mxu1 %vm836_vm3, %v22818_v54  ;;  %v10916_v55 = vunpack.c.0.s8 %v10915_v53 }
 0x16b   : > { %20526 = vmatprep.subr.msk.mxu0 %vm836_vm3, %v22844_v58  ;;  %20541 = vmatprep.subr.msk.mxu1 %vm836_vm3, %v22838_v56 }
 0x16c   : > { %20518 = vmatprep.mubr.msk.f32.mxu0 %vm829_vm0, %v23635_v8  ;;  %20533 = vmatprep.mubr.msk.f32.mxu1 %vm829_vm0, %v23635_v8  ;;  %v23900_v5 = vsub.s32 %v10916_v55, %v22510_v3 }
 0x16d   : > { %20519 = vmatmul.mubr.msk.f32.vlgmr.msra.gmra.mrb[6].mxu0 %vm829_vm0, %v23644_v17  ;;  %20534 = vmatmul.mubr.msk.f32.vlgmr.msra.gmra.mrb[4].mxu1 %vm829_vm0, %v23644_v17 }
 0x16e   : > { %20527 = vmatpush3.msk.msra.mxu0 %vm836_vm3, %v22844_v58  ;;  %20542 = vmatpush3.msk.msra.mxu1 %vm836_vm3, %v22838_v56 }
 0x16f   : > { %20536 = vmatprep.subr.msk.mxu0 %vm836_vm3, %v22862_v59  ;;  %20551 = vmatprep.subr.msk.mxu1 %vm836_vm3, %v22864_v60 }
 0x170   : > { %20528 = vmatprep.mubr.msk.f32.mxu0 %vm829_vm0, %v23635_v8  ;;  %20543 = vmatprep.mubr.msk.f32.mxu1 %vm829_vm0, %v23635_v8 }
 0x171   : > { %20529 = vmatmul.mubr.msk.f32.vlgmr.msra.gmra.mrb[8].mxu0 %vm829_vm0, %v23644_v17  ;;  %20544 = vmatmul.mubr.msk.f32.vlgmr.msra.gmra.mrb[6].mxu1 %vm829_vm0, %v23644_v17  ;;  %v23722_v35 = vpop.f32.mrb[2].mxu0 }
 0x172   : > { %20537 = vmatpush3.msk.msra.mxu0 %vm836_vm3, %v22862_v59  ;;  %20552 = vmatpush3.msk.msra.mxu1 %vm836_vm3, %v22864_v60  ;;  %v23728_v15 = vpop.f32.mrb[3].mxu0 }
 0x173   : > { %20546 = vmatprep.subr.msk.mxu0 %vm836_vm3, %v22887_v62  ;;  %20538 = vmatprep.mubr.msk.f32.mxu0 %vm829_vm0, %v23635_v8 }
 0x174   : > { %20553 = vmatprep.mubr.msk.f32.mxu1 %vm829_vm0, %v23635_v8  ;;  %20561 = vmatprep.subr.msk.mxu1 %vm836_vm3, %v9510_v18 }
 0x175   : > { %20539 = vmatmul.mubr.msk.f32.vlgmr.msra.gmra.mrb[10].mxu0 %vm829_vm0, %v23644_v17  ;;  %20554 = vmatmul.mubr.msk.f32.vlgmr.msra.gmra.mrb[8].mxu1 %vm829_vm0, %v23644_v17 }
 0x176   : > { %20547 = vmatpush3.msk.msra.mxu0 %vm836_vm3, %v22887_v62  ;;  %20562 = vmatpush3.msk.msra.mxu1 %vm836_vm3, %v9510_v18 }
 0x177   : > { %20556 = vmatprep.subr.msk.mxu0 %vm836_vm3, %v23368_v32  ;;  %20571 = vmatprep.subr.msk.mxu1 %vm836_vm3, %v22976_v2 }
 0x178   : > { %20548 = vmatprep.mubr.msk.f32.mxu0 %vm829_vm0, %v23635_v8  ;;  %20563 = vmatprep.mubr.msk.f32.mxu1 %vm829_vm0, %v23635_v8 }
 0x179   : > { %20549 = vmatmul.mubr.msk.f32.vlgmr.msra.gmra.mrb[12].mxu0 %vm829_vm0, %v23644_v17  ;;  %20564 = vmatmul.mubr.msk.f32.vlgmr.msra.gmra.mrb[10].mxu1 %vm829_vm0, %v23644_v17 }
 0x17a   : > { %20557 = vmatpush3.msk.msra.mxu0 %vm836_vm3, %v23368_v32  ;;  %20572 = vmatpush3.msk.msra.mxu1 %vm836_vm3, %v22976_v2 }
 0x17b   : > { %20566 = vmatprep.subr.msk.mxu0 %vm836_vm3, %v22994_v4  ;;  %20581 = vmatprep.subr.msk.mxu1 %vm836_vm3, %v23004_v9 }
 0x17c   : > { %20558 = vmatprep.mubr.msk.f32.mxu0 %vm829_vm0, %v23635_v8  ;;  %20573 = vmatprep.mubr.msk.f32.mxu1 %vm829_vm0, %v824_v24 }
 0x17d   : > { %20559 = vmatmul.mubr.msk.f32.vlgmr.msra.gmra.mrb[14].mxu0 %vm829_vm0, %v23644_v17  ;;  %20574 = vmatmul.mubr.msk.f32.vlgmr.msra.gmra.mrb[12].mxu1 %vm829_vm0, %v23766_v57 }
 0x17e   : > { %20567 = vmatpush3.msk.msra.mxu0 %vm836_vm3, %v22994_v4  ;;  %20582 = vmatpush3.msk.msra.mxu1 %vm836_vm3, %v23004_v9 }
 0x17f   : > { %20576 = vmatprep.subr.msk.mxu0 %vm836_vm3, %v23032_v13  ;;  %20591 = vmatprep.subr.msk.mxu1 %vm836_vm3, %v23042_v14 }
 0x180   : > { %20568 = vmatprep.mubr.msk.f32.mxu0 %vm829_vm0, %v824_v24  ;;  %20583 = vmatprep.mubr.msk.f32.mxu1 %vm829_vm0, %v824_v24 }
 0x181   : > { %20569 = vmatmul.mubr.msk.f32.vlgmr.msra.gmra.mrb[0].mxu0 %vm829_vm0, %v23766_v57  ;;  %20584 = vmatmul.mubr.msk.f32.vlgmr.msra.gmra.mrb[0].mxu1 %vm829_vm0, %v23766_v57 }
 0x182   : > { %20577 = vmatpush3.msk.msra.mxu0 %vm836_vm3, %v23032_v13  ;;  %20592 = vmatpush3.msk.msra.mxu1 %vm836_vm3, %v23042_v14 }
 0x183   : > { %20586 = vmatprep.subr.msk.mxu0 %vm836_vm3, %v23058_v16  ;;  %20601 = vmatprep.subr.msk.mxu1 %vm836_vm3, %v23068_v19 }
 0x184   : > { %20578 = vmatprep.mubr.msk.f32.mxu0 %vm829_vm0, %v824_v24  ;;  %20593 = vmatprep.mubr.msk.f32.mxu1 %vm829_vm0, %v824_v24 }
 0x185   : > { %20579 = vmatmul.mubr.msk.f32.vlgmr.msra.gmra.mrb[4].mxu0 %vm829_vm0, %v23766_v57  ;;  %20594 = vmatmul.mubr.msk.f32.vlgmr.msra.gmra.mrb[2].mxu1 %vm829_vm0, %v23766_v57 }
 0x186   : > { %20587 = vmatpush3.msk.msra.mxu0 %vm836_vm3, %v23058_v16  ;;  %20602 = vmatpush3.msk.msra.mxu1 %vm836_vm3, %v23068_v19 }
 0x187   : > { %20596 = vmatprep.subr.msk.mxu0 %vm836_vm3, %v23086_v20  ;;  %20611 = vmatprep.subr.msk.mxu1 %vm836_vm3, %v23096_v21 }
 0x188   : > { %20588 = vmatprep.mubr.msk.f32.mxu0 %vm829_vm0, %v824_v24  ;;  %20603 = vmatprep.mubr.msk.f32.mxu1 %vm829_vm0, %v824_v24 }
 0x189   : > { %20589 = vmatmul.mubr.msk.f32.vlgmr.msra.gmra.mrb[6].mxu0 %vm829_vm0, %v23766_v57  ;;  %20604 = vmatmul.mubr.msk.f32.vlgmr.msra.gmra.mrb[4].mxu1 %vm829_vm0, %v23766_v57 }
 0x18a   : > { %20597 = vmatpush3.msk.msra.mxu0 %vm836_vm3, %v23086_v20  ;;  %20612 = vmatpush3.msk.msra.mxu1 %vm836_vm3, %v23096_v21 }
 0x18b   : > { %20606 = vmatprep.subr.msk.mxu0 %vm836_vm3, %v23114_v22  ;;  %20621 = vmatprep.subr.msk.mxu1 %vm836_vm3, %v23124_v25 }
 0x18c   : > { %20598 = vmatprep.mubr.msk.f32.mxu0 %vm829_vm0, %v824_v24  ;;  %20613 = vmatprep.mubr.msk.f32.mxu1 %vm829_vm0, %v824_v24 }
 0x18d   : > { %20599 = vmatmul.mubr.msk.f32.vlgmr.msra.gmra.mrb[8].mxu0 %vm829_vm0, %v23766_v57  ;;  %20614 = vmatmul.mubr.msk.f32.vlgmr.msra.gmra.mrb[6].mxu1 %vm829_vm0, %v23766_v57 }
 0x18e   : > { %20607 = vmatpush3.msk.msra.mxu0 %vm836_vm3, %v23114_v22  ;;  %20622 = vmatpush3.msk.msra.mxu1 %vm836_vm3, %v23124_v25 }
 0x18f   : > { %20616 = vmatprep.subr.msk.mxu0 %vm836_vm3, %v23142_v26  ;;  %20608 = vmatprep.mubr.msk.f32.mxu0 %vm829_vm0, %v824_v24 }
 0x190   : > { %20623 = vmatprep.mubr.msk.f32.mxu1 %vm829_vm0, %v824_v24  ;;  %20631 = vmatprep.subr.msk.mxu1 %vm836_vm3, %v10598_v63 }
 0x191   : > { %20609 = vmatmul.mubr.msk.f32.vlgmr.msra.gmra.mrb[10].mxu0 %vm829_vm0, %v23766_v57  ;;  %20624 = vmatmul.mubr.msk.f32.vlgmr.msra.gmra.mrb[8].mxu1 %vm829_vm0, %v23766_v57 }
 0x192   : > { %20617 = vmatpush3.msk.msra.mxu0 %vm836_vm3, %v23142_v26  ;;  %20618 = vmatprep.mubr.msk.f32.mxu0 %vm829_vm0, %v824_v24 }
 0x193   : > { %20626 = vmatprep.subr.msk.mxu0 %vm836_vm3, %v23481_v36  ;;  %20632 = vmatpush3.msk.msra.mxu1 %vm836_vm3, %v10598_v63 }
 0x194   : > { %20633 = vmatprep.mubr.msk.f32.mxu1 %vm829_vm0, %v824_v24  ;;  %22182 = vset.pattern.permute.xlu1 %v22401_v29 }
 0x195   : > { %20619 = vmatmul.mubr.msk.f32.vlgmr.msra.gmra.mrb[12].mxu0 %vm829_vm0, %v23766_v57  ;;  %20634 = vmatmul.mubr.msk.f32.vlgmr.msra.gmra.mrb[10].mxu1 %vm829_vm0, %v23766_v57 }
 0x196   : > { %20627 = vmatpush3.msk.msra.mxu0 %vm836_vm3, %v23481_v36  ;;  %20628 = vmatprep.mubr.msk.f32.mxu0 %vm829_vm0, %v824_v24  ;;  %vm10834_vm3 = vcmask 113664  }
 0x197   : > { %10771 = vperm.xlu1 %22182, %v806_v23   ;;  %22181 = vset.pattern.permute.xlu0 %v22402_v30 }
 0x198   : > { %10706 = vperm.xlu0 %22181, %v806_v23   ;;  %21316 = vmatprep.subr.bf16.mxu0 %v22405_v47 }
 0x199   : > { %20629 = vmatmul.mubr.msk.f32.vlgmr.msra.gmra.mrb[14].mxu0 %vm829_vm0, %v23766_v57 }
 0x19a   : > { %21319 = vmatpush3.bf16.msk.msra.mxu0 %vm21318_vm7, %v21317_v46  ;;  %20640 = vmatprep.mubr.msk.f32.mxu0 %vm22406_vm8, %v22403_v43 }
 0x19b   : > { %22183 = vset.pattern.permute.xlu1 %v22402_v30  ;;  %21320 = vmatprep.subr.bf16.mxu0 %v22405_v47 }
 0x19c   : > { %10711 = vperm.xlu1 %22183, %v807_v6   ;;  %22184 = vset.pattern.permute.xlu0 %v22401_v29 }
 0x19d   : > { %10775 = vperm.xlu0 %22184, %v807_v6  }
 0x216   : > { %v23888_v51 = vpop.permute.xlu1 %10771 }
 0x217   : > { %v23890_v54 = vpop.permute.xlu0 %10706 }
 0x21b   : > { %v23892_v58 = vpop.permute.xlu1 %10711 }
 0x21c   : > { %v23896_v62 = vpop.permute.xlu0 %10775 }
 0x250   : > { %v20575_v56 = vpop.f32.mrb[12].mxu1 }
 0x251   : > { %v21720_v59 = vadd.f32 %v20575_v56, %v23722_v35  ;;  %v9763_v60 = vpop.f32.mrb[13].mxu1 }
 0x252   : > { %v21721_v61 = vadd.f32 %v9763_v60, %v23728_v15 }
 0x253   : > { %v10717_v1 = vadd.f32 %v21720_v59, %v23892_v58 }
 0x254   : > { %v10716_v40 = vadd.f32 %v21721_v61, %v23890_v54  ;;  %v20585_v2 = vpop.f32.mrb[0].mxu1  ;;  %v20570_v4 = vpop.f32.mrb[0].mxu0 }
 0x255   : > { %v10721_v9 = vadd.f32 %v20585_v2, %v23892_v58  ;;  %v10715_v11 = vadd.f32 %v20570_v4, %v23892_v58  ;;  %vm10745_vm14 = vcmp.gt.f32.partialorder %v10717_v1, 0.0  ;;  %v10781_v12 = vmul.f32 %v23896_v62, %v10717_v1  ;;  %v9688_v13 = vpop.f32.mrb[1].mxu0  ;;  %v9913_v14 = vpop.f32.mrb[1].mxu1 }
 0x256   : > { %vm10744_vm15 = vcmp.gt.f32.partialorder %v10716_v40, 0.0  ;;  %v10780_v16 = vmul.f32 %v23888_v51, %v10716_v40  ;;  %v10714_v3 = vadd.f32 %v23890_v54, %v9688_v13  ;;  %v10720_v19 = vadd.f32 %v23890_v54, %v9913_v14 }
 0x257   : > { %vm10743_vm0 = vcmp.gt.f32.partialorder %v10715_v11, 0.0  ;;  %v10779_v20 = vmul.f32 %v23896_v62, %v10715_v11  ;;  %v10809_v21 = vsel %vm10745_vm14, %v10717_v1, %v10781_v12  ;;  %vm10749_vm4 = vcmp.gt.f32.partialorder %v10721_v9, 0.0 }
 0x258   : > { %v10808_v22 = vsel %vm10744_vm15, %v10716_v40, %v10780_v16  ;;  %vm10742_vm5 = vcmp.gt.f32.partialorder %v10714_v3, 0.0  ;;  %v10778_v25 = vmul.f32 %v23888_v51, %v10714_v3  ;;  %v20580_v26 = vpop.f32.mrb[4].mxu0  ;;  %v20595_v27 = vpop.f32.mrb[2].mxu1  ;;  %v10840_v7 = vsel %vm10838_vm13, %v10809_v21, -inf }
 0x259   : > { %v10807_v28 = vsel %vm10743_vm0, %v10715_v11, %v10779_v20  ;;  %vm10748_vm6 = vcmp.gt.f32.partialorder %v10720_v19, 0.0  ;;  %v10784_v31 = vmul.f32 %v23888_v51, %v10720_v19  ;;  %v9838_v32 = vpop.f32.mrb[5].mxu0  ;;  %v10063_v33 = vpop.f32.mrb[3].mxu1  ;;  %v10719_v37 = vadd.f32 %v20580_v26, %v23892_v58 }
 0x25a   : > { %v10839_v34 = vsel %vm10838_vm13, %v10807_v28, -inf  ;;  %v10806_v36 = vsel %vm10742_vm5, %v10714_v3, %v10778_v25  ;;  %v10785_v39 = vmul.f32 %v23896_v62, %v10721_v9  ;;  %v10836_v18 = vsel %vm10834_vm3, %v10808_v22, -inf }
 0x25b   : > { %v10841_v8 = vmax.f32 %v10839_v34, %v10840_v7  ;;  %v10835_v17 = vsel %vm10834_vm3, %v10806_v36, -inf  ;;  %v10725_v35 = vadd.f32 %v20595_v27, %v23892_v58  ;;  %vm10747_vm7 = vcmp.gt.f32.partialorder %v10719_v37, 0.0 }
 0x25c   : > { %v10837_v15 = vmax.f32 %v10835_v17, %v10836_v18  ;;  %v10783_v24 = vmul.f32 %v23896_v62, %v10719_v37  ;;  %v20590_v57 = vpop.f32.mrb[6].mxu0  ;;  %v20605_v63 = vpop.f32.mrb[4].mxu1  ;;  %v10812_v29 = vsel %vm10748_vm6, %v10720_v19, %v10784_v31  ;;  %v10813_v23 = vsel %vm10749_vm4, %v10721_v9, %v10785_v39 }
 0x25d   : > { %v10789_v30 = vmul.f32 %v23896_v62, %v10725_v35  ;;  %v9988_v6 = vpop.f32.mrb[7].mxu0  ;;  %v10213_v38 = vpop.f32.mrb[5].mxu1  ;;  %vm10753_vm9 = vcmp.gt.f32.partialorder %v10725_v35, 0.0  ;;  %v10846_v46 = vsel %vm10838_vm13, %v10813_v23, -inf  ;;  %v10718_v0 = vadd.f32 %v23890_v54, %v9838_v32 }
 0x25e   : > { %v10913_v42 = vcombine.high %v10837_v15, %v10837_v15  ;;  %v10920_v41 = vrot.slane %v10837_v15, %v23900_v5  ;;  %v10811_v44 = vsel %vm10747_vm7, %v10719_v37, %v10783_v24  ;;  %v10724_v48 = vadd.f32 %v23890_v54, %v10063_v33 }
 0x25f   : > { %v10845_v45 = vsel %vm10838_vm13, %v10811_v44, -inf  ;;  %v10817_v59 = vsel %vm10753_vm9, %v10725_v35, %v10789_v30  ;;  %vm10746_vm10 = vcmp.gt.f32.partialorder %v10718_v0, 0.0  ;;  %v10782_v60 = vmul.f32 %v23888_v51, %v10718_v0 }
 0x260   : > { %v10927_v10 = vrot.slane %v10913_v42, %v23900_v5  ;;  %v10928_v52 = vcombine.high %v10920_v41, %v10920_v41  ;;  %v10847_v53 = vmax.f32 %v10845_v45, %v10846_v46  ;;  %v20600_v55 = vpop.f32.mrb[8].mxu0  ;;  %v20615_v56 = vpop.f32.mrb[6].mxu1  ;;  %v10788_v61 = vmul.f32 %v23888_v51, %v10724_v48 }
 0x261   : > { %v10138_v1 = vpop.f32.mrb[9].mxu0  ;;  %v10363_v40 = vpop.f32.mrb[7].mxu1  ;;  %v10843_v2 = vsel %vm10834_vm3, %v10812_v29, -inf  ;;  %vm10752_vm11 = vcmp.gt.f32.partialorder %v10724_v48, 0.0  ;;  %v10723_v4 = vadd.f32 %v20590_v57, %v23892_v58  ;;  %v23934_v9 = vrot.slane %v10841_v8, %v23900_v5 }
 0x262   : > { %v10810_v11 = vsel %vm10746_vm10, %v10718_v0, %v10782_v60  ;;  %v10729_v12 = vadd.f32 %v20605_v63, %v23892_v58  ;;  %v10722_v13 = vadd.f32 %v23890_v54, %v9988_v6  ;;  %v10929_v14 = vcombine.high %v10927_v10, %v10927_v10 }
 0x263   : > { %v23938_v16 = vcombine.low %v10920_v41, %v10928_v52  ;;  %v10852_v3 = vsel %vm10838_vm13, %v10817_v59, -inf  ;;  %v10842_v19 = vsel %vm10834_vm3, %v10810_v11, -inf  ;;  %v10816_v25 = vsel %vm10752_vm11, %v10724_v48, %v10788_v61 }
 0x264   : > { %v20610_v20 = vpop.f32.mrb[10].mxu0  ;;  %v23942_v21 = vpop.f32.mrb[8].mxu1  ;;  %v10844_v22 = vmax.f32 %v10842_v19, %v10843_v2  ;;  %vm10751_vm14 = vcmp.gt.f32.partialorder %v10723_v4, 0.0  ;;  %v10787_v26 = vmul.f32 %v23896_v62, %v10723_v4  ;;  %v10793_v7 = vmul.f32 %v23896_v62, %v10729_v12 }
 0x265   : > { %v23945_v27 = vpop.f32.mrb[11].mxu0  ;;  %v23947_v28 = vpop.f32.mrb[9].mxu1  ;;  %vm10750_vm15 = vcmp.gt.f32.partialorder %v10722_v13, 0.0  ;;  %v10786_v31 = vmul.f32 %v23888_v51, %v10722_v13  ;;  %v10728_v32 = vadd.f32 %v23890_v54, %v10213_v38  ;;  %vm10757_vm0 = vcmp.gt.f32.partialorder %v10729_v12, 0.0 }
 0x266   : > { %v23953_v33 = vrot.slane %v10844_v22, %v23900_v5  ;;  %v10815_v34 = vsel %vm10751_vm14, %v10723_v4, %v10787_v26  ;;  %v10727_v36 = vadd.f32 %v20600_v55, %v23892_v58  ;;  %v23957_v37 = vrot.slane %v10847_v53, %v23900_v5 }
 0x267   : > { %v10937_v39 = vcombine.high %v10844_v22, %v10844_v22  ;;  %v10851_v8 = vsel %vm10838_vm13, %v10815_v34, -inf  ;;  %v10814_v17 = vsel %vm10750_vm15, %v10722_v13, %v10786_v31  ;;  %v23962_v15 = vcombine.low %v10927_v10, %v10929_v14 }
 0x268   : > { %v20620_v18 = vpop.f32.mrb[12].mxu0  ;;  %v23960_v35 = vpop.f32.mrb[10].mxu1  ;;  %v11098_v24 = vcombine.low %v23934_v9, %v23953_v33  ;;  %v10849_v57 = vsel %vm10834_vm3, %v10816_v25, -inf  ;;  %v10853_v63 = vmax.f32 %v10851_v8, %v10852_v3  ;;  %v10821_v30 = vsel %vm10757_vm0, %v10729_v12, %v10793_v7 }
 0x269   : > { %v23967_v29 = vpop.f32.mrb[13].mxu0  ;;  %v23969_v23 = vpop.f32.mrb[11].mxu1  ;;  %v10848_v6 = vsel %vm10834_vm3, %v10814_v17, -inf  ;;  %v10792_v38 = vmul.f32 %v23888_v51, %v10728_v32  ;;  %vm10755_vm4 = vcmp.gt.f32.partialorder %v10727_v36, 0.0  ;;  %v11089_v42 = vrot.slane %v23938_v16, %v23900_v5 }
 0x26a   : > { %v10850_v41 = vmax.f32 %v10848_v6, %v10849_v57  ;;  %vm10756_vm5 = vcmp.gt.f32.partialorder %v10728_v32, 0.0  ;;  %v10791_v44 = vmul.f32 %v23896_v62, %v10727_v36  ;;  %v23977_v45 = vrot.slane %v10937_v39, %v23900_v5 }
 0x26b   : > { %v10733_v46 = vadd.f32 %v20615_v56, %v23892_v58  ;;  %v10726_v0 = vadd.f32 %v23890_v54, %v10138_v1  ;;  %v10732_v48 = vadd.f32 %v23890_v54, %v10363_v40  ;;  %v23985_v52 = vsel %vm10838_vm13, %v10821_v30, -inf }
 0x26c   : > { %v23982_v10 = vpop.f32.mrb[14].mxu0  ;;  %v10961_v53 = vcombine.high %v10850_v41, %v10850_v41  ;;  %v10968_v55 = vrot.slane %v10850_v41, %v23900_v5  ;;  %v10819_v59 = vsel %vm10755_vm4, %v10727_v36, %v10791_v44  ;;  %v10820_v61 = vsel %vm10756_vm5, %v10728_v32, %v10792_v38 }
 0x26d   : > { %v23988_v60 = vpop.f32.mrb[15].mxu0  ;;  %v10857_v2 = vsel %vm10838_vm13, %v10819_v59, -inf  ;;  %vm10761_vm6 = vcmp.gt.f32.partialorder %v10733_v46, 0.0  ;;  %v10797_v56 = vmul.f32 %v23896_v62, %v10733_v46  ;;  %v10952_v1 = vcombine.high %v23953_v33, %v23953_v33 }
 0x26e   : > { %v10859_v40 = vmax.f32 %v10857_v2, %v23985_v52  ;;  %vm10754_vm7 = vcmp.gt.f32.partialorder %v10726_v0, 0.0  ;;  %v10790_v4 = vmul.f32 %v23888_v51, %v10726_v0  ;;  %vm10760_vm9 = vcmp.gt.f32.partialorder %v10732_v48, 0.0 }
 0x26f   : > { %v10825_v11 = vsel %vm10761_vm6, %v10733_v46, %v10797_v56  ;;  %v10796_v12 = vmul.f32 %v23888_v51, %v10732_v48  ;;  %v10731_v13 = vadd.f32 %v20610_v20, %v23892_v58  ;;  %v23999_v14 = vrot.slane %v10853_v63, %v23900_v5 }
 0x270   : > { %v24002_v3 = vrot.slane %v10961_v53, %v23900_v5  ;;  %v10976_v19 = vcombine.high %v10968_v55, %v10968_v55  ;;  %v10855_v22 = vsel %vm10834_vm3, %v10820_v61, -inf  ;;  %v10864_v25 = vsel %vm10838_vm13, %v10825_v11, -inf }
 0x271   : > { %v10818_v26 = vsel %vm10754_vm7, %v10726_v0, %v10790_v4  ;;  %vm10759_vm10 = vcmp.gt.f32.partialorder %v10731_v13, 0.0  ;;  %v10795_v7 = vmul.f32 %v23896_v62, %v10731_v13  ;;  %v10824_v32 = vsel %vm10760_vm9, %v10732_v48, %v10796_v12 }
 0x272   : > { %v10854_v31 = vsel %vm10834_vm3, %v10818_v26, -inf  ;;  %v10737_v20 = vadd.f32 %v23942_v21, %v23892_v58  ;;  %v10730_v34 = vadd.f32 %v23890_v54, %v23945_v27  ;;  %v10736_v8 = vadd.f32 %v23890_v54, %v23947_v28 }
 0x273   : > { %v10856_v36 = vmax.f32 %v10854_v31, %v10855_v22  ;;  %v10823_v39 = vsel %vm10759_vm10, %v10731_v13, %v10795_v7  ;;  %v10735_v17 = vadd.f32 %v20620_v18, %v23892_v58  ;;  %v10953_v38 = vcombine.high %v23977_v45, %v23977_v45 }
 0x274   : > { %v10863_v57 = vsel %vm10838_vm13, %v10823_v39, -inf  ;;  %vm10765_vm11 = vcmp.gt.f32.partialorder %v10737_v20, 0.0  ;;  %v10801_v63 = vmul.f32 %v23896_v62, %v10737_v20  ;;  %vm10758_vm14 = vcmp.gt.f32.partialorder %v10730_v34, 0.0 }
 0x275   : > { %v10985_v30 = vcombine.high %v10856_v36, %v10856_v36  ;;  %v24018_v6 = vrot.slane %v10856_v36, %v23900_v5  ;;  %v10865_v21 = vmax.f32 %v10863_v57, %v10864_v25  ;;  %v10794_v27 = vmul.f32 %v23888_v51, %v10730_v34 }
 0x276   : > { %v10829_v41 = vsel %vm10765_vm11, %v10737_v20, %v10801_v63  ;;  %vm10764_vm15 = vcmp.gt.f32.partialorder %v10736_v8, 0.0  ;;  %v10800_v28 = vmul.f32 %v23888_v51, %v10736_v8  ;;  %v10977_v18 = vcombine.high %v24002_v3, %v24002_v3 }
 0x277   : > { %v24026_v44 = vcombine.low %v10968_v55, %v10976_v19  ;;  %v11133_v46 = vcombine.low %v23999_v14, %v24018_v6  ;;  %vm10763_vm0 = vcmp.gt.f32.partialorder %v10735_v17, 0.0  ;;  %v24031_v0 = vrot.slane %v10985_v30, %v23900_v5 }
 0x278   : > { %v10861_v48 = vsel %vm10834_vm3, %v10824_v32, -inf  ;;  %v10822_v52 = vsel %vm10758_vm14, %v10730_v34, %v10794_v27  ;;  %v10799_v53 = vmul.f32 %v23896_v62, %v10735_v17  ;;  %v24036_v59 = vsel %vm10838_vm13, %v10829_v41, -inf }
 0x279   : > { %v10860_v61 = vsel %vm10834_vm3, %v10822_v52, -inf  ;;  %v10828_v2 = vsel %vm10764_vm15, %v10736_v8, %v10800_v28  ;;  %v10741_v55 = vadd.f32 %v23960_v35, %v23892_v58  ;;  %v10734_v11 = vadd.f32 %v23890_v54, %v23967_v29 }
 0x27a   : > { %v10862_v56 = vmax.f32 %v10860_v61, %v10861_v48  ;;  %v10827_v4 = vsel %vm10763_vm0, %v10735_v17, %v10799_v53  ;;  %v10740_v12 = vadd.f32 %v23890_v54, %v23969_v23  ;;  %v11096_v22 = vrot.slane %v23962_v15, %v23900_v5 }
 0x27b   : > { %v10869_v13 = vsel %vm10838_vm13, %v10827_v4, -inf  ;;  %vm10769_vm4 = vcmp.gt.f32.partialorder %v10741_v55, 0.0  ;;  %v10805_v19 = vmul.f32 %v23896_v62, %v10741_v55  ;;  %v11008_v25 = vrot.slane %v10859_v40, %v23900_v5 }
 0x27c   : > { %v11009_v26 = vcombine.high %v10862_v56, %v10862_v56  ;;  %v10871_v35 = vmax.f32 %v10869_v13, %v24036_v59  ;;  %vm10762_vm5 = vcmp.gt.f32.partialorder %v10734_v11, 0.0  ;;  %v10798_v29 = vmul.f32 %v23888_v51, %v10734_v11 }
 0x27d   : > { %v10833_v7 = vsel %vm10769_vm4, %v10741_v55, %v10805_v19  ;;  %vm10768_vm6 = vcmp.gt.f32.partialorder %v10740_v12, 0.0  ;;  %v10804_v23 = vmul.f32 %v23888_v51, %v10740_v12  ;;  %v11000_v31 = vcombine.high %v24018_v6, %v24018_v6 }
 0x27e   : > { %v11001_v32 = vcombine.high %v24031_v0, %v24031_v0  ;;  %v11032_v15 = vrot.slane %v10865_v21, %v23900_v5  ;;  %v10867_v40 = vsel %vm10834_vm3, %v10828_v2, -inf  ;;  %v24060_v20 = vrot.slane %v10862_v56, %v23900_v5 }
 0x27f   : > { %v10826_v34 = vsel %vm10762_vm5, %v10734_v11, %v10798_v29  ;;  %v24065_v36 = vcombine.low %v11089_v42, %v11096_v22  ;;  %v10739_v39 = vadd.f32 %v23982_v10, %v23892_v58  ;;  %v11023_v8 = vrot.slane %v11009_v26, %v23900_v5 }
 0x280   : > { %v10876_v17 = vsel %vm10838_vm13, %v10833_v7, -inf  ;;  %v10866_v57 = vsel %vm10834_vm3, %v10826_v34, -inf  ;;  %v10832_v63 = vsel %vm10768_vm6, %v10740_v12, %v10804_v23  ;;  %v10738_v16 = vadd.f32 %v23890_v54, %v23988_v60 }
 0x281   : > { %v10868_v30 = vmax.f32 %v10866_v57, %v10867_v40  ;;  %20641 = vmatmul.mubr.msk.f32.vlgmr.msra.gmra.mrb[16].mxu0 %vm10834_vm3, %v24065_v36  ;;  %vm10767_vm7 = vcmp.gt.f32.partialorder %v10739_v39, 0.0  ;;  %v10803_v21 = vmul.f32 %v23896_v62, %v10739_v39  ;;  %v11099_v58 = vcombine.low %v10952_v1, %v23977_v45 }
 0x282   : > { %20643 = vmatprep.mubr.msk.f32.mxu0 %vm22406_vm8, %v22403_v43  ;;  %v11106_v42 = vrot.slane %v11098_v24, %v23900_v5  ;;  %v11115_v10 = vcombine.low %v10953_v38, %v23957_v37  ;;  %v11130_v62 = vrot.slane %v24026_v44, %v23900_v5  ;;  %vm10766_vm9 = vcmp.gt.f32.partialorder %v10738_v16, 0.0  ;;  %21323 = vmatpush3.bf16.msk.msra.mxu0 %vm23882_vm12, %v23886_v50 }
 0x283   : > { %v11033_v27 = vcombine.high %v10868_v30, %v10868_v30  ;;  %v11040_v54 = vrot.slane %v10868_v30, %v23900_v5  ;;  %v10831_v60 = vsel %vm10767_vm7, %v10739_v39, %v10803_v21  ;;  %v10802_v1 = vmul.f32 %v23888_v51, %v10738_v16 }
 0x284   : > { %v10875_v45 = vsel %vm10838_vm13, %v10831_v60, -inf  ;;  %v11113_v9 = vrot.slane %v11099_v58, %v23900_v5  ;;  %v11123_v33 = vrot.slane %v11115_v10, %v23900_v5  ;;  %v11132_v49 = vcombine.low %v24002_v3, %v10977_v18 }
 0x285   : > { %v11047_v37 = vrot.slane %v11033_v27, %v23900_v5  ;;  %v11048_v24 = vcombine.high %v11040_v54, %v11040_v54  ;;  %v11183_v38 = vcombine.low %v11032_v15, %v11040_v54  ;;  %v10877_v41 = vmax.f32 %v10875_v45, %v10876_v17 }
 0x286   : > { %v10830_v28 = vsel %vm10766_vm9, %v10738_v16, %v10802_v1  ;;  %v11114_v44 = vcombine.low %v11106_v42, %v11113_v9  ;;  %v11131_v48 = vcombine.low %v11123_v33, %v11130_v62  ;;  %v10873_v51 = vsel %vm10834_vm3, %v10832_v63, -inf }
 0x287   : > { %v11049_v50 = vcombine.high %v11047_v37, %v11047_v37  ;;  %v10872_v52 = vsel %vm10834_vm3, %v10830_v28, -inf  ;;  %v11147_v53 = vrot.slane %v11133_v46, %v23900_v5  ;;  %v11140_v61 = vrot.slane %v11132_v49, %v23900_v5 }
 0x288   : > { %v10874_v59 = vmax.f32 %v10872_v52, %v10873_v51  ;;  %20644 = vmatmul.mubr.msk.f32.gmra.mrb[18].mxu0 %vm10834_vm3, %v11114_v44  ;;  %v11149_v2 = vcombine.low %v11000_v31, %v24031_v0  ;;  %v11150_v55 = vcombine.low %v11001_v32, %v11008_v25  ;;  %v11025_v56 = vcombine.high %v11023_v8, %v11023_v8 }
 0x289   : > { %v11056_v3 = vrot.slane %v10871_v35, %v23900_v5  ;;  %20646 = vmatprep.mubr.msk.f32.mxu0 %vm22406_vm8, %v22403_v43  ;;  %v11184_v18 = vcombine.low %v11048_v24, %v11047_v37  ;;  %v11148_v14 = vcombine.low %v11140_v61, %v11147_v53  ;;  %v11191_v6 = vrot.slane %v11183_v38, %v23900_v5 }
 0x28a   : > { %v11057_v4 = vcombine.high %v10874_v59, %v10874_v59  ;;  %v11064_v11 = vrot.slane %v10874_v59, %v23900_v5  ;;  %v11157_v46 = vrot.slane %v11149_v2, %v23900_v5  ;;  %v11164_v12 = vrot.slane %v11150_v55, %v23900_v5 }
 0x28b   : > { %v11198_v0 = vrot.slane %v11184_v18, %v23900_v5  ;;  %v11200_v13 = vcombine.low %v11049_v50, %v11056_v3  ;;  %v11024_v19 = vcombine.high %v24060_v20, %v24060_v20  ;;  %v11080_v7 = vrot.slane %v10877_v41, %v23900_v5 }
 0x28c   : > { %v11071_v22 = vrot.slane %v11057_v4, %v23900_v5  ;;  %v11072_v25 = vcombine.high %v11064_v11, %v11064_v11  ;;  %20647 = vmatmul.mubr.msk.f32.gmra.mrb[20].mxu0 %vm10834_vm3, %v11131_v48  ;;  %v11165_v26 = vcombine.low %v11157_v46, %v11164_v12  ;;  %v11167_v31 = vcombine.low %v11023_v8, %v11025_v56 }
 0x28d   : > { %20649 = vmatprep.mubr.msk.f32.mxu0 %vm22406_vm8, %v22403_v43  ;;  %v11199_v35 = vcombine.low %v11191_v6, %v11198_v0  ;;  %v11166_v32 = vcombine.low %v24060_v20, %v11024_v19  ;;  %v11208_v15 = vrot.slane %v11200_v13, %v23900_v5  ;;  %v11231_v63 = vrot.slane %v11080_v7, %v23900_v5 }
 0x28e   : > { %v11073_v29 = vcombine.high %v11071_v22, %v11071_v22  ;;  %v11201_v23 = vcombine.low %v11064_v11, %v11072_v25  ;;  %v11181_v39 = vrot.slane %v11167_v31, %v23900_v5  ;;  %vm11697_vm12 = vcmask 80896  }
 0x28f   : > { %v11174_v20 = vrot.slane %v11166_v32, %v23900_v5  ;;  %vm22409_vm13 = vmmov 1  }
 0x290   : > { %20650 = vmatmul.mubr.msk.f32.gmra.mrb[22].mxu0 %vm10834_vm3, %v11148_v14  ;;  %v11215_v40 = vrot.slane %v11201_v23, %v23900_v5  ;;  %v11217_v34 = vcombine.low %v11071_v22, %v11073_v29 }
 0x291   : > { %20652 = vmatprep.mubr.msk.f32.mxu0 %vm22406_vm8, %v22403_v43  ;;  %v11182_v30 = vcombine.low %v11174_v20, %v11181_v39 }
 0x292   : > { %v11216_v17 = vcombine.low %v11208_v15, %v11215_v40  ;;  %v11224_v57 = vrot.slane %v11217_v34, %v23900_v5 }
 0x294   : > { %20653 = vmatmul.mubr.msk.f32.gmra.mrb[24].mxu0 %vm10834_vm3, %v11165_v26  ;;  %v11232_v8 = vcombine.low %v11224_v57, %v11231_v63 }
 0x295   : > { %20655 = vmatprep.mubr.msk.f32.mxu0 %vm22406_vm8, %v22403_v43 }
 0x298   : > { %20656 = vmatmul.mubr.msk.f32.gmra.mrb[26].mxu0 %vm10834_vm3, %v11182_v30 }
 0x299   : > { %20658 = vmatprep.mubr.msk.f32.mxu0 %vm22406_vm8, %v22403_v43 }
 0x29c   : > { %20659 = vmatmul.mubr.msk.f32.gmra.mrb[28].mxu0 %vm10834_vm3, %v11199_v35 }
 0x29d   : > { %20661 = vmatprep.mubr.msk.f32.mxu0 %vm22406_vm8, %v22403_v43 }
 0x2a0   : > { %20662 = vmatmul.mubr.msk.f32.gmra.mrb[30].mxu0 %vm10834_vm3, %v11216_v17 }
 0x2a1   : > { %20664 = vmatprep.mubr.msk.f32.mxu0 %vm22406_vm8, %v22403_v43 }
 0x2a4   : > { %20665 = vmatmul.mubr.msk.f32.gmra.mrb[32].mxu0 %vm10834_vm3, %v11232_v8 }
 0x2a5   : > { %20671 = vmatprep.mubr.msk.f32.mxu0 %vm22406_vm8, %v22403_v43 }
 0x2a8   : > { %20672 = vmatmul.mubr.msk.f32.vlgmr.msra.gmra.mrb[34].mxu0 %vm10834_vm3, %v24065_v36 }
 0x2a9   : > { %20674 = vmatprep.mubr.msk.f32.mxu0 %vm22406_vm8, %v22403_v43 }
 0x2ac   : > { %20675 = vmatmul.mubr.msk.f32.gmra.mrb[36].mxu0 %vm10834_vm3, %v11114_v44 }
 0x2ad   : > { %20677 = vmatprep.mubr.msk.f32.mxu0 %vm22406_vm8, %v22403_v43 }
 0x2b0   : > { %20678 = vmatmul.mubr.msk.f32.gmra.mrb[38].mxu0 %vm10834_vm3, %v11131_v48 }
 0x2b1   : > { %20680 = vmatprep.mubr.msk.f32.mxu0 %vm22406_vm8, %v22403_v43 }
 0x2b4   : > { %20681 = vmatmul.mubr.msk.f32.gmra.mrb[40].mxu0 %vm10834_vm3, %v11148_v14 }
 0x2b5   : > { %20683 = vmatprep.mubr.msk.f32.mxu0 %vm22406_vm8, %v22403_v43 }
 0x2b8   : > { %20684 = vmatmul.mubr.msk.f32.gmra.mrb[42].mxu0 %vm10834_vm3, %v11165_v26 }
 0x2b9   : > { %20686 = vmatprep.mubr.msk.f32.mxu0 %vm22406_vm8, %v22403_v43 }
 0x2bc   : > { %20687 = vmatmul.mubr.msk.f32.gmra.mrb[44].mxu0 %vm10834_vm3, %v11182_v30 }
 0x2bd   : > { %20689 = vmatprep.mubr.msk.f32.mxu0 %vm22406_vm8, %v22403_v43 }
 0x2c0   : > { %20690 = vmatmul.mubr.msk.f32.gmra.mrb[46].mxu0 %vm10834_vm3, %v11199_v35 }
 0x2c1   : > { %20692 = vmatprep.mubr.msk.f32.mxu0 %vm22406_vm8, %v22403_v43 }
 0x2c4   : > { %20693 = vmatmul.mubr.msk.f32.gmra.mrb[48].mxu0 %vm10834_vm3, %v11216_v17 }
 0x2c5   : > { %20695 = vmatprep.mubr.msk.f32.mxu0 %vm22406_vm8, %v22403_v43 }
 0x2c8   : > { %20696 = vmatmul.mubr.msk.f32.gmra.mrb[50].mxu0 %vm10834_vm3, %v11232_v8  ;;  %vm24287_vm3 = vmpackc.low %vm789_vm2, %vm22409_vm13  ;;  %vm15561_vm2 = vcmask 130048  }
 0x354   : > { %v11321_v36 = vpop.f32.mrb[16].mxu0 }
 0x355   : > { %v20642_v21 = vpop.f32.mrb[17].mxu0 }
 0x35b   : > { %v11326_v16 = vpop.f32.mrb[18].mxu0 }
 0x35c   : > { %v20645_v58 = vpop.f32.mrb[19].mxu0 }
 0x35f   : > { %v11331_v42 = vpop.f32.mrb[20].mxu0 }
 0x360   : > { %v20648_v10 = vpop.f32.mrb[21].mxu0 }
 0x363   : > { %v11336_v62 = vpop.f32.mrb[22].mxu0 }
 0x364   : > { %v20651_v27 = vpop.f32.mrb[23].mxu0 }
 0x367   : > { %v11341_v54 = vpop.f32.mrb[24].mxu0 }
 0x368   : > { %v20654_v60 = vpop.f32.mrb[25].mxu0 }
 0x36b   : > { %v24178_v45 = vpop.f32.mrb[26].mxu0 }
 0x36c   : > { %v20657_v1 = vpop.f32.mrb[27].mxu0 }
 0x36d   : > { %v24209_v1 = vld [vmem:[%s25172_s2 + $0x10] sm:$0xff] }
 0x36e   : > { %20702 = vmatprep.mubr.msk.f32.mxu0 %vm11697_vm12, %v24209_v1  ;;  %20709 = vmatprep.mubr.msk.f32.mxu1 %vm11697_vm12, %v24209_v1 }
 0x36f   : > { %v24180_v9 = vpop.f32.mrb[28].mxu0 }
 0x370   : > { %v20660_v33 = vpop.f32.mrb[29].mxu0 }
 0x373   : > { %v24182_v37 = vpop.f32.mrb[30].mxu0 }
 0x374   : > { %v20663_v24 = vpop.f32.mrb[31].mxu0 }
 0x377   : > { %v24184_v38 = vpop.f32.mrb[32].mxu0 }
 0x378   : > { %v20666_v41 = vpop.f32.mrb[33].mxu0 }
 0x37b   : > { %v11434_v28 = vpop.f32.mrb[34].mxu0 }
 0x37c   : > { %v11478_v44 = vmax.f32 %v11321_v36, %v11434_v28  ;;  %v20673_v48 = vpop.f32.mrb[35].mxu0 }
 0x37e   : > { %v11496_v49 = vcombine.high %v11478_v44, %v11478_v44  ;;  %v11503_v50 = vrot.slane %v11478_v44, %v23900_v5 }
 0x37f   : > { %v11439_v51 = vpop.f32.mrb[36].mxu0 }
 0x380   : > { %v11510_v52 = vrot.slane %v11496_v49, %v23900_v5  ;;  %v11511_v53 = vcombine.high %v11503_v50, %v11503_v50  ;;  %v11479_v59 = vmax.f32 %v11326_v16, %v11439_v51  ;;  %v20676_v61 = vpop.f32.mrb[37].mxu0 }
 0x382   : > { %v11512_v2 = vcombine.high %v11510_v52, %v11510_v52  ;;  %v11668_v55 = vcombine.low %v11503_v50, %v11511_v53  ;;  %v11513_v56 = vcombine.high %v11479_v59, %v11479_v59  ;;  %v11520_v3 = vrot.slane %v11479_v59, %v23900_v5 }
 0x383   : > { %v11444_v18 = vpop.f32.mrb[38].mxu0 }
 0x384   : > { %v11669_v4 = vcombine.low %v11510_v52, %v11512_v2  ;;  %v11527_v11 = vrot.slane %v11513_v56, %v23900_v5  ;;  %v11528_v14 = vcombine.high %v11520_v3, %v11520_v3  ;;  %v20679_v6 = vpop.f32.mrb[39].mxu0  ;;  %v11480_v46 = vmax.f32 %v11331_v42, %v11444_v18 }
 0x385   : > { %v11676_v12 = vrot.slane %v11668_v55, %v23900_v5  ;;  %v11691_v35 = vrot.slane %v11520_v3, %v23900_v5 }
 0x386   : > { %v11683_v0 = vrot.slane %v11669_v4, %v23900_v5  ;;  %v11529_v13 = vcombine.high %v11527_v11, %v11527_v11  ;;  %v11781_v19 = vcombine.low %v11528_v14, %v11527_v11  ;;  %v11530_v22 = vcombine.high %v11480_v46, %v11480_v46 }
 0x387   : > { %v11537_v25 = vrot.slane %v11480_v46, %v23900_v5  ;;  %v11449_v26 = vpop.f32.mrb[40].mxu0 }
 0x388   : > { %v11481_v7 = vmax.f32 %v11336_v62, %v11449_v26  ;;  %v20682_v29 = vpop.f32.mrb[41].mxu0  ;;  %v11684_v23 = vcombine.low %v11676_v12, %v11683_v0  ;;  %v11544_v31 = vrot.slane %v11530_v22, %v23900_v5  ;;  %v11789_v17 = vrot.slane %v11781_v19, %v23900_v5 }
 0x389   : > { %v11545_v32 = vcombine.high %v11537_v25, %v11537_v25  ;;  %v11782_v15 = vcombine.low %v11529_v13, %v11537_v25 }
 0x38a   : > { %v11547_v40 = vcombine.high %v11481_v7, %v11481_v7  ;;  %v11554_v34 = vrot.slane %v11481_v7, %v23900_v5  ;;  %v24196_v39 = vpack.i.bf16 %v11691_v35, %v11684_v23  ;;  %v11546_v57 = vcombine.high %v11544_v31, %v11544_v31 }
 0x38b   : > { %v11796_v63 = vrot.slane %v11782_v15, %v23900_v5  ;;  %v11454_v20 = vpop.f32.mrb[42].mxu0  ;;  %v24200_v8 = vpack.c.bf16 %v11691_v35, %v11684_v23  ;;  %v11804_v58 = vrot.slane %v11545_v32, %v23900_v5 }
 0x38c   : > { %v11561_v30 = vrot.slane %v11547_v40, %v23900_v5  ;;  %v11562_v36 = vcombine.high %v11554_v34, %v11554_v34  ;;  %v11482_v21 = vmax.f32 %v11341_v54, %v11454_v20  ;;  %22186 = vrot.lane.b32.xlu1 %v24196_v39, %s22399_s20  ;;  %v20685_v16 = vpop.f32.mrb[43].mxu0  ;;  %v11887_v42 = vcombine.low %v11544_v31, %v11546_v57 }
 0x38d   : > { %v11797_v10 = vcombine.low %v11789_v17, %v11796_v63 }
 0x38e   : > { %v11888_v62 = vcombine.low %v11554_v34, %v11562_v36  ;;  %v11563_v27 = vcombine.high %v11561_v30, %v11561_v30  ;;  %v11564_v60 = vcombine.high %v11482_v21, %v11482_v21  ;;  %v11895_v33 = vrot.slane %v11887_v42, %v23900_v5 }
 0x38f   : > { %v11571_v54 = vrot.slane %v11482_v21, %v23900_v5  ;;  %v11459_v24 = vpop.f32.mrb[44].mxu0  ;;  %v24213_v41 = vpack.i.bf16 %v11804_v58, %v11797_v10  ;;  %v24222_v52 = vpack.c.bf16 %v11804_v58, %v11797_v10  ;;  %v11910_v53 = vrot.slane %v11561_v30, %v23900_v5 }
 0x390   : > { %v11902_v28 = vrot.slane %v11888_v62, %v23900_v5  ;;  %v11578_v44 = vrot.slane %v11564_v60, %v23900_v5  ;;  %v11483_v48 = vmax.f32 %v24178_v45, %v11459_v24  ;;  %v20688_v49 = vpop.f32.mrb[45].mxu0 }
 0x391   : > { %v11579_v50 = vcombine.high %v11571_v54, %v11571_v54  ;;  %v11993_v51 = vcombine.low %v11563_v27, %v11571_v54 }
 0x392   : > { %v11581_v59 = vcombine.high %v11483_v48, %v11483_v48  ;;  %v11588_v61 = vrot.slane %v11483_v48, %v23900_v5  ;;  %v11903_v2 = vcombine.low %v11895_v33, %v11902_v28  ;;  %v11580_v55 = vcombine.high %v11578_v44, %v11578_v44 }
 0x393   : > { %v11994_v45 = vcombine.low %v11579_v50, %v11578_v44  ;;  %v11464_v56 = vpop.f32.mrb[46].mxu0  ;;  %v12001_v6 = vrot.slane %v11993_v51, %v23900_v5 }
 0x394   : > { %v11595_v3 = vrot.slane %v11581_v59, %v23900_v5  ;;  %v11596_v18 = vcombine.high %v11588_v61, %v11588_v61  ;;  %v11484_v4 = vmax.f32 %v24180_v9, %v11464_v56  ;;  %v20691_v11 = vpop.f32.mrb[47].mxu0  ;;  %v22190_v14 = vpack.i.bf16 %v11910_v53, %v11903_v2 }
 0x395   : > { %v12008_v46 = vrot.slane %v11994_v45, %v23900_v5  ;;  %v24230_v12 = vpack.c.bf16 %v11910_v53, %v11903_v2  ;;  %v12016_v35 = vrot.slane %v11580_v55, %v23900_v5 }
 0x396   : > { %v11597_v0 = vcombine.high %v11595_v3, %v11595_v3  ;;  %v12099_v13 = vcombine.low %v11588_v61, %v11596_v18  ;;  %v11598_v19 = vcombine.high %v11484_v4, %v11484_v4  ;;  %v11605_v22 = vrot.slane %v11484_v4, %v23900_v5  ;;  %22191 = vrot.lane.b32.xlu1 %v22190_v14, %s22399_s20 }
 0x397   : > { %v11469_v25 = vpop.f32.mrb[48].mxu0  ;;  %v12009_v26 = vcombine.low %v12001_v6, %v12008_v46  ;;  %v22408_v18 = vmov 2   ;;  %v22410_v46 = vmov 3  }
 0x398   : > { %v12100_v9 = vcombine.low %v11595_v3, %v11597_v0  ;;  %v11612_v7 = vrot.slane %v11598_v19, %v23900_v5  ;;  %v11613_v29 = vcombine.high %v11605_v22, %v11605_v22  ;;  %v20694_v23 = vpop.f32.mrb[49].mxu0  ;;  %v11485_v31 = vmax.f32 %v24182_v37, %v11469_v25  ;;  %v24282_v3 = vld [vmem:[%s25175_s5 + $0x8] sm:$0xff]  ;;  %22255 = vset.pattern.permute.xlu0 %v22408_v18  ;;  %v11653_v0 = vld [vmem:[%s25172_s2 + $0x18] sm:$0xff] }
 0x399   : > { %v22220_v32 = vpack.i.bf16 %v12016_v35, %v12009_v26  ;;  %v24237_v15 = vpack.c.bf16 %v12016_v35, %v12009_v26  ;;  %v12107_v40 = vrot.slane %v12099_v13, %v23900_v5  ;;  %v12122_v36 = vrot.slane %v11605_v22, %v23900_v5  ;;  %22256 = vset.pattern.permute.xlu1 %v22408_v18 }
 0x39a   : > { %v12114_v34 = vrot.slane %v12100_v9, %v23900_v5  ;;  %v11614_v17 = vcombine.high %v11612_v7, %v11612_v7  ;;  %22201 = vrot.lane.b32.xlu1 %v24196_v39, %s22400_s21  ;;  %v13333_v57 = vcombine.low %v11613_v29, %v11612_v7  ;;  %v11615_v63 = vcombine.high %v11485_v31, %v11485_v31 }
 0x39b   : > { %v11622_v20 = vrot.slane %v11485_v31, %v23900_v5  ;;  %v11474_v30 = vpop.f32.mrb[50].mxu0 }
 0x39c   : > { %v11486_v37 = vmax.f32 %v24184_v38, %v11474_v30  ;;  %v20697_v21 = vpop.f32.mrb[51].mxu0  ;;  %v12115_v16 = vcombine.low %v12107_v40, %v12114_v34  ;;  %v11629_v58 = vrot.slane %v11615_v63, %v23900_v5  ;;  %v13341_v33 = vrot.slane %v13333_v57, %v23900_v5  ;;  %v11650_v40 = vld [vmem:[%s25172_s2] sm:$0xff]  ;;  %v11651_v30 = vld [vmem:[%s25172_s2 + $0x8] sm:$0xff] }
 0x39d   : > { %v11630_v42 = vcombine.high %v11622_v20, %v11622_v20  ;;  %v13334_v10 = vcombine.low %v11614_v17, %v11622_v20 }
 0x39e   : > { %v11632_v62 = vcombine.high %v11486_v37, %v11486_v37  ;;  %v11639_v27 = vrot.slane %v11486_v37, %v23900_v5  ;;  %v22210_v60 = vpack.i.bf16 %v12122_v36, %v12115_v16  ;;  %v24248_v39 = vpack.c.bf16 %v12122_v36, %v12115_v16 }
 0x39f   : > { %v11631_v54 = vcombine.high %v11629_v58, %v11629_v58  ;;  %v13348_v24 = vrot.slane %v13334_v10, %v23900_v5  ;;  %v13356_v38 = vrot.slane %v11630_v42, %v23900_v5 }
 0x3a0   : > { %v11647_v28 = vcombine.high %v11639_v27, %v11639_v27  ;;  %22211 = vrot.lane.b32.xlu1 %v22210_v60, %s22400_s21  ;;  %22196 = vrot.lane.b32.xlu0 %v22210_v60, %s22399_s20  ;;  %v11646_v49 = vrot.slane %v11632_v62, %v23900_v5 }
 0x3a1   : > { %v14547_v44 = vcombine.low %v11629_v58, %v11631_v54  ;;  %v13349_v48 = vcombine.low %v13341_v33, %v13348_v24  ;;  %v11654_v24 = vld [vmem:[%s25172_s2 + $0x20] sm:$0xff] }
 0x3a2   : > { %v14548_v50 = vcombine.low %v11639_v27, %v11647_v28  ;;  %v14570_v2 = vrot.slane %v11646_v49, %v23900_v5 }
 0x3a3   : > { %v22230_v51 = vpack.i.bf16 %v13356_v38, %v13349_v48  ;;  %v24256_v53 = vpack.c.bf16 %v13356_v38, %v13349_v48  ;;  %v14555_v59 = vrot.slane %v14547_v44, %v23900_v5 }
 0x3a4   : > { %v14562_v61 = vrot.slane %v14548_v50, %v23900_v5  ;;  %22221 = vrot.lane.b32.xlu1 %v22220_v32, %s22399_s20  ;;  %22206 = vrot.lane.b32.xlu0 %v22190_v14, %s22400_s21  ;;  %v24277_v5 = vld [vmem:[%s25175_s5] sm:$0xff] }
 0x3a6   : > { %v14563_v55 = vcombine.low %v14555_v59, %v14562_v61  ;;  %v11657_v59 = vld [vmem:[%s25172_s2 + $0x38] sm:$0xff] }
 0x3a8   : > { %22231 = vrot.lane.b32.xlu1 %v22230_v51, %s22399_s20  ;;  %v22250_v45 = vpack.i.bf16 %v14570_v2, %v14563_v55  ;;  %v24264_v56 = vpack.c.bf16 %v14570_v2, %v14563_v55  ;;  %22216 = vrot.lane.b32.xlu0 %v24213_v41, %s22399_s20  ;;  %v11658_v55 = vld [vmem:[%s25172_s2 + $0x40] sm:$0xff] }
 0x3ac   : > { %22241 = vrot.lane.b32.xlu1 %v22230_v51, %s22400_s21  ;;  %22226 = vrot.lane.b32.xlu0 %v24213_v41, %s22400_s21  ;;  %v11656_v51 = vld [vmem:[%s25172_s2 + $0x30] sm:$0xff] }
 0x3b0   : > { %22251 = vrot.lane.b32.xlu1 %v22250_v45, %s22400_s21  ;;  %22236 = vrot.lane.b32.xlu0 %v22220_v32, %s22400_s21 }
 0x3b4   : > { %22246 = vrot.lane.b32.xlu0 %v22250_v45, %s22399_s20  ;;  %15462 = vperm.xlu1 %22256, %v24282_v3   ;;  %v11659_v45 = vld [vmem:[%s25172_s2 + $0x48] sm:$0xff] }
 0x3b8   : > { %15457 = vperm.xlu0 %22255, %v24277_v5   ;;  %22257 = vset.pattern.permute.xlu1 %v22410_v46 }
 0x3b9   : > { %15486 = vperm.xlu1 %22257, %v24277_v5  }
 0x3bc   : > { %22258 = vset.pattern.permute.xlu0 %v22410_v46 }
 0x3bd   : > { %15490 = vperm.xlu0 %22258, %v24282_v3  }
 0x3fe   : > { %v22187_v41 = vpop.permute.xlu1 %22186 }
 0x3ff   : > { %v22189_v4 = vunpack.i.h.bf16 %v22187_v41  ;;  %v22188_v11 = vunpack.i.l.bf16 %v22187_v41  ;;  %v11660_v41 = vld [vmem:[%s25172_s2 + $0x50] sm:$0xff] }
 0x401   : > { %v21324_v6 = vpack.c.bf16 %v22189_v4, %v22188_v11  ;;  %v11661_v11 = vld [vmem:[%s25172_s2 + $0x58] sm:$0xff] }
 0x403   : > { %21326 = vmatprep.subr.msk.bf16.mxu0 %vm24287_vm3, %v21324_v6 }
 0x404   : > { %21329 = vmatpush3.bf16.msk.msra.mxu0 %vm24287_vm3, %v21324_v6 }
 0x407   : > { %20703 = vmatmul.mubr.msk.f32.vlgmr.msra.gmra.mrb[52].mxu0 %vm11697_vm12, %v11653_v0 }
 0x408   : > { %v22192_v13 = vpop.permute.xlu1 %22191  ;;  %20716 = vmatprep.mubr.msk.f32.mxu0 %vm11697_vm12, %v24209_v1 }
 0x409   : > { %v22194_v19 = vunpack.i.h.bf16 %v22192_v13  ;;  %v22193_v22 = vunpack.i.l.bf16 %v22192_v13  ;;  %v11662_v13 = vld [vmem:[%s25172_s2 + $0x60] sm:$0xff] }
 0x40b   : > { %v24303_v25 = vpack.c.bf16 %v22194_v19, %v22193_v22  ;;  %v11663_v19 = vld [vmem:[%s25172_s2 + $0x68] sm:$0xff] }
 0x40c   : > { %v22202_v26 = vpop.permute.xlu1 %22201  ;;  %v11667_v22 = vld [vmem:[%s25172_s2 + $0x88] sm:$0xff] }
 0x40d   : > { %21338 = vmatprep.subr.msk.bf16.mxu0 %vm24287_vm3, %v24303_v25  ;;  %v22204_v37 = vunpack.i.h.bf16 %v22202_v26  ;;  %v22203_v21 = vunpack.i.l.bf16 %v22202_v26 }
 0x40e   : > { %21341 = vmatpush3.bf16.msk.msra.mxu0 %vm24287_vm3, %v24303_v25 }
 0x40f   : > { %v21384_v58 = vpack.c.bf16 %v22204_v37, %v22203_v21 }
 0x411   : > { %20717 = vmatmul.mubr.msk.f32.vlgmr.msra.gmra.mrb[54].mxu0 %vm11697_vm12, %v11653_v0 }
 0x412   : > { %20730 = vmatprep.mubr.msk.f32.mxu0 %vm11697_vm12, %v24209_v1  ;;  %v22212_v35 = vpop.permute.xlu1 %22211  ;;  %v22197_v9 = vpop.permute.xlu0 %22196 }
 0x413   : > { %v22199_v7 = vunpack.i.h.bf16 %v22197_v9  ;;  %v22198_v29 = vunpack.i.l.bf16 %v22197_v9  ;;  %v22214_v62 = vunpack.i.h.bf16 %v22212_v35  ;;  %v22213_v27 = vunpack.i.l.bf16 %v22212_v35 }
 0x415   : > { %v24314_v23 = vpack.c.bf16 %v22199_v7, %v22198_v29  ;;  %v24399_v38 = vpack.c.bf16 %v22214_v62, %v22213_v27 }
 0x416   : > { %v22207_v31 = vpop.permute.xlu0 %22206  ;;  %v22222_v32 = vpop.permute.xlu1 %22221 }
 0x417   : > { %21350 = vmatprep.subr.msk.bf16.mxu0 %vm24287_vm3, %v24314_v23  ;;  %v22224_v17 = vunpack.i.h.bf16 %v22222_v32  ;;  %v22223_v57 = vunpack.i.l.bf16 %v22222_v32  ;;  %v22209_v42 = vunpack.i.h.bf16 %v22207_v31  ;;  %v22208_v10 = vunpack.i.l.bf16 %v22207_v31 }
 0x418   : > { %21353 = vmatpush3.bf16.msk.msra.mxu0 %vm24287_vm3, %v24314_v23 }
 0x419   : > { %21356 = vmatprep.subr.msk.bf16.mxu0 %vm24287_vm3, %v24200_v8  ;;  %v24341_v16 = vpack.c.bf16 %v22224_v17, %v22223_v57  ;;  %v24376_v60 = vpack.c.bf16 %v22209_v42, %v22208_v10 }
 0x41a   : > { %v22217_v34 = vpop.permute.xlu0 %22216 }
 0x41b   : > { %v22219_v63 = vunpack.i.h.bf16 %v22217_v34  ;;  %v22218_v20 = vunpack.i.l.bf16 %v22217_v34  ;;  %20731 = vmatmul.mubr.msk.f32.vlgmr.msra.gmra.mrb[56].mxu0 %vm11697_vm12, %v11653_v0 }
 0x41c   : > { %21359 = vmatpush3.bf16.msk.msra.mxu0 %vm24287_vm3, %v24200_v8  ;;  %20737 = vmatprep.mubr.msk.f32.mxu0 %vm11697_vm12, %v11650_v40 }
 0x41d   : > { %v24336_v36 = vpack.c.bf16 %v22219_v63, %v22218_v20  ;;  %21368 = vmatprep.subr.msk.bf16.mxu0 %vm24287_vm3, %v24230_v12 }
 0x41e   : > { %v22227_v8 = vpop.permute.xlu0 %22226 }
 0x41f   : > { %21332 = vmatprep.subr.msk.bf16.mxu1 %vm24287_vm3, %v24336_v36  ;;  %20738 = vmatmul.mubr.msk.f32.vlgmr.msra.gmra.mrb[52].mxu0 %vm11697_vm12, %v11651_v30  ;;  %v22229_v33 = vunpack.i.h.bf16 %v22227_v8  ;;  %v22228_v54 = vunpack.i.l.bf16 %v22227_v8 }
 0x420   : > { %21335 = vmatpush3.bf16.msk.msra.mxu1 %vm24287_vm3, %v24336_v36  ;;  %21371 = vmatpush3.bf16.msk.msra.mxu0 %vm24287_vm3, %v24230_v12 }
 0x421   : > { %21344 = vmatprep.subr.msk.bf16.mxu1 %vm24287_vm3, %v24341_v16  ;;  %21380 = vmatprep.subr.msk.bf16.mxu0 %vm24287_vm3, %v24248_v39  ;;  %v24401_v44 = vpack.c.bf16 %v22229_v33, %v22228_v54 }
 0x422   : > { %20751 = vmatprep.mubr.msk.f32.mxu0 %vm11697_vm12, %v11650_v40  ;;  %v22237_v28 = vpop.permute.xlu0 %22236 }
 0x423   : > { %20710 = vmatmul.mubr.msk.f32.vlgmr.msra.gmra.mrb[14].mxu1 %vm11697_vm12, %v11653_v0  ;;  %20752 = vmatmul.mubr.msk.f32.vlgmr.msra.gmra.mrb[54].mxu0 %vm11697_vm12, %v11651_v30  ;;  %v22239_v48 = vunpack.i.h.bf16 %v22237_v28  ;;  %v22238_v49 = vunpack.i.l.bf16 %v22237_v28 }
 0x424   : > { %21347 = vmatpush3.bf16.msk.msra.mxu1 %vm24287_vm3, %v24341_v16  ;;  %21383 = vmatpush3.bf16.msk.msra.mxu0 %vm24287_vm3, %v24248_v39 }
 0x425   : > { %21362 = vmatprep.subr.msk.bf16.mxu1 %vm24287_vm3, %v24222_v52  ;;  %21386 = vmatprep.subr.msk.bf16.mxu0 %vm24287_vm3, %v21384_v58  ;;  %v24419_v50 = vpack.c.bf16 %v22239_v48, %v22238_v49 }
 0x426   : > { %20723 = vmatprep.mubr.msk.f32.mxu1 %vm11697_vm12, %v24209_v1  ;;  %20765 = vmatprep.mubr.msk.f32.mxu0 %vm11697_vm12, %v11650_v40  ;;  %v11655_v1 = vld [vmem:[%s25172_s2 + $0x28] sm:$0xff] }
 0x427   : > { %20724 = vmatmul.mubr.msk.f32.vlgmr.msra.gmra.mrb[16].mxu1 %vm11697_vm12, %v11653_v0  ;;  %20766 = vmatmul.mubr.msk.f32.vlgmr.msra.gmra.mrb[56].mxu0 %vm11697_vm12, %v11651_v30 }
 0x428   : > { %21365 = vmatpush3.bf16.msk.msra.mxu1 %vm24287_vm3, %v24222_v52  ;;  %21389 = vmatpush3.bf16.msk.msra.mxu0 %vm24287_vm3, %v21384_v58 }
 0x429   : > { %21374 = vmatprep.subr.msk.bf16.mxu1 %vm24287_vm3, %v24237_v15  ;;  %21398 = vmatprep.subr.msk.bf16.mxu0 %vm24287_vm3, %v24376_v60 }
 0x42a   : > { %20744 = vmatprep.mubr.msk.f32.mxu1 %vm11697_vm12, %v11650_v40  ;;  %20772 = vmatprep.mubr.msk.f32.mxu0 %vm11697_vm12, %v11654_v24 }
 0x42b   : > { %20745 = vmatmul.mubr.msk.f32.vlgmr.msra.gmra.mrb[14].mxu1 %vm11697_vm12, %v11651_v30  ;;  %20773 = vmatmul.mubr.msk.f32.vlgmr.msra.gmra.mrb[52].mxu0 %vm11697_vm12, %v11655_v1 }
 0x42c   : > { %21377 = vmatpush3.bf16.msk.msra.mxu1 %vm24287_vm3, %v24237_v15  ;;  %21401 = vmatpush3.bf16.msk.msra.mxu0 %vm24287_vm3, %v24376_v60 }
 0x42d   : > { %21392 = vmatprep.subr.msk.bf16.mxu1 %vm24287_vm3, %v24401_v44  ;;  %21410 = vmatprep.subr.msk.bf16.mxu0 %vm24287_vm3, %v24399_v38 }
 0x42e   : > { %20758 = vmatprep.mubr.msk.f32.mxu1 %vm11697_vm12, %v11650_v40  ;;  %20786 = vmatprep.mubr.msk.f32.mxu0 %vm11697_vm12, %v11654_v24 }
 0x42f   : > { %20759 = vmatmul.mubr.msk.f32.vlgmr.msra.gmra.mrb[16].mxu1 %vm11697_vm12, %v11651_v30  ;;  %20787 = vmatmul.mubr.msk.f32.vlgmr.msra.gmra.mrb[54].mxu0 %vm11697_vm12, %v11655_v1 }
 0x430   : > { %21395 = vmatpush3.bf16.msk.msra.mxu1 %vm24287_vm3, %v24401_v44  ;;  %21413 = vmatpush3.bf16.msk.msra.mxu0 %vm24287_vm3, %v24399_v38 }
 0x431   : > { %21404 = vmatprep.subr.msk.bf16.mxu1 %vm24287_vm3, %v24419_v50  ;;  %21416 = vmatprep.subr.msk.bf16.mxu0 %vm24287_vm3, %v24222_v52 }
 0x432   : > { %20779 = vmatprep.mubr.msk.f32.mxu1 %vm11697_vm12, %v11654_v24  ;;  %20800 = vmatprep.mubr.msk.f32.mxu0 %vm11697_vm12, %v11654_v24 }
 0x433   : > { %20780 = vmatmul.mubr.msk.f32.vlgmr.msra.gmra.mrb[14].mxu1 %vm11697_vm12, %v11655_v1  ;;  %20801 = vmatmul.mubr.msk.f32.vlgmr.msra.gmra.mrb[56].mxu0 %vm11697_vm12, %v11655_v1 }
 0x434   : > { %21407 = vmatpush3.bf16.msk.msra.mxu1 %vm24287_vm3, %v24419_v50  ;;  %21419 = vmatpush3.bf16.msk.msra.mxu0 %vm24287_vm3, %v24222_v52  ;;  %v22232_v52 = vpop.permute.xlu1 %22231 }
 0x435   : > { %21422 = vmatprep.subr.msk.bf16.mxu1 %vm24287_vm3, %v24230_v12  ;;  %21428 = vmatprep.subr.msk.bf16.mxu0 %vm24287_vm3, %v24237_v15  ;;  %v22234_v61 = vunpack.i.h.bf16 %v22232_v52  ;;  %v22233_v2 = vunpack.i.l.bf16 %v22232_v52 }
 0x436   : > { %20793 = vmatprep.mubr.msk.f32.mxu1 %vm11697_vm12, %v11654_v24  ;;  %20807 = vmatprep.mubr.msk.f32.mxu0 %vm11697_vm12, %v11656_v51 }
 0x437   : > { %20794 = vmatmul.mubr.msk.f32.vlgmr.msra.gmra.mrb[16].mxu1 %vm11697_vm12, %v11655_v1  ;;  %20808 = vmatmul.mubr.msk.f32.vlgmr.msra.gmra.mrb[52].mxu0 %vm11697_vm12, %v11657_v59  ;;  %v21468_v18 = vpack.c.bf16 %v22234_v61, %v22233_v2 }
 0x438   : > { %21425 = vmatpush3.bf16.msk.msra.mxu1 %vm24287_vm3, %v24230_v12  ;;  %21431 = vmatpush3.bf16.msk.msra.mxu0 %vm24287_vm3, %v24237_v15  ;;  %v22242_v4 = vpop.permute.xlu1 %22241 }
 0x439   : > { %21434 = vmatprep.subr.msk.bf16.mxu1 %vm24287_vm3, %v24248_v39  ;;  %21440 = vmatprep.subr.msk.bf16.mxu0 %vm24287_vm3, %v24256_v53  ;;  %v22244_v6 = vunpack.i.h.bf16 %v22242_v4  ;;  %v22243_v46 = vunpack.i.l.bf16 %v22242_v4 }
 0x43a   : > { %20814 = vmatprep.mubr.msk.f32.mxu1 %vm11697_vm12, %v11656_v51  ;;  %20821 = vmatprep.mubr.msk.f32.mxu0 %vm11697_vm12, %v11656_v51 }
 0x43b   : > { %20815 = vmatmul.mubr.msk.f32.vlgmr.msra.gmra.mrb[14].mxu1 %vm11697_vm12, %v11657_v59  ;;  %20822 = vmatmul.mubr.msk.f32.vlgmr.msra.gmra.mrb[54].mxu0 %vm11697_vm12, %v11657_v59  ;;  %v21498_v0 = vpack.c.bf16 %v22244_v6, %v22243_v46 }
 0x43c   : > { %21437 = vmatpush3.bf16.msk.msra.mxu1 %vm24287_vm3, %v24248_v39  ;;  %21443 = vmatpush3.bf16.msk.msra.mxu0 %vm24287_vm3, %v24256_v53 }
 0x43d   : > { %21446 = vmatprep.subr.msk.bf16.mxu0 %vm24287_vm3, %v24336_v36  ;;  %21452 = vmatprep.subr.msk.bf16.mxu1 %vm24287_vm3, %v24303_v25 }
 0x43e   : > { %20828 = vmatprep.mubr.msk.f32.mxu1 %vm11697_vm12, %v11656_v51  ;;  %20835 = vmatprep.mubr.msk.f32.mxu0 %vm11697_vm12, %v11656_v51 }
 0x43f   : > { %20829 = vmatmul.mubr.msk.f32.vlgmr.msra.gmra.mrb[16].mxu1 %vm11697_vm12, %v11657_v59  ;;  %20836 = vmatmul.mubr.msk.f32.vlgmr.msra.gmra.mrb[56].mxu0 %vm11697_vm12, %v11657_v59 }
 0x440   : > { %21449 = vmatpush3.bf16.msk.msra.mxu0 %vm24287_vm3, %v24336_v36  ;;  %21455 = vmatpush3.bf16.msk.msra.mxu1 %vm24287_vm3, %v24303_v25 }
 0x441   : > { %21458 = vmatprep.subr.msk.bf16.mxu0 %vm24287_vm3, %v24341_v16  ;;  %21464 = vmatprep.subr.msk.bf16.mxu1 %vm24287_vm3, %v24314_v23 }
 0x442   : > { %20842 = vmatprep.mubr.msk.f32.mxu0 %vm11697_vm12, %v11658_v55  ;;  %20849 = vmatprep.mubr.msk.f32.mxu1 %vm11697_vm12, %v11658_v55 }
 0x443   : > { %20843 = vmatmul.mubr.msk.f32.vlgmr.msra.gmra.mrb[52].mxu0 %vm11697_vm12, %v11659_v45  ;;  %20850 = vmatmul.mubr.msk.f32.vlgmr.msra.gmra.mrb[14].mxu1 %vm11697_vm12, %v11659_v45 }
 0x444   : > { %21461 = vmatpush3.bf16.msk.msra.mxu0 %vm24287_vm3, %v24341_v16  ;;  %21467 = vmatpush3.bf16.msk.msra.mxu1 %vm24287_vm3, %v24314_v23 }
 0x445   : > { %21470 = vmatprep.subr.msk.bf16.mxu0 %vm24287_vm3, %v21468_v18  ;;  %21482 = vmatprep.subr.msk.bf16.mxu1 %vm24287_vm3, %v24376_v60 }
 0x446   : > { %20856 = vmatprep.mubr.msk.f32.mxu0 %vm11697_vm12, %v11658_v55  ;;  %20863 = vmatprep.mubr.msk.f32.mxu1 %vm11697_vm12, %v11658_v55 }
 0x447   : > { %20857 = vmatmul.mubr.msk.f32.vlgmr.msra.gmra.mrb[54].mxu0 %vm11697_vm12, %v11659_v45  ;;  %20864 = vmatmul.mubr.msk.f32.vlgmr.msra.gmra.mrb[16].mxu1 %vm11697_vm12, %v11659_v45 }
 0x448   : > { %21473 = vmatpush3.bf16.msk.msra.mxu0 %vm24287_vm3, %v21468_v18  ;;  %21485 = vmatpush3.bf16.msk.msra.mxu1 %vm24287_vm3, %v24376_v60 }
 0x449   : > { %21476 = vmatprep.subr.msk.bf16.mxu0 %vm24287_vm3, %v24401_v44  ;;  %21494 = vmatprep.subr.msk.bf16.mxu1 %vm24287_vm3, %v24399_v38 }
 0x44a   : > { %20870 = vmatprep.mubr.msk.f32.mxu0 %vm11697_vm12, %v11658_v55  ;;  %20884 = vmatprep.mubr.msk.f32.mxu1 %vm11697_vm12, %v11660_v41 }
 0x44b   : > { %20871 = vmatmul.mubr.msk.f32.vlgmr.msra.gmra.mrb[56].mxu0 %vm11697_vm12, %v11659_v45  ;;  %20885 = vmatmul.mubr.msk.f32.vlgmr.msra.gmra.mrb[14].mxu1 %vm11697_vm12, %v11661_v11 }
 0x44c   : > { %21479 = vmatpush3.bf16.msk.msra.mxu0 %vm24287_vm3, %v24401_v44  ;;  %21497 = vmatpush3.bf16.msk.msra.mxu1 %vm24287_vm3, %v24399_v38 }
 0x44d   : > { %21488 = vmatprep.subr.msk.bf16.mxu0 %vm24287_vm3, %v24419_v50  ;;  %21512 = vmatprep.subr.msk.bf16.mxu1 %vm24287_vm3, %v24237_v15 }
 0x44e   : > { %20877 = vmatprep.mubr.msk.f32.mxu0 %vm11697_vm12, %v11660_v41  ;;  %20898 = vmatprep.mubr.msk.f32.mxu1 %vm11697_vm12, %v11660_v41 }
 0x44f   : > { %20878 = vmatmul.mubr.msk.f32.vlgmr.msra.gmra.mrb[52].mxu0 %vm11697_vm12, %v11661_v11  ;;  %20899 = vmatmul.mubr.msk.f32.vlgmr.msra.gmra.mrb[16].mxu1 %vm11697_vm12, %v11661_v11 }
 0x450   : > { %21491 = vmatpush3.bf16.msk.msra.mxu0 %vm24287_vm3, %v24419_v50  ;;  %21515 = vmatpush3.bf16.msk.msra.mxu1 %vm24287_vm3, %v24237_v15  ;;  %v11664_v15 = vld [vmem:[%s25172_s2 + $0x70] sm:$0xff] }
 0x451   : > { %21500 = vmatprep.subr.msk.bf16.mxu0 %vm24287_vm3, %v21498_v0  ;;  %21524 = vmatprep.subr.msk.bf16.mxu1 %vm24287_vm3, %v24256_v53 }
 0x452   : > { %20891 = vmatprep.mubr.msk.f32.mxu0 %vm11697_vm12, %v11660_v41  ;;  %20919 = vmatprep.mubr.msk.f32.mxu1 %vm11697_vm12, %v11662_v13 }
 0x453   : > { %20892 = vmatmul.mubr.msk.f32.vlgmr.msra.gmra.mrb[54].mxu0 %vm11697_vm12, %v11661_v11  ;;  %20920 = vmatmul.mubr.msk.f32.vlgmr.msra.gmra.mrb[14].mxu1 %vm11697_vm12, %v11663_v19 }
 0x454   : > { %21503 = vmatpush3.bf16.msk.msra.mxu0 %vm24287_vm3, %v21498_v0  ;;  %21527 = vmatpush3.bf16.msk.msra.mxu1 %vm24287_vm3, %v24256_v53  ;;  %v11665_v53 = vld [vmem:[%s25172_s2 + $0x78] sm:$0xff] }
 0x455   : > { %21506 = vmatprep.subr.msk.bf16.mxu0 %vm24287_vm3, %v24230_v12  ;;  %21542 = vmatprep.subr.msk.bf16.mxu1 %vm24287_vm3, %v24341_v16 }
 0x456   : > { %20905 = vmatprep.mubr.msk.f32.mxu0 %vm11697_vm12, %v11660_v41  ;;  %20933 = vmatprep.mubr.msk.f32.mxu1 %vm11697_vm12, %v11662_v13 }
 0x457   : > { %20906 = vmatmul.mubr.msk.f32.vlgmr.msra.gmra.mrb[56].mxu0 %vm11697_vm12, %v11661_v11  ;;  %20934 = vmatmul.mubr.msk.f32.vlgmr.msra.gmra.mrb[16].mxu1 %vm11697_vm12, %v11663_v19 }
 0x458   : > { %21509 = vmatpush3.bf16.msk.msra.mxu0 %vm24287_vm3, %v24230_v12  ;;  %21545 = vmatpush3.bf16.msk.msra.mxu1 %vm24287_vm3, %v24341_v16  ;;  %v11666_v12 = vld [vmem:[%s25172_s2 + $0x80] sm:$0xff] }
 0x459   : > { %21518 = vmatprep.subr.msk.bf16.mxu0 %vm24287_vm3, %v24248_v39  ;;  %21554 = vmatprep.subr.msk.bf16.mxu1 %vm24287_vm3, %v21468_v18 }
 0x45a   : > { %20912 = vmatprep.mubr.msk.f32.mxu0 %vm11697_vm12, %v11662_v13  ;;  %20954 = vmatprep.mubr.msk.f32.mxu1 %vm11697_vm12, %v11664_v15 }
 0x45b   : > { %20913 = vmatmul.mubr.msk.f32.vlgmr.msra.gmra.mrb[52].mxu0 %vm11697_vm12, %v11663_v19  ;;  %20955 = vmatmul.mubr.msk.f32.vlgmr.msra.gmra.mrb[14].mxu1 %vm11697_vm12, %v11665_v53 }
 0x45c   : > { %21521 = vmatpush3.bf16.msk.msra.mxu0 %vm24287_vm3, %v24248_v39  ;;  %21557 = vmatpush3.bf16.msk.msra.mxu1 %vm24287_vm3, %v21468_v18  ;;  %v22247_v39 = vpop.permute.xlu0 %22246 }
 0x45d   : > { %21530 = vmatprep.subr.msk.bf16.mxu0 %vm24287_vm3, %v24264_v56  ;;  %21572 = vmatprep.subr.msk.bf16.mxu1 %vm24287_vm3, %v24419_v50  ;;  %v22248_v26 = vunpack.i.l.bf16 %v22247_v39 }
 0x45e   : > { %20926 = vmatprep.mubr.msk.f32.mxu0 %vm11697_vm12, %v11662_v13  ;;  %20968 = vmatprep.mubr.msk.f32.mxu1 %vm11697_vm12, %v11664_v15 }
 0x45f   : > { %20927 = vmatmul.mubr.msk.f32.vlgmr.msra.gmra.mrb[54].mxu0 %vm11697_vm12, %v11663_v19  ;;  %20969 = vmatmul.mubr.msk.f32.vlgmr.msra.gmra.mrb[16].mxu1 %vm11697_vm12, %v11665_v53 }
 0x460   : > { %21533 = vmatpush3.bf16.msk.msra.mxu0 %vm24287_vm3, %v24264_v56  ;;  %21575 = vmatpush3.bf16.msk.msra.mxu1 %vm24287_vm3, %v24419_v50  ;;  %v22249_v56 = vunpack.i.h.bf16 %v22247_v39  ;;  %v15458_v31 = vpop.permute.xlu0 %15457 }
 0x461   : > { %21536 = vmatprep.subr.msk.bf16.mxu0 %vm24287_vm3, %v24303_v25  ;;  %21584 = vmatprep.subr.msk.bf16.mxu1 %vm24287_vm3, %v21498_v0 }
 0x462   : > { %20940 = vmatprep.mubr.msk.f32.mxu0 %vm11697_vm12, %v11662_v13  ;;  %20989 = vmatprep.mubr.msk.f32.mxu1 %vm11697_vm12, %v11666_v12  ;;  %v21558_v35 = vpack.c.bf16 %v22249_v56, %v22248_v26  ;;  %v24728_v26 = vld [vmem:[%s25173_s3 + $0x8] sm:$0xff] }
 0x463   : > { %20941 = vmatmul.mubr.msk.f32.vlgmr.msra.gmra.mrb[56].mxu0 %vm11697_vm12, %v11663_v19  ;;  %20990 = vmatmul.mubr.msk.f32.vlgmr.msra.gmra.mrb[14].mxu1 %vm11697_vm12, %v11667_v22 }
 0x464   : > { %21539 = vmatpush3.bf16.msk.msra.mxu0 %vm24287_vm3, %v24303_v25  ;;  %21587 = vmatpush3.bf16.msk.msra.mxu1 %vm24287_vm3, %v21498_v0  ;;  %v22252_v25 = vpop.permute.xlu1 %22251  ;;  %v15491_v34 = vpop.permute.xlu0 %15490 }
 0x465   : > { %21548 = vmatprep.subr.msk.bf16.mxu0 %vm24287_vm3, %v24314_v23  ;;  %20947 = vmatprep.mubr.msk.f32.mxu0 %vm11697_vm12, %v11664_v15  ;;  %v22254_v9 = vunpack.i.h.bf16 %v22252_v25  ;;  %v22253_v7 = vunpack.i.l.bf16 %v22252_v25  ;;  %v24735_v25 = vld [vmem:[%s25173_s3 + $0x10] sm:$0xff] }
 0x466   : > { %21003 = vmatprep.mubr.msk.f32.mxu1 %vm11697_vm12, %v11666_v12 }
 0x467   : > { %20948 = vmatmul.mubr.msk.f32.vlgmr.msra.gmra.mrb[52].mxu0 %vm11697_vm12, %v11665_v53  ;;  %21004 = vmatmul.mubr.msk.f32.vlgmr.msra.gmra.mrb[16].mxu1 %vm11697_vm12, %v11667_v22  ;;  %v21588_v29 = vpack.c.bf16 %v22254_v9, %v22253_v7  ;;  %v24744_v9 = vld [vmem:[%s25173_s3 + $0x20] sm:$0xff]  ;;  %v24751_v7 = vld [vmem:[%s25173_s3 + $0x18] sm:$0xff] }
 0x468   : > { %21551 = vmatpush3.bf16.msk.msra.mxu0 %vm24287_vm3, %v24314_v23  ;;  %20961 = vmatprep.mubr.msk.f32.mxu0 %vm11697_vm12, %v11664_v15  ;;  %v24708_v23 = vld [vmem:[%s25173_s3] sm:$0xff]  ;;  %v15463_v32 = vpop.permute.xlu1 %15462 }
 0x469   : > { %21560 = vmatprep.subr.msk.bf16.mxu0 %vm24287_vm3, %v21558_v35  ;;  %21067 = vmatprep.mubr.msk.f32.mxu1 %vm15561_vm2, %v24708_v23 }
 0x46b   : > { %20962 = vmatmul.mubr.msk.f32.vlgmr.msra.gmra.mrb[54].mxu0 %vm11697_vm12, %v11665_v53 }
 0x46c   : > { %21563 = vmatpush3.bf16.msk.msra.mxu0 %vm24287_vm3, %v21558_v35  ;;  %20975 = vmatprep.mubr.msk.f32.mxu0 %vm11697_vm12, %v11664_v15  ;;  %v15487_v57 = vpop.permute.xlu1 %15486 }
 0x46d   : > { %21566 = vmatprep.subr.msk.bf16.mxu0 %vm24287_vm3, %v24376_v60 }
 0x46f   : > { %20976 = vmatmul.mubr.msk.f32.vlgmr.msra.gmra.mrb[56].mxu0 %vm11697_vm12, %v11665_v53 }
 0x470   : > { %21569 = vmatpush3.bf16.msk.msra.mxu0 %vm24287_vm3, %v24376_v60  ;;  %20982 = vmatprep.mubr.msk.f32.mxu0 %vm11697_vm12, %v11666_v12 }
 0x471   : > { %21578 = vmatprep.subr.msk.bf16.mxu0 %vm24287_vm3, %v24399_v38 }
 0x473   : > { %20983 = vmatmul.mubr.msk.f32.vlgmr.msra.gmra.mrb[52].mxu0 %vm11697_vm12, %v11667_v22 }
 0x474   : > { %21581 = vmatpush3.bf16.msk.msra.mxu0 %vm24287_vm3, %v24399_v38  ;;  %20996 = vmatprep.mubr.msk.f32.mxu0 %vm11697_vm12, %v11666_v12 }
 0x475   : > { %21590 = vmatprep.subr.msk.bf16.mxu0 %vm24287_vm3, %v21588_v29 }
 0x477   : > { %20997 = vmatmul.mubr.msk.f32.vlgmr.msra.gmra.mrb[54].mxu0 %vm11697_vm12, %v11667_v22 }
 0x478   : > { %21593 = vmatpush3.bf16.msk.msra.mxu0 %vm24287_vm3, %v21588_v29  ;;  %21010 = vmatprep.mubr.msk.f32.mxu0 %vm11697_vm12, %v11666_v12  ;;  %v15525_v29 = vld [vmem:[%s25173_s3 + $0x40] sm:$0xff] }
 0x47b   : > { %21011 = vmatmul.mubr.msk.f32.vlgmr.msra.gmra.mrb[56].mxu0 %vm11697_vm12, %v11667_v22 }
 0x47c   : > { %21017 = vmatprep.mubr.msk.f32.mxu0 %vm15561_vm2, %v24744_v9 }
 0x536   : > { %v20991_v40 = vpop.f32.mrb[14].mxu1 }
 0x537   : > { %v15468_v17 = vadd.f32 %v20991_v40, %v15463_v32  ;;  %v15204_v14 = vpop.f32.mrb[15].mxu1 }
 0x538   : > { %v15467_v63 = vadd.f32 %v15458_v31, %v15204_v14 }
 0x539   : > { %vm15478_vm10 = vcmp.gt.f32.partialorder %v15468_v17, 0.0  ;;  %v15496_v20 = vmul.f32 %v15491_v34, %v15468_v17 }
 0x53a   : > { %vm15477_vm11 = vcmp.gt.f32.partialorder %v15467_v63, 0.0  ;;  %v15495_v30 = vmul.f32 %v15487_v57, %v15467_v63  ;;  %v21005_v36 = vpop.f32.mrb[16].mxu1 }
 0x53b   : > { %v15472_v37 = vadd.f32 %v21005_v36, %v15463_v32  ;;  %v15354_v21 = vpop.f32.mrb[17].mxu1  ;;  %v15506_v16 = vsel %vm15478_vm10, %v15468_v17, %v15496_v20  ;;  %v15526_v36 = vld [vmem:[%s25173_s3 + $0x48] sm:$0xff] }
 0x53c   : > { %v15471_v8 = vadd.f32 %v15458_v31, %v15354_v21  ;;  %v15505_v58 = vsel %vm15477_vm11, %v15467_v63, %v15495_v30  ;;  %v15527_v21 = vld [vmem:[%s25173_s3 + $0x50] sm:$0xff] }
 0x53d   : > { %vm15482_vm14 = vcmp.gt.f32.partialorder %v15472_v37, 0.0  ;;  %v15500_v42 = vmul.f32 %v15491_v34, %v15472_v37  ;;  %v22264_v10 = vpack.i.bf16 %v15506_v16, %v15505_v58  ;;  %v24712_v62 = vpack.c.bf16 %v15506_v16, %v15505_v58  ;;  %v15528_v58 = vld [vmem:[%s25173_s3 + $0x58] sm:$0xff] }
 0x53e   : > { %vm15481_vm15 = vcmp.gt.f32.partialorder %v15471_v8, 0.0  ;;  %v15499_v27 = vmul.f32 %v15487_v57, %v15471_v8 }
 0x53f   : > { %v15510_v60 = vsel %vm15482_vm14, %v15472_v37, %v15500_v42  ;;  %vm18202_vm14 = vcmask 261120  }
 0x540   : > { %v15509_v33 = vsel %vm15481_vm15, %v15471_v8, %v15499_v27 }
 0x541   : > { %v24714_v54 = vpack.c.bf16 %v15510_v60, %v15509_v33  ;;  %v22284_v24 = vpack.i.bf16 %v15510_v60, %v15509_v33 }
 0x546   : > { %v20984_v28 = vpop.f32.mrb[52].mxu0 }
 0x547   : > { %v15466_v1 = vadd.f32 %v20984_v28, %v15463_v32  ;;  %v15129_v38 = vpop.f32.mrb[53].mxu0 }
 0x548   : > { %v15465_v44 = vadd.f32 %v15458_v31, %v15129_v38 }
 0x549   : > { %vm15476_vm0 = vcmp.gt.f32.partialorder %v15466_v1, 0.0  ;;  %v15494_v48 = vmul.f32 %v15491_v34, %v15466_v1 }
 0x54a   : > { %vm15475_vm4 = vcmp.gt.f32.partialorder %v15465_v44, 0.0  ;;  %v15493_v49 = vmul.f32 %v15487_v57, %v15465_v44  ;;  %v20998_v50 = vpop.f32.mrb[54].mxu0 }
 0x54b   : > { %v15504_v51 = vsel %vm15476_vm0, %v15466_v1, %v15494_v48  ;;  %v15470_v59 = vadd.f32 %v20998_v50, %v15463_v32  ;;  %v15279_v52 = vpop.f32.mrb[55].mxu0 }
 0x54c   : > { %v15503_v61 = vsel %vm15475_vm4, %v15465_v44, %v15493_v49  ;;  %v15469_v2 = vadd.f32 %v15458_v31, %v15279_v52  ;;  %v15522_v49 = vld [vmem:[%s25173_s3 + $0x28] sm:$0xff]  ;;  %v15529_v52 = vld [vmem:[%s25173_s3 + $0x60] sm:$0xff] }
 0x54d   : > { %vm15480_vm5 = vcmp.gt.f32.partialorder %v15470_v59, 0.0  ;;  %v15498_v55 = vmul.f32 %v15491_v34, %v15470_v59  ;;  %v22259_v45 = vpack.i.bf16 %v15504_v51, %v15503_v61  ;;  %v24716_v18 = vpack.c.bf16 %v15504_v51, %v15503_v61  ;;  %v15523_v51 = vld [vmem:[%s25173_s3 + $0x30] sm:$0xff]  ;;  %v15530_v61 = vld [vmem:[%s25173_s3 + $0x68] sm:$0xff] }
 0x54e   : > { %vm15479_vm6 = vcmp.gt.f32.partialorder %v15469_v2, 0.0  ;;  %v15497_v41 = vmul.f32 %v15487_v57, %v15469_v2  ;;  %v21012_v4 = vpop.f32.mrb[56].mxu0 }
 0x54f   : > { %v15508_v11 = vsel %vm15480_vm5, %v15470_v59, %v15498_v55  ;;  %v15474_v6 = vadd.f32 %v21012_v4, %v15463_v32  ;;  %22260 = vrot.lane.b32.xlu1 %v22259_v45, %s22400_s21  ;;  %v15436_v46 = vpop.f32.mrb[57].mxu0  ;;  %v15524_v59 = vld [vmem:[%s25173_s3 + $0x38] sm:$0xff] }
 0x550   : > { %v15507_v0 = vsel %vm15479_vm6, %v15469_v2, %v15497_v41  ;;  %v15473_v13 = vadd.f32 %v15458_v31, %v15436_v46  ;;  %v15531_v2 = vld [vmem:[%s25173_s3 + $0x70] sm:$0xff]  ;;  %v15532_v55 = vld [vmem:[%s25173_s3 + $0x78] sm:$0xff]  ;;  %v22412_v41 = vmov 5  }
 0x551   : > { %v24719_v19 = vpack.c.bf16 %v15508_v11, %v15507_v0  ;;  %vm15484_vm7 = vcmp.gt.f32.partialorder %v15474_v6, 0.0  ;;  %v15502_v15 = vmul.f32 %v15491_v34, %v15474_v6  ;;  %v22269_v53 = vpack.i.bf16 %v15508_v11, %v15507_v0 }
 0x552   : > { %vm15483_vm9 = vcmp.gt.f32.partialorder %v15473_v13, 0.0  ;;  %v15501_v12 = vmul.f32 %v15487_v57, %v15473_v13 }
 0x553   : > { %v15512_v39 = vsel %vm15484_vm7, %v15474_v6, %v15502_v15  ;;  %22265 = vrot.lane.b32.xlu1 %v22264_v10, %s22400_s21  ;;  %22270 = vrot.lane.b32.xlu0 %v22269_v53, %s22400_s21  ;;  %v15535_v6 = vld [vmem:[%s25173_s3 + $0x90] sm:$0xff] }
 0x554   : > { %v15511_v22 = vsel %vm15483_vm9, %v15473_v13, %v15501_v12  ;;  %21615 = vmatprep.subr.bf16.mxu1 %v24719_v19  ;;  %v15537_v13 = vld [vmem:[%s25173_s3 + $0xa0] sm:$0xff]  ;;  %v15538_v12 = vld [vmem:[%s25173_s3 + $0xa8] sm:$0xff]  ;;  %vm18473_vm9 = vcmask 19456  }
 0x555   : > { %21617 = vmatpush3.bf16.msra.mxu1 %v24719_v19  ;;  %v22299_v56 = vpack.i.bf16 %v15512_v39, %v15511_v22  ;;  %v24730_v35 = vpack.c.bf16 %v15512_v39, %v15511_v22  ;;  %v15539_v39 = vld [vmem:[%s25173_s3 + $0xb0] sm:$0xff] }
 0x557   : > { %22275 = vrot.lane.b32.xlu1 %v22264_v10, %s22399_s20  ;;  %22280 = vrot.lane.b32.xlu0 %v22269_v53, %s22399_s20 }
 0x558   : > { %21068 = vmatmul.mubr.msk.f32.vlgmr.msra.gmra.mrb[18].mxu1 %vm15561_vm2, %v24728_v26 }
 0x559   : > { %21070 = vmatprep.mubr.msk.f32.mxu1 %vm15561_vm2, %v24735_v25 }
 0x55b   : > { %22285 = vrot.lane.b32.xlu1 %v22284_v24, %s22399_s20  ;;  %22290 = vrot.lane.b32.xlu0 %v22284_v24, %s22400_s21 }
 0x55c   : > { %21071 = vmatmul.mubr.msk.f32.gmra.mrb[20].mxu1 %vm15561_vm2, %v24751_v7 }
 0x55d   : > { %21077 = vmatprep.mubr.msk.f32.mxu1 %vm15561_vm2, %v15525_v29 }
 0x55f   : > { %22295 = vrot.lane.b32.xlu1 %v22259_v45, %s22399_s20  ;;  %22300 = vrot.lane.b32.xlu0 %v22299_v56, %s22399_s20  ;;  %v22411_v45 = vmov 4  }
 0x560   : > { %22310 = vset.pattern.permute.xlu1 %v22411_v45  ;;  %22309 = vset.pattern.permute.xlu0 %v22411_v45 }
 0x563   : > { %22305 = vrot.lane.b32.xlu1 %v22299_v56, %s22400_s21  ;;  %18113 = vperm.xlu0 %22309, %v24277_v5   ;;  %v15540_v56 = vld [vmem:[%s25173_s3 + $0xb8] sm:$0xff]  ;;  %s22122_s21 = smul.u32 12, %s22507_s13  ;;  %s277_s13 = sand.u32 1, %s22388_s25  }
 0x564   : > { %s22120_s16 = smul.u32 6, %s277_s13  ;;  %s25129_s8 = scalar_lea.sflag [#allocation3], %s277_s13 }
 0x565   : > { %s25109_s15 = scalar_lea.vmem %s25176_s6, %s22122_s21  ;;  %s22338_s21 = sshll.u32 %s22414_s28, 4  ;;  %s22339_s21 = int_to_ptr.vmem [resolvable:$false] %s22338_s21 }
 0x566   : > { %s279_s17 = scalar_lea.vmem [#allocation2], %s22120_s16  ;;  %s22340_s9 = scalar_lea.vmem %s22339_s21, 192 }
 0x567   : > { %18118 = vperm.xlu1 %22310, %v24282_v3   ;;  %22312 = vset.pattern.permute.xlu0 %v22412_v41  ;;  %s18503_s19 = sshll.u32 %s279_s17, 4  ;;  %s25127_s19 = int_to_ptr.vmem [resolvable:$true] %s18503_s19 }
 0x568   : > { %18160 = vperm.xlu0 %22312, %v24282_v3   ;;  %v15515_v3 = vld [vmem:[%s25175_s5 + $0x10] sm:$0xff]  ;;  %s22334_s20 = scalar_lea.vmem %s25127_s19, 96  ;;  %p22341_p0 = scmp.lt.s32.totalorder %s25127_s19, %s22339_s21 }
 0x569   : > { %p22335_p11 = scmp.ne.s32.totalorder %s25127_s19, %s22334_s20  ;;  %p22342_p1 = scmp.lt.s32.totalorder %s22340_s9, %s22334_s20 }
 0x56b   : > { %22311 = vset.pattern.permute.xlu1 %v22412_v41  ;;  %p22336_p12 = pnand %p22335_p11, %p22495_p5  ;;  %p22343_p2 = por %p22342_p1, %p22341_p0 }
 0x56c   : > { %18156 = vperm.xlu1 %22311, %v24277_v5   ;;  %v15536_v5 = vld [vmem:[%s25173_s3 + $0x98] sm:$0xff]  ;;  %18164 = vperm.xlu0 %22312, %v15515_v3  }
 0x56d   : > { %p22337_p13 = pneg %p22336_p12 }
 0x56f   : > { %p22344_p3 = pnand %p22343_p2, %p22337_p13 }
 0x570   : > { %22313 = vset.pattern.permute.xlu1 %v22411_v45 }
 0x571   : > { %18123 = vperm.xlu1 %22313, %v15515_v3  }
 0x5c1   : > { %v22261_v31 = vpop.permute.xlu1 %22260 }
 0x5c2   : > { %v22263_v32 = vunpack.i.h.bf16 %v22261_v31  ;;  %v22262_v40 = vunpack.i.l.bf16 %v22261_v31  ;;  %v15546_v31 = vld [vmem:[%s25173_s3 + $0xe8] sm:$0xff] }
 0x5c4   : > { %v21618_v34 = vpack.c.bf16 %v22263_v32, %v22262_v40  ;;  %v15547_v32 = vld [vmem:[%s25173_s3 + $0xf0] sm:$0xff] }
 0x5c5   : > { %v22266_v17 = vpop.permute.xlu1 %22265  ;;  %v22271_v14 = vpop.permute.xlu0 %22270 }
 0x5c6   : > { %v22268_v57 = vunpack.i.h.bf16 %v22266_v17  ;;  %v22267_v63 = vunpack.i.l.bf16 %v22266_v17  ;;  %v22273_v20 = vunpack.i.h.bf16 %v22271_v14  ;;  %v22272_v30 = vunpack.i.l.bf16 %v22271_v14  ;;  %21619 = vmatprep.subr.bf16.mxu1 %v21618_v34  ;;  %v15549_v14 = vld [vmem:[%s25173_s3 + $0x100] sm:$0xff] }
 0x5c7   : > { %21621 = vmatpush3.bf16.msra.mxu1 %v21618_v34  ;;  %v15548_v34 = vld [vmem:[%s25173_s3 + $0xf8] sm:$0xff] }
 0x5c8   : > { %v24769_v37 = vpack.c.bf16 %v22268_v57, %v22267_v63  ;;  %v24774_v8 = vpack.c.bf16 %v22273_v20, %v22272_v30  ;;  %v15550_v20 = vld [vmem:[%s25173_s3 + $0x108] sm:$0xff]  ;;  %v15551_v30 = vld [vmem:[%s25173_s3 + $0x110] sm:$0xff] }
 0x5c9   : > { %v22276_v16 = vpop.permute.xlu1 %22275  ;;  %v22281_v28 = vpop.permute.xlu0 %22280 }
 0x5ca   : > { %21078 = vmatmul.mubr.msk.f32.vlgmr.msra.gmra.mrb[22].mxu1 %vm15561_vm2, %v15526_v36  ;;  %21623 = vmatprep.subr.bf16.mxu1 %v24769_v37  ;;  %v22278_v27 = vunpack.i.h.bf16 %v22276_v16  ;;  %v22277_v60 = vunpack.i.l.bf16 %v22276_v16  ;;  %v22283_v44 = vunpack.i.h.bf16 %v22281_v28  ;;  %v22282_v48 = vunpack.i.l.bf16 %v22281_v28  ;;  %v18196_v28 = vld [vmem:[%s25175_s5] sm:$0x3f] }
 0x5cb   : > { %21625 = vmatpush3.bf16.msra.mxu1 %v24769_v37  ;;  %21080 = vmatprep.mubr.msk.f32.mxu1 %vm15561_vm2, %v15527_v21 }
 0x5cc   : > { %21627 = vmatprep.subr.bf16.mxu1 %v24774_v8  ;;  %v21598_v38 = vpack.c.bf16 %v22278_v27, %v22277_v60  ;;  %v24797_v50 = vpack.c.bf16 %v22283_v44, %v22282_v48 }
 0x5cd   : > { %v24784_v42 = vpop.permute.xlu1 %22285  ;;  %v22291_v0 = vpop.permute.xlu0 %22290 }
 0x5ce   : > { %21081 = vmatmul.mubr.msk.f32.gmra.mrb[24].mxu1 %vm15561_vm2, %v15528_v58  ;;  %v22288_v4 = vunpack.i.h.bf16 %v24784_v42  ;;  %v22287_v11 = vunpack.i.l.bf16 %v24784_v42  ;;  %v22293_v15 = vunpack.i.h.bf16 %v22291_v0  ;;  %v22292_v53 = vunpack.i.l.bf16 %v22291_v0 }
 0x5cf   : > { %21087 = vmatprep.mubr.msk.f32.mxu1 %vm15561_vm2, %v15525_v29 }
 0x5d0   : > { %v24884_v46 = vpack.c.bf16 %v22288_v4, %v22287_v11  ;;  %v24930_v22 = vpack.c.bf16 %v22293_v15, %v22292_v53 }
 0x5d1   : > { %v22296_v10 = vpop.permute.xlu1 %22295 }
 0x5d2   : > { %v22298_v33 = vunpack.i.h.bf16 %v22296_v10  ;;  %v22297_v24 = vunpack.i.l.bf16 %v22296_v10  ;;  %21088 = vmatmul.mubr.msk.f32.vlgmr.msra.gmra.mrb[26].mxu1 %vm15561_vm2, %v15526_v36 }
 0x5d3   : > { %21629 = vmatpush3.bf16.msra.mxu1 %v24774_v8  ;;  %21090 = vmatprep.mubr.msk.f32.mxu1 %vm15561_vm2, %v15527_v21 }
 0x5d4   : > { %v21594_v1 = vpack.c.bf16 %v22298_v33, %v22297_v24  ;;  %21631 = vmatprep.subr.bf16.mxu1 %v24712_v62 }
 0x5d5   : > { %v22306_v17 = vpop.permute.xlu1 %22305 }
 0x5d6   : > { %21595 = vmatprep.subr.bf16.mxu0 %v21594_v1  ;;  %21091 = vmatmul.mubr.msk.f32.gmra.mrb[28].mxu1 %vm15561_vm2, %v15528_v58  ;;  %v22308_v57 = vunpack.i.h.bf16 %v22306_v17  ;;  %v22307_v63 = vunpack.i.l.bf16 %v22306_v17 }
 0x5d7   : > { %21597 = vmatpush3.bf16.msra.mxu0 %v21594_v1  ;;  %21097 = vmatprep.mubr.msk.f32.mxu1 %vm15561_vm2, %v15525_v29  ;;  %v22413_v1 = vmov 6  }
 0x5d8   : > { %21599 = vmatprep.subr.bf16.mxu0 %v21598_v38  ;;  %22315 = vset.pattern.permute.xlu0 %v22413_v1 }
 0x5d9   : > { %18199 = vperm.xlu0 %22315, %v18196_v28  }
 0x5da   : > { %21018 = vmatmul.mubr.msk.f32.vlgmr.msra.gmra.mrb[58].mxu0 %vm15561_vm2, %v15522_v49  ;;  %21098 = vmatmul.mubr.msk.f32.vlgmr.msra.gmra.mrb[18].mxu1 %vm15561_vm2, %v15526_v36  ;;  %v21698_v36 = vpack.c.bf16 %v22308_v57, %v22307_v63 }
 0x5db   : > { %21633 = vmatpush3.bf16.msra.mxu1 %v24712_v62  ;;  %21601 = vmatpush3.bf16.msra.mxu0 %v21598_v38 }
 0x5dc   : > { %21635 = vmatprep.subr.bf16.mxu1 %v24719_v19  ;;  %21603 = vmatprep.subr.bf16.mxu0 %v24797_v50 }
 0x5dd   : > { %21020 = vmatprep.mubr.msk.f32.mxu0 %vm15561_vm2, %v15523_v51  ;;  %21100 = vmatprep.mubr.msk.f32.mxu1 %vm15561_vm2, %v15527_v21 }
 0x5de   : > { %21021 = vmatmul.mubr.msk.f32.gmra.mrb[60].mxu0 %vm15561_vm2, %v15524_v59  ;;  %21101 = vmatmul.mubr.msk.f32.gmra.mrb[20].mxu1 %vm15561_vm2, %v15528_v58 }
 0x5df   : > { %21027 = vmatprep.mubr.msk.f32.mxu0 %vm15561_vm2, %v24744_v9  ;;  %21107 = vmatprep.mubr.msk.f32.mxu1 %vm15561_vm2, %v15529_v52 }
 0x5e2   : > { %21028 = vmatmul.mubr.msk.f32.vlgmr.msra.gmra.mrb[62].mxu0 %vm15561_vm2, %v15522_v49  ;;  %21108 = vmatmul.mubr.msk.f32.vlgmr.msra.gmra.mrb[22].mxu1 %vm15561_vm2, %v15530_v61 }
 0x5e3   : > { %21605 = vmatpush3.bf16.msra.mxu0 %v24797_v50  ;;  %21637 = vmatpush3.bf16.msra.mxu1 %v24719_v19 }
 0x5e4   : > { %21607 = vmatprep.subr.bf16.mxu0 %v24716_v18  ;;  %21639 = vmatprep.subr.bf16.mxu1 %v24714_v54 }
 0x5e5   : > { %21030 = vmatprep.mubr.msk.f32.mxu0 %vm15561_vm2, %v15523_v51  ;;  %21110 = vmatprep.mubr.msk.f32.mxu1 %vm15561_vm2, %v15531_v2 }
 0x5e6   : > { %21031 = vmatmul.mubr.msk.f32.gmra.mrb[64].mxu0 %vm15561_vm2, %v15524_v59  ;;  %21111 = vmatmul.mubr.msk.f32.gmra.mrb[24].mxu1 %vm15561_vm2, %v15532_v55  ;;  %v25046_v48 = vpop.permute.xlu1 %18118 }
 0x5e7   : > { %21037 = vmatprep.mubr.msk.f32.mxu0 %vm15561_vm2, %v24744_v9  ;;  %21117 = vmatprep.mubr.msk.f32.mxu1 %vm15561_vm2, %v15529_v52  ;;  %v15544_v9 = vld [vmem:[%s25173_s3 + $0xd8] sm:$0xff] }
 0x5ea   : > { %21038 = vmatmul.mubr.msk.f32.vlgmr.msra.gmra.mrb[66].mxu0 %vm15561_vm2, %v15522_v49  ;;  %21118 = vmatmul.mubr.msk.f32.vlgmr.msra.gmra.mrb[26].mxu1 %vm15561_vm2, %v15530_v61 }
 0x5eb   : > { %21609 = vmatpush3.bf16.msra.mxu0 %v24716_v18  ;;  %21641 = vmatpush3.bf16.msra.mxu1 %v24714_v54  ;;  %v15533_v18 = vld [vmem:[%s25173_s3 + $0x80] sm:$0xff]  ;;  %v25048_v49 = vpop.permute.xlu1 %18156 }
 0x5ec   : > { %21611 = vmatprep.subr.bf16.mxu0 %v24712_v62  ;;  %21643 = vmatprep.subr.bf16.mxu1 %v21598_v38 }
 0x5ed   : > { %21040 = vmatprep.mubr.msk.f32.mxu0 %vm15561_vm2, %v15523_v51  ;;  %21120 = vmatprep.mubr.msk.f32.mxu1 %vm15561_vm2, %v15531_v2 }
 0x5ee   : > { %21041 = vmatmul.mubr.msk.f32.gmra.mrb[68].mxu0 %vm15561_vm2, %v15524_v59  ;;  %21121 = vmatmul.mubr.msk.f32.gmra.mrb[28].mxu1 %vm15561_vm2, %v15532_v55 }
 0x5ef   : > { %21047 = vmatprep.mubr.msk.f32.mxu0 %vm15561_vm2, %v24708_v23  ;;  %21127 = vmatprep.mubr.msk.f32.mxu1 %vm15561_vm2, %v15529_v52 }
 0x5f2   : > { %21048 = vmatmul.mubr.msk.f32.vlgmr.msra.gmra.mrb[58].mxu0 %vm15561_vm2, %v24728_v26  ;;  %21128 = vmatmul.mubr.msk.f32.vlgmr.msra.gmra.mrb[18].mxu1 %vm15561_vm2, %v15530_v61 }
 0x5f3   : > { %21613 = vmatpush3.bf16.msra.mxu0 %v24712_v62  ;;  %21645 = vmatpush3.bf16.msra.mxu1 %v21598_v38  ;;  %v15534_v62 = vld [vmem:[%s25173_s3 + $0x88] sm:$0xff] }
 0x5f4   : > { %21647 = vmatprep.subr.bf16.mxu1 %v24797_v50  ;;  %21130 = vmatprep.mubr.msk.f32.mxu1 %vm15561_vm2, %v15531_v2 }
 0x5f5   : > { %21050 = vmatprep.mubr.msk.f32.mxu0 %vm15561_vm2, %v24735_v25  ;;  %21702 = vmatprep.subr.bf16.mxu0 %v22405_v47 }
 0x5f6   : > { %21131 = vmatmul.mubr.msk.f32.gmra.mrb[20].mxu1 %vm15561_vm2, %v15532_v55  ;;  %21051 = vmatmul.mubr.msk.f32.gmra.mrb[60].mxu0 %vm15561_vm2, %v24751_v7 }
 0x5f7   : > { %21137 = vmatprep.mubr.msk.f32.mxu1 %vm15561_vm2, %v15533_v18  ;;  %21057 = vmatprep.mubr.msk.f32.mxu0 %vm15561_vm2, %v24708_v23  ;;  %v15516_v23 = vld [vmem:[%s25175_s5 + $0x18] sm:$0xff] }
 0x5f8   : > { %18128 = vperm.xlu1 %22313, %v15516_v23  }
 0x5fa   : > { %21138 = vmatmul.mubr.msk.f32.vlgmr.msra.gmra.mrb[22].mxu1 %vm15561_vm2, %v15534_v62  ;;  %21058 = vmatmul.mubr.msk.f32.vlgmr.msra.gmra.mrb[62].mxu0 %vm15561_vm2, %v24728_v26  ;;  %v15541_v26 = vld [vmem:[%s25173_s3 + $0xc0] sm:$0xff] }
 0x5fb   : > { %21649 = vmatpush3.bf16.msra.mxu1 %v24797_v50  ;;  %21140 = vmatprep.mubr.msk.f32.mxu1 %vm15561_vm2, %v15535_v6 }
 0x5fc   : > { %21651 = vmatprep.subr.bf16.mxu1 %v24884_v46  ;;  %21060 = vmatprep.mubr.msk.f32.mxu0 %vm15561_vm2, %v24735_v25  ;;  %v15542_v25 = vld [vmem:[%s25173_s3 + $0xc8] sm:$0xff] }
 0x5fd   : > { %22314 = vset.pattern.permute.xlu1 %v22412_v41 }
 0x5fe   : > { %21141 = vmatmul.mubr.msk.f32.gmra.mrb[24].mxu1 %vm15561_vm2, %v15536_v5  ;;  %21061 = vmatmul.mubr.msk.f32.gmra.mrb[64].mxu0 %vm15561_vm2, %v24751_v7 }
 0x5ff   : > { %21147 = vmatprep.mubr.msk.f32.mxu1 %vm15561_vm2, %v15533_v18  ;;  %21291 = vmatprep.mubr.msk.f32.mxu0 %vm22406_vm8, %v22403_v43 }
 0x600   : > { %18168 = vperm.xlu1 %22314, %v15516_v23  }
 0x602   : > { %21148 = vmatmul.mubr.msk.f32.vlgmr.msra.gmra.mrb[26].mxu1 %vm15561_vm2, %v15534_v62 }
 0x603   : > { %21653 = vmatpush3.bf16.msra.mxu1 %v24884_v46  ;;  %21150 = vmatprep.mubr.msk.f32.mxu1 %vm15561_vm2, %v15535_v6 }
 0x604   : > { %21655 = vmatprep.subr.bf16.mxu1 %v24769_v37 }
 0x606   : > { %21151 = vmatmul.mubr.msk.f32.gmra.mrb[28].mxu1 %vm15561_vm2, %v15536_v5 }
 0x607   : > { %21157 = vmatprep.mubr.msk.f32.mxu1 %vm15561_vm2, %v15533_v18 }
 0x60a   : > { %21158 = vmatmul.mubr.msk.f32.vlgmr.msra.gmra.mrb[18].mxu1 %vm15561_vm2, %v15534_v62 }
 0x60b   : > { %21657 = vmatpush3.bf16.msra.mxu1 %v24769_v37  ;;  %21160 = vmatprep.mubr.msk.f32.mxu1 %vm15561_vm2, %v15535_v6  ;;  %v15552_v37 = vld [vmem:[%s25173_s3 + $0x118] sm:$0xff] }
 0x60c   : > { %21659 = vmatprep.subr.bf16.mxu1 %v24774_v8 }
 0x60e   : > { %21161 = vmatmul.mubr.msk.f32.gmra.mrb[20].mxu1 %vm15561_vm2, %v15536_v5 }
 0x60f   : > { %21167 = vmatprep.mubr.msk.f32.mxu1 %vm15561_vm2, %v15537_v13 }
 0x612   : > { %21168 = vmatmul.mubr.msk.f32.vlgmr.msra.gmra.mrb[22].mxu1 %vm15561_vm2, %v15538_v12 }
 0x613   : > { %21661 = vmatpush3.bf16.msra.mxu1 %v24774_v8  ;;  %21170 = vmatprep.mubr.msk.f32.mxu1 %vm15561_vm2, %v15539_v39 }
 0x614   : > { %21663 = vmatprep.subr.bf16.mxu1 %v24930_v22 }
 0x616   : > { %21171 = vmatmul.mubr.msk.f32.gmra.mrb[24].mxu1 %vm15561_vm2, %v15540_v56 }
 0x617   : > { %21177 = vmatprep.mubr.msk.f32.mxu1 %vm15561_vm2, %v15537_v13 }
 0x61a   : > { %21178 = vmatmul.mubr.msk.f32.vlgmr.msra.gmra.mrb[26].mxu1 %vm15561_vm2, %v15538_v12 }
 0x61b   : > { %21665 = vmatpush3.bf16.msra.mxu1 %v24930_v22  ;;  %21180 = vmatprep.mubr.msk.f32.mxu1 %vm15561_vm2, %v15539_v39 }
 0x61c   : > { %21667 = vmatprep.subr.bf16.mxu1 %v24719_v19 }
 0x61e   : > { %21181 = vmatmul.mubr.msk.f32.gmra.mrb[28].mxu1 %vm15561_vm2, %v15540_v56 }
 0x61f   : > { %21187 = vmatprep.mubr.msk.f32.mxu1 %vm15561_vm2, %v15537_v13 }
 0x622   : > { %21188 = vmatmul.mubr.msk.f32.vlgmr.msra.gmra.mrb[18].mxu1 %vm15561_vm2, %v15538_v12 }
 0x623   : > { %21669 = vmatpush3.bf16.msra.mxu1 %v24719_v19  ;;  %21190 = vmatprep.mubr.msk.f32.mxu1 %vm15561_vm2, %v15539_v39  ;;  %v15543_v19 = vld [vmem:[%s25173_s3 + $0xd0] sm:$0xff] }
 0x624   : > { %21671 = vmatprep.subr.bf16.mxu1 %v24714_v54 }
 0x626   : > { %21191 = vmatmul.mubr.msk.f32.gmra.mrb[20].mxu1 %vm15561_vm2, %v15540_v56 }
 0x627   : > { %21197 = vmatprep.mubr.msk.f32.mxu1 %vm15561_vm2, %v15541_v26 }
 0x62a   : > { %21198 = vmatmul.mubr.msk.f32.vlgmr.msra.gmra.mrb[22].mxu1 %vm15561_vm2, %v15542_v25 }
 0x62b   : > { %21673 = vmatpush3.bf16.msra.mxu1 %v24714_v54  ;;  %21200 = vmatprep.mubr.msk.f32.mxu1 %vm15561_vm2, %v15543_v19  ;;  %v22301_v54 = vpop.permute.xlu0 %22300 }
 0x62c   : > { %21675 = vmatprep.subr.bf16.mxu1 %v24730_v35  ;;  %v22303_v7 = vunpack.i.h.bf16 %v22301_v54  ;;  %v22302_v29 = vunpack.i.l.bf16 %v22301_v54 }
 0x62e   : > { %21201 = vmatmul.mubr.msk.f32.gmra.mrb[24].mxu1 %vm15561_vm2, %v15544_v9  ;;  %v21686_v40 = vpack.c.bf16 %v22303_v7, %v22302_v29 }
 0x62f   : > { %21207 = vmatprep.mubr.msk.f32.mxu1 %vm15561_vm2, %v15541_v26  ;;  %v25052_v51 = vpop.permute.xlu0 %18113 }
 0x632   : > { %21208 = vmatmul.mubr.msk.f32.vlgmr.msra.gmra.mrb[26].mxu1 %vm15561_vm2, %v15542_v25 }
 0x633   : > { %21677 = vmatpush3.bf16.msra.mxu1 %v24730_v35  ;;  %21210 = vmatprep.mubr.msk.f32.mxu1 %vm15561_vm2, %v15543_v19  ;;  %v15545_v35 = vld [vmem:[%s25173_s3 + $0xe0] sm:$0xff]  ;;  %v25057_v18 = vpop.permute.xlu0 %18160 }
 0x634   : > { %21679 = vmatprep.subr.bf16.mxu1 %v24797_v50 }
 0x636   : > { %21211 = vmatmul.mubr.msk.f32.gmra.mrb[28].mxu1 %vm15561_vm2, %v15544_v9 }
 0x637   : > { %21217 = vmatprep.mubr.msk.f32.mxu1 %vm15561_vm2, %v15541_v26 }
 0x63a   : > { %21218 = vmatmul.mubr.msk.f32.vlgmr.msra.gmra.mrb[18].mxu1 %vm15561_vm2, %v15542_v25 }
 0x63b   : > { %21681 = vmatpush3.bf16.msra.mxu1 %v24797_v50  ;;  %21220 = vmatprep.mubr.msk.f32.mxu1 %vm15561_vm2, %v15543_v19  ;;  %v25050_v50 = vpop.permute.xlu1 %18123 }
 0x63c   : > { %21683 = vmatprep.subr.bf16.mxu1 %v24884_v46 }
 0x63e   : > { %21221 = vmatmul.mubr.msk.f32.gmra.mrb[20].mxu1 %vm15561_vm2, %v15544_v9 }
 0x63f   : > { %21227 = vmatprep.mubr.msk.f32.mxu1 %vm15561_vm2, %v15545_v35 }
 0x642   : > { %21228 = vmatmul.mubr.msk.f32.vlgmr.msra.gmra.mrb[22].mxu1 %vm15561_vm2, %v15546_v31 }
 0x643   : > { %21685 = vmatpush3.bf16.msra.mxu1 %v24884_v46  ;;  %21230 = vmatprep.mubr.msk.f32.mxu1 %vm15561_vm2, %v15547_v32 }
 0x644   : > { %21687 = vmatprep.subr.bf16.mxu1 %v21686_v40 }
 0x646   : > { %21231 = vmatmul.mubr.msk.f32.gmra.mrb[24].mxu1 %vm15561_vm2, %v15548_v34 }
 0x647   : > { %21237 = vmatprep.mubr.msk.f32.mxu1 %vm15561_vm2, %v15545_v35 }
 0x64a   : > { %21238 = vmatmul.mubr.msk.f32.vlgmr.msra.gmra.mrb[26].mxu1 %vm15561_vm2, %v15546_v31 }
 0x64b   : > { %21689 = vmatpush3.bf16.msra.mxu1 %v21686_v40  ;;  %21240 = vmatprep.mubr.msk.f32.mxu1 %vm15561_vm2, %v15547_v32 }
 0x64c   : > { %21691 = vmatprep.subr.bf16.mxu1 %v24774_v8 }
 0x64e   : > { %21241 = vmatmul.mubr.msk.f32.gmra.mrb[28].mxu1 %vm15561_vm2, %v15548_v34 }
 0x64f   : > { %21247 = vmatprep.mubr.msk.f32.mxu1 %vm15561_vm2, %v15545_v35 }
 0x652   : > { %21248 = vmatmul.mubr.msk.f32.vlgmr.msra.gmra.mrb[18].mxu1 %vm15561_vm2, %v15546_v31 }
 0x653   : > { %21693 = vmatpush3.bf16.msra.mxu1 %v24774_v8  ;;  %21250 = vmatprep.mubr.msk.f32.mxu1 %vm15561_vm2, %v15547_v32 }
 0x654   : > { %21695 = vmatprep.subr.bf16.mxu1 %v24930_v22 }
 0x656   : > { %21251 = vmatmul.mubr.msk.f32.gmra.mrb[20].mxu1 %vm15561_vm2, %v15548_v34 }
 0x657   : > { %21257 = vmatprep.mubr.msk.f32.mxu1 %vm15561_vm2, %v15549_v14 }
 0x65a   : > { %21258 = vmatmul.mubr.msk.f32.vlgmr.msra.gmra.mrb[22].mxu1 %vm15561_vm2, %v15550_v20 }
 0x65b   : > { %21697 = vmatpush3.bf16.msra.mxu1 %v24930_v22  ;;  %21260 = vmatprep.mubr.msk.f32.mxu1 %vm15561_vm2, %v15551_v30  ;;  %v25067_v22 = vpop.permute.xlu0 %18164 }
 0x65c   : > { %21699 = vmatprep.subr.bf16.mxu1 %v21698_v36 }
 0x65e   : > { %21261 = vmatmul.mubr.msk.f32.gmra.mrb[24].mxu1 %vm15561_vm2, %v15552_v37 }
 0x65f   : > { %21267 = vmatprep.mubr.msk.f32.mxu1 %vm15561_vm2, %v15549_v14 }
 0x662   : > { %21268 = vmatmul.mubr.msk.f32.vlgmr.msra.gmra.mrb[26].mxu1 %vm15561_vm2, %v15550_v20 }
 0x663   : > { %21701 = vmatpush3.bf16.msra.mxu1 %v21698_v36  ;;  %21270 = vmatprep.mubr.msk.f32.mxu1 %vm15561_vm2, %v15551_v30 }
 0x666   : > { %21271 = vmatmul.mubr.msk.f32.gmra.mrb[28].mxu1 %vm15561_vm2, %v15552_v37 }
 0x667   : > { %21277 = vmatprep.mubr.msk.f32.mxu1 %vm15561_vm2, %v15549_v14 }
 0x66a   : > { %21278 = vmatmul.mubr.msk.f32.vlgmr.msra.gmra.mrb[18].mxu1 %vm15561_vm2, %v15550_v20  ;;  %v18195_v20 = vld [vmem:[%s25174_s4] sm:$0x3f] }
 0x66b   : > { %21280 = vmatprep.mubr.msk.f32.mxu1 %vm15561_vm2, %v15551_v30 }
 0x66e   : > { %21281 = vmatmul.mubr.msk.f32.gmra.mrb[20].mxu1 %vm15561_vm2, %v15552_v37 }
 0x677   : > { %v25054_v55 = vpop.permute.xlu1 %18128 }
 0x67f   : > { %v25062_v3 = vpop.permute.xlu1 %18168 }
 0x6bd   : > { %v25035_v21 = vpop.f32.mrb[66].mxu0 }
 0x6be   : > { %v25037_v16 = vpop.f32.mrb[67].mxu0 }
 0x6c1   : > { %v25039_v8 = vpop.f32.mrb[68].mxu0 }
 0x6c2   : > { %v25041_v58 = vpop.f32.mrb[69].mxu0 }
 0x6c5   : > { %v21049_v42 = vpop.f32.mrb[58].mxu0 }
 0x6c6   : > { %v15923_v10 = vpop.f32.mrb[59].mxu0 }
 0x6c9   : > { %v21052_v27 = vpop.f32.mrb[60].mxu0 }
 0x6ca   : > { %v15933_v60 = vpop.f32.mrb[61].mxu0 }
 0x6cd   : > { %v21059_v33 = vpop.f32.mrb[62].mxu0 }
 0x6ce   : > { %v16008_v24 = vpop.f32.mrb[63].mxu0 }
 0x6d1   : > { %v21062_v38 = vpop.f32.mrb[64].mxu0 }
 0x6d2   : > { %v16018_v44 = vpop.f32.mrb[65].mxu0 }
 0x72d   : > { %v21259_v59 = vpop.f32.mrb[22].mxu1 }
 0x72e   : > { %v21722_v52 = vadd.f32 %v21259_v59, %v21049_v42  ;;  %v17904_v61 = vpop.f32.mrb[23].mxu1 }
 0x72f   : > { %v21723_v2 = vadd.f32 %v17904_v61, %v15923_v10 }
 0x730   : > { %v18132_v45 = vadd.f32 %v21722_v52, %v25046_v48 }
 0x731   : > { %v18131_v41 = vadd.f32 %v21723_v2, %v25052_v51  ;;  %v21262_v4 = vpop.f32.mrb[24].mxu1 }
 0x732   : > { %vm18144_vm12 = vcmp.gt.f32.partialorder %v18132_v45, 0.0  ;;  %v18172_v11 = vmul.f32 %v25057_v18, %v18132_v45  ;;  %v21724_v62 = vadd.f32 %v21262_v4, %v21052_v27  ;;  %v17914_v6 = vpop.f32.mrb[25].mxu1 }
 0x733   : > { %vm18143_vm13 = vcmp.gt.f32.partialorder %v18131_v41, 0.0  ;;  %v18171_v46 = vmul.f32 %v25048_v49, %v18131_v41  ;;  %v21725_v5 = vadd.f32 %v17914_v6, %v15933_v60 }
 0x734   : > { %v18184_v23 = vsel %vm18144_vm12, %v18132_v45, %v18172_v11  ;;  %v18134_v0 = vadd.f32 %v21724_v62, %v25054_v55 }
 0x735   : > { %v18183_v13 = vsel %vm18143_vm13, %v18131_v41, %v18171_v46  ;;  %v18133_v15 = vadd.f32 %v21725_v5, %v25050_v50  ;;  %v21269_v53 = vpop.f32.mrb[26].mxu1 }
 0x736   : > { %vm18146_vm3 = vcmp.gt.f32.partialorder %v18134_v0, 0.0  ;;  %v18174_v12 = vmul.f32 %v25062_v3, %v18134_v0  ;;  %v21726_v39 = vadd.f32 %v21269_v53, %v21059_v33  ;;  %v17989_v56 = vpop.f32.mrb[27].mxu1  ;;  %v21703_v26 = vpack.c.bf16 %v18184_v23, %v18183_v13 }
 0x737   : > { %vm18145_vm2 = vcmp.gt.f32.partialorder %v18133_v15, 0.0  ;;  %v18173_v25 = vmul.f32 %v25067_v22, %v18133_v15  ;;  %v21727_v19 = vadd.f32 %v17989_v56, %v16008_v24 }
 0x738   : > { %v18186_v9 = vsel %vm18146_vm3, %v18134_v0, %v18174_v12  ;;  %v18136_v54 = vadd.f32 %v21726_v39, %v25046_v48  ;;  %21704 = vmatpush3.bf16.msra.mxu0 %v21703_v26 }
 0x739   : > { %v18185_v35 = vsel %vm18145_vm2, %v18133_v15, %v18173_v25  ;;  %v18135_v7 = vadd.f32 %v21727_v19, %v25052_v51  ;;  %v21272_v29 = vpop.f32.mrb[28].mxu1  ;;  %21705 = vmatprep.subr.bf16.mxu0 %v22405_v47 }
 0x73a   : > { %vm18148_vm10 = vcmp.gt.f32.partialorder %v18136_v54, 0.0  ;;  %v18176_v31 = vmul.f32 %v25057_v18, %v18136_v54  ;;  %v21728_v32 = vadd.f32 %v21272_v29, %v21062_v38  ;;  %v17999_v40 = vpop.f32.mrb[29].mxu1  ;;  %v21706_v34 = vpack.c.bf16 %v18186_v9, %v18185_v35 }
 0x73b   : > { %vm18147_vm11 = vcmp.gt.f32.partialorder %v18135_v7, 0.0  ;;  %v18175_v17 = vmul.f32 %v25048_v49, %v18135_v7  ;;  %v21729_v14 = vadd.f32 %v17999_v40, %v16018_v44 }
 0x73c   : > { %v18188_v57 = vsel %vm18148_vm10, %v18136_v54, %v18176_v31  ;;  %v18138_v63 = vadd.f32 %v21728_v32, %v25054_v55  ;;  %21707 = vmatpush3.bf16.msra.mxu0 %v21706_v34 }
 0x73d   : > { %v18187_v30 = vsel %vm18147_vm11, %v18135_v7, %v18175_v17  ;;  %v18137_v36 = vadd.f32 %v21729_v14, %v25050_v50  ;;  %v21279_v37 = vpop.f32.mrb[18].mxu1  ;;  %21708 = vmatprep.subr.bf16.mxu0 %v22405_v47 }
 0x73e   : > { %vm18150_vm15 = vcmp.gt.f32.partialorder %v18138_v63, 0.0  ;;  %v18178_v42 = vmul.f32 %v25062_v3, %v18138_v63  ;;  %v21730_v10 = vadd.f32 %v21279_v37, %v25035_v21  ;;  %v18080_v27 = vpop.f32.mrb[19].mxu1  ;;  %v21709_v60 = vpack.c.bf16 %v18188_v57, %v18187_v30 }
 0x73f   : > { %vm18149_vm0 = vcmp.gt.f32.partialorder %v18137_v36, 0.0  ;;  %v18177_v33 = vmul.f32 %v25067_v22, %v18137_v36  ;;  %v21731_v24 = vadd.f32 %v18080_v27, %v25037_v16  ;;  %21292 = vmatmul.mubr.msk.f32.vlgmr.msra.gmra.mrb[70].mxu0 %vm18202_vm14, %v18195_v20 }
 0x740   : > { %v18190_v28 = vsel %vm18150_vm15, %v18138_v63, %v18178_v42  ;;  %v18140_v1 = vadd.f32 %v21730_v10, %v25046_v48  ;;  %21710 = vmatpush3.bf16.msra.mxu0 %v21709_v60  ;;  %21302 = vmatprep.mubr.msk.f32.mxu0 %vm22406_vm8, %v22403_v43 }
 0x741   : > { %v18189_v38 = vsel %vm18149_vm0, %v18137_v36, %v18177_v33  ;;  %v18139_v44 = vadd.f32 %v21731_v24, %v25052_v51  ;;  %v21282_v21 = vpop.f32.mrb[20].mxu1  ;;  %21711 = vmatprep.subr.bf16.mxu0 %v22405_v47 }
 0x742   : > { %vm18152_vm4 = vcmp.gt.f32.partialorder %v18140_v1, 0.0  ;;  %v18180_v59 = vmul.f32 %v25057_v18, %v18140_v1  ;;  %v21732_v16 = vadd.f32 %v21282_v21, %v25039_v8  ;;  %v18090_v52 = vpop.f32.mrb[21].mxu1  ;;  %v21712_v61 = vpack.c.bf16 %v18190_v28, %v18189_v38 }
 0x743   : > { %vm18151_vm5 = vcmp.gt.f32.partialorder %v18139_v44, 0.0  ;;  %v18179_v48 = vmul.f32 %v25048_v49, %v18139_v44  ;;  %v21733_v2 = vadd.f32 %v18090_v52, %v25041_v58 }
 0x744   : > { %v18192_v45 = vsel %vm18152_vm4, %v18140_v1, %v18180_v59  ;;  %v18142_v41 = vadd.f32 %v21732_v16, %v25054_v55  ;;  %21713 = vmatpush3.bf16.msra.mxu0 %v21712_v61  ;;  %v18200_v55 = vpop.permute.xlu0 %18199 }
 0x745   : > { %v18191_v51 = vsel %vm18151_vm5, %v18139_v44, %v18179_v48  ;;  %v18141_v4 = vadd.f32 %v21733_v2, %v25050_v50  ;;  %21714 = vmatprep.subr.bf16.mxu0 %v22405_v47 }
 0x746   : > { %vm18154_vm6 = vcmp.gt.f32.partialorder %v18142_v41, 0.0  ;;  %v18182_v8 = vmul.f32 %v25062_v3, %v18142_v41  ;;  %v21715_v18 = vpack.c.bf16 %v18192_v45, %v18191_v51 }
 0x747   : > { %vm18153_vm7 = vcmp.gt.f32.partialorder %v18141_v4, 0.0  ;;  %v18181_v11 = vmul.f32 %v25067_v22, %v18141_v4  ;;  %21303 = vmatmul.mubr.msk.f32.vlgmr.msra.gmra.mrb[72].mxu0 %vm18202_vm14, %v18195_v20 }
 0x748   : > { %v18194_v58 = vsel %vm18154_vm6, %v18142_v41, %v18182_v8  ;;  %21716 = vmatpush3.bf16.msra.mxu0 %v21715_v18  ;;  %21313 = vmatprep.mubr.msk.f32.mxu0 %vm22406_vm8, %v22403_v43  ;;  %vm18477_vm8 = vcmask 17408  }
 0x749   : > { %v18193_v49 = vsel %vm18153_vm7, %v18141_v4, %v18181_v11  ;;  %21717 = vmatprep.subr.bf16.mxu0 %v22405_v47 }
 0x74a   : > { %v21718_v50 = vpack.c.bf16 %v18194_v58, %v18193_v49 }
 0x74c   : > { %21719 = vmatpush3.bf16.msra.mxu0 %v21718_v50 }
 0x74f   : > { %21314 = vmatmul.mubr.msk.f32.vlgmr.msra.gmra.mrb[74].mxu0 %vm18202_vm14, %v18195_v20 }
 0x812   : > { %v18272_v62 = vpop.f32.mrb[70].mxu0 }
 0x813   : > { %v18273_v6 = vadd.f32 %v18272_v62, %v18200_v55  ;;  %v21293_v43 = vpop.f32.mrb[71].mxu0 }
 0x815   : > { %v18419_v46 = vrot.slane %v18273_v6, 1  ;;  %v18428_v5 = vrot.slane %v18273_v6, 7  ;;  %18474 = vst.msk [vmem:[%s25109_s15] sm:$0xf] %vm18473_vm9, %v18273_v6 }
 0x817   : > { %v18425_v47 = vsub.f32 %v18273_v6, %v18419_v46  ;;  %v18434_v3 = vsub.f32 %v18273_v6, %v18428_v5 }
 0x819   : > { %v18440_v23 = vrot.slane %v18425_v47, 4  ;;  %v18449_v0 = vrot.slane %v18434_v3, 4 }
 0x81a   : > { %v18342_v13 = vpop.f32.mrb[72].mxu0 }
 0x81b   : > { %v18455_v15 = vsel %vm772_vm1, %v18440_v23, %v18449_v0  ;;  %v18343_v53 = vadd.f32 %v18342_v13, %v18200_v55  ;;  %v21304_v12 = vpop.f32.mrb[73].mxu0 }
 0x81c   : > { %v18458_v39 = vsub.f32 0.0, %v18455_v15 }
 0x81d   : > { %v18420_v22 = vrot.slane %v18343_v53, 1  ;;  %v18429_v56 = vrot.slane %v18343_v53, 7  ;;  %18475 = vst.msk [vmem:[%s25109_s15 + $0x4] sm:$0xf] %vm18473_vm9, %v18343_v53 }
 0x81e   : > { %v18461_v26 = vmul.f32 1.442695, %v18458_v39 }
 0x81f   : > { %v18426_v25 = vsub.f32 %v18343_v53, %v18420_v22  ;;  %v18435_v19 = vsub.f32 %v18343_v53, %v18429_v56 }
 0x820   : > { %22322 = vpow2.f32 %v18461_v26 }
 0x821   : > { %v18441_v9 = vrot.slane %v18426_v25, 4  ;;  %v18450_v54 = vrot.slane %v18435_v19, 4 }
 0x822   : > { %v18412_v35 = vpop.f32.mrb[74].mxu0 }
 0x823   : > { %v18456_v7 = vsel %vm772_vm1, %v18441_v9, %v18450_v54  ;;  %v18413_v29 = vadd.f32 %v18412_v35, %v18200_v55  ;;  %v21315_v31 = vpop.f32.mrb[75].mxu0 }
 0x824   : > { %v18459_v32 = vsub.f32 0.0, %v18456_v7 }
 0x825   : > { %v18421_v40 = vrot.slane %v18413_v29, 1  ;;  %v18430_v34 = vrot.slane %v18413_v29, 7  ;;  %18476 = vst.msk [vmem:[%s25109_s15 + $0x8] sm:$0xf] %vm18473_vm9, %v18413_v29 }
 0x826   : > { %v18463_v17 = vmul.f32 1.442695, %v18459_v32 }
 0x827   : > { %v18427_v14 = vsub.f32 %v18413_v29, %v18421_v40  ;;  %v18436_v57 = vsub.f32 %v18413_v29, %v18430_v34 }
 0x828   : > { %22324 = vpow2.f32 %v18463_v17 }
 0x829   : > { %v18442_v63 = vrot.slane %v18427_v14, 4  ;;  %v18451_v20 = vrot.slane %v18436_v57, 4 }
 0x82a   : > { %v22323_v30 = vpop.eup %22322 }
 0x82b   : > { %v18467_v36 = vadd.f32 1.0, %v22323_v30  ;;  %v18457_v37 = vsel %vm772_vm1, %v18442_v63, %v18451_v20 }
 0x82c   : > { %v18460_v42 = vsub.f32 0.0, %v18457_v37 }
 0x82d   : > { %22326 = vrcp.f32 %v18467_v36 }
 0x82e   : > { %v18465_v10 = vmul.f32 1.442695, %v18460_v42 }
 0x830   : > { %22328 = vpow2.f32 %v18465_v10 }
 0x832   : > { %v22325_v27 = vpop.eup %22324 }
 0x833   : > { %v18468_v60 = vadd.f32 1.0, %v22325_v27 }
 0x835   : > { %22330 = vrcp.f32 %v18468_v60 }
 0x837   : > { %v22327_v33 = vpop.eup %22326 }
 0x838   : > { %18478 = vst.msk [vmem:[%s279_s17] sm:$0x3] %vm18477_vm8, %v22327_v33 }
 0x83a   : > { %v22329_v24 = vpop.eup %22328 }
 0x83b   : > { %v18469_v28 = vadd.f32 1.0, %v22329_v24 }
 0x83d   : > { %22332 = vrcp.f32 %v18469_v28 }
 0x83f   : > { %v22331_v1 = vpop.eup %22330 }
 0x840   : > { %18479 = vst.msk [vmem:[%s279_s17 + $0x2] sm:$0x3] %vm18477_vm8, %v22331_v1 }
 0x847   : > { %v22333_v38 = vpop.eup %22332 }
 0x848   : > { %18480 = vst.msk [vmem:[%s279_s17 + $0x4] sm:$0x3] %vm18477_vm8, %v22333_v38 }
 0x849   : > { %22347 = shalt.err (!%p22344_p3)
}
 0x84a   : > { %s22348_s14 = scalar_lea.hbm %s25125_s29, 96  ;;  %s22352_s16 = scalar_lea.hbm %s25177_s7, 192 }
 0x84b   : > { %p22349_p4 = scmp.ne.s32.totalorder %s25125_s29, %s22348_s14  ;;  %p22353_p9 = scmp.lt.u32.totalorder %s25125_s29, %s25177_s7 }
 0x84c   : > { %p22354_p10 = scmp.lt.u32.totalorder %s22352_s16, %s22348_s14  ;;  %p22356_p12 = scmp.lt.u32.totalorder %s22348_s14, %s25125_s29 }
 0x84d   : > { %p22350_p7 = pnand %p22349_p4, %p22495_p5 }
 0x84e   : > { %p22355_p11 = por %p22354_p10, %p22353_p9 }
 0x84f   : > { %p22351_p8 = pneg %p22350_p7 }
 0x850   : > { %p22357_p13 = por %p22356_p12, %p22355_p11 }
 0x852   : > { %p22358_p0 = pnand %p22357_p13, %p22351_p8 }
 0x854   : > { %22361 = shalt.err (!%p22358_p0)
}
 0x855   : > { %s22415_s22 = smov 32   ;;  %s22416_s23 = smov 2  }
 0x856   : > { %22124 = dma.vmem_to_hbm [thread:$0]  (%p22495_p5), %s25127_s19, 96, %s25125_s29, %s25129_s8, %s22415_s22, %s22415_s22, %s22416_s23  }
 0x857 PF: > { %p22130_p1 = scmp.ge.s32.totalorder %s22396_s27, 2  ;;  %s18526_s20 = sand.u32 1, %s22384_s24  }
 0x858   : > { %s18527_s28 = scalar_lea.sflag [#allocation3], %s18526_s20 }
 0x859   : > { %p22127_p2 = pnand %p22130_p1, %p22499_p6 }
 0x85b   : > { %22379 = dma.done.wait (!%p22127_p2), %s18527_s28, 96  }
 0x85c   : > { %22381 = vsyncadd (!%p22127_p2), %s18527_s28, 4294967200  ;;  %p18_p3 = scmp.ge.s32.totalorder %s22482_s30, 4   ;;  %s25184_s24 = smov %s22388_s25 }
 0x85d   : > { %s25185_s25 = smov %s22392_s26  ;;  %s25186_s26 = smov %s22493_s10 }
 0x85e   : > { %s25187_s27 = smov %s22482_s30  ;;  %20 = sbr.rel (!%p18_p3) target bundleno = 3 (0x3), region = 91 }
 0x865   :  { %18532 = vsyncpa [#allocation3], 1 }
 0x866   :  { %18534 = vsyncpa [#allocation3 + $0x1], 1 }

</bundles_post_ra>
